<compile_context>
chip_gen: v7x
topology: tpu7x:2x2x1
jax: 0.10.0
libtpu: 0.0.40
codegen_flags: <defaults>
</compile_context>

<pallas_src>
import jax
import jax.numpy as jnp
from jax.experimental import pallas as pl
from jax.experimental.pallas import tpu as pltpu


_LEAKY_SLOPE = 0.2
_DROPOUT_P = 0.3
_DROPOUT_THRESH = int(round(_DROPOUT_P * (1 << 24)))   # 24-bit threshold
_DROPOUT_SCALE = 1.0 / (1.0 - _DROPOUT_P)


def _uniform_u24(shape, seed_u32, row0_u32, salt):
    """Stateless counter-based PRNG (murmur3-style finalizer) -> 24 uniform bits.

    Pure jnp integer ops so it lowers on the TPU VPU and in interpret mode
    (no dependence on pltpu.prng_seed / prng_random_bits).
    """
    rows = jax.lax.broadcasted_iota(jnp.int32, shape, 0).astype(jnp.uint32) + row0_u32
    cols = jax.lax.broadcasted_iota(jnp.int32, shape, 1).astype(jnp.uint32)
    h = seed_u32 * jnp.uint32(0x9E3779B1)
    h = h ^ (rows * jnp.uint32(0x85EBCA77))
    h = h ^ (cols * jnp.uint32(0xC2B2AE3D))
    h = h ^ jnp.uint32((salt * 0x27D4EB2F) & 0xFFFFFFFF)
    # murmur3 fmix32 finalizer
    h = h ^ (h >> 16)
    h = h * jnp.uint32(0x85EBCA6B)
    h = h ^ (h >> 13)
    h = h * jnp.uint32(0xC2B2AE35)
    h = h ^ (h >> 16)
    return h >> 8  # uniform in [0, 2^24)


def _leaky_relu_dropout(h, seed_u32, row0_u32, salt):
    h = jnp.where(h > 0, h, _LEAKY_SLOPE * h)
    u24 = _uniform_u24(h.shape, seed_u32, row0_u32, salt)
    keep = u24.astype(jnp.int32) >= jnp.int32(_DROPOUT_THRESH)
    return jnp.where(keep, h * _DROPOUT_SCALE, 0.0)


def discriminator_kernel(seed_ref,
                         x_ref,
                         w1_ref, b1_ref,
                         w2_ref, b2_ref,
                         w3_ref, b3_ref,
                         w4_ref, b4_ref,
                         o_ref):
    seed_u32 = seed_ref[0].astype(jnp.uint32)
    tb = x_ref.shape[0]
    row0 = (pl.program_id(0) * tb).astype(jnp.uint32)   # global row offset of this tile

    # fc1 -> leaky_relu -> dropout   (bf16 x bf16 matmul, f32 accumulate)
    h = jnp.dot(x_ref[...], w1_ref[...], preferred_element_type=jnp.float32) + b1_ref[...]
    h = _leaky_relu_dropout(h, seed_u32, row0, 1).astype(jnp.bfloat16)

    # fc2 -> leaky_relu -> dropout
    h = jnp.dot(h, w2_ref[...], preferred_element_type=jnp.float32) + b2_ref[...]
    h = _leaky_relu_dropout(h, seed_u32, row0, 2).astype(jnp.bfloat16)

    # fc3 -> leaky_relu -> dropout
    h = jnp.dot(h, w3_ref[...], preferred_element_type=jnp.float32) + b3_ref[...]
    h = _leaky_relu_dropout(h, seed_u32, row0, 3).astype(jnp.bfloat16)

    # fc4 (output lane-padded to 128; real logit in column 0) + sigmoid
    logits = jnp.dot(h, w4_ref[...], preferred_element_type=jnp.float32) + b4_ref[...]
    o_ref[...] = 1.0 / (1.0 + jnp.exp(-logits))


def init_discriminator_params(key, input_dim):
    """PyTorch nn.Linear default init: U(-1/sqrt(fan_in), 1/sqrt(fan_in)).

    Weights stored as (d_in, d_out) == torch weight.T, biases as (1, d_out)."""
    dims = [(input_dim, 1024), (1024, 512), (512, 256), (256, 1)]
    params = []
    for (d_in, d_out) in dims:
        key, kw, kb = jax.random.split(key, 3)
        bound = 1.0 / (d_in ** 0.5)
        w = jax.random.uniform(kw, (d_in, d_out), jnp.float32, -bound, bound)
        b = jax.random.uniform(kb, (1, d_out), jnp.float32, -bound, bound)
        params += [w, b]
    return tuple(params)


def discriminator_forward(x, params, seed, *, tb=256):
    """x: (B, D) float32. params: torch-layout (W.T, b) per layer. seed: (1,) int32."""
    w1, b1, w2, b2, w3, b3, w4, b4 = params
    B, D = x.shape
    H1, H2, H3 = w1.shape[1], w2.shape[1], w3.shape[1]

    Dp = pl.cdiv(D, 128) * 128       # lane-pad input features
    NOUT = 128                       # lane-pad fc4 output (real logit in col 0)

    # Batch tile: design point 256 (fills MXU M on v6e/v7x), shrink for tiny batches.
    tb = max(8, min(int(tb), pl.cdiv(B, 8) * 8))
    tb = (tb // 8) * 8
    Bp = pl.cdiv(B, tb) * tb

    bf16 = jnp.bfloat16
    xp = jnp.pad(x.astype(bf16), ((0, Bp - B), (0, Dp - D)))
    w1p = jnp.pad(w1.astype(bf16), ((0, Dp - D), (0, 0)))
    w2p = w2.astype(bf16)
    w3p = w3.astype(bf16)
    w4p = jnp.pad(w4.astype(bf16), ((0, 0), (0, NOUT - w4.shape[1])))
    b1p = b1.astype(jnp.float32)
    b2p = b2.astype(jnp.float32)
    b3p = b3.astype(jnp.float32)
    b4p = jnp.pad(b4.astype(jnp.float32), ((0, 0), (0, NOUT - b4.shape[1])))

    def const(i, seed_ref):          # weights/biases: VMEM-resident across batch tiles
        return (0, 0)

    in_specs = [
        pl.BlockSpec((tb, Dp), lambda i, seed_ref: (i, 0)),   # x (blocked over batch)
        pl.BlockSpec((Dp, H1), const), pl.BlockSpec((1, H1), const),
        pl.BlockSpec((H1, H2), const), pl.BlockSpec((1, H2), const),
        pl.BlockSpec((H2, H3), const), pl.BlockSpec((1, H3), const),
        pl.BlockSpec((H3, NOUT), const), pl.BlockSpec((1, NOUT), const),
    ]
    out_specs = pl.BlockSpec((tb, NOUT), lambda i, seed_ref: (i, 0))

    fn = pl.pallas_call(
        discriminator_kernel,
        out_shape=jax.ShapeDtypeStruct((Bp, NOUT), jnp.float32),
        grid_spec=pltpu.PrefetchScalarGridSpec(
            num_scalar_prefetch=1,          # seed lands in SMEM
            grid=(Bp // tb,),
            in_specs=in_specs,
            out_specs=out_specs,
        ),
        compiler_params=pltpu.CompilerParams(
            dimension_semantics=("parallel",),   # shard batch tiles across cores
        ),
    )
    out = fn(seed, xp, w1p, b1p, w2p, b2p, w3p, b3p, w4p, b4p)
    return out[:B, :1]


if __name__ == "__main__":
    input_dim = 64
    batch = 32

    key = jax.random.PRNGKey(0)
    key, kx = jax.random.split(key)
    x = jax.random.normal(kx, (batch, input_dim), dtype=jnp.float32)

    params = init_discriminator_params(key, input_dim)
    seed = jnp.array([42], dtype=jnp.int32)

    # tb=16 so the smoke test exercises a 2-step grid with VMEM-resident weights.
    out = discriminator_forward(x, params, seed, tb=16)
    out = jax.block_until_ready(out)

    assert out.shape == (batch, 1)
    assert bool(jnp.all(jnp.isfinite(out)))
    assert bool(jnp.all((out >= 0.0) & (out <= 1.0)))
    print("KERNEL_OK")
</pallas_src>

<mosaic_0001>
module attributes {stable_mosaic.version = 11 : i64} {
  func.func @discriminator_kernel(%arg0: i32, %arg1: memref<1xi32, #tpu.memory_space<smem>>, %arg2: memref<16x128xbf16, #tpu.memory_space<vmem>>, %arg3: memref<128x1024xbf16, #tpu.memory_space<vmem>>, %arg4: memref<1x1024xf32, #tpu.memory_space<vmem>>, %arg5: memref<1024x512xbf16, #tpu.memory_space<vmem>>, %arg6: memref<1x512xf32, #tpu.memory_space<vmem>>, %arg7: memref<512x256xbf16, #tpu.memory_space<vmem>>, %arg8: memref<1x256xf32, #tpu.memory_space<vmem>>, %arg9: memref<256x128xbf16, #tpu.memory_space<vmem>>, %arg10: memref<1x128xf32, #tpu.memory_space<vmem>>, %arg11: memref<16x128xf32, #tpu.memory_space<vmem>>) attributes {dimension_semantics = [#tpu.dimension_semantics<parallel>], iteration_bounds = array<i64: 2>, scalar_prefetch = 1 : i64, scratch_operands = 0 : i64, tpu.core_type = #tpu.core_type<tc>, window_params = [{transform_indices = @transform_0, window_bounds = array<i64: 16, 128>}, {pipeline_mode = #tpu.pipeline_mode<synchronous>, transform_indices = @transform_1, window_bounds = array<i64: 128, 1024>}, {pipeline_mode = #tpu.pipeline_mode<synchronous>, transform_indices = @transform_2, window_bounds = array<i64: 1, 1024>}, {pipeline_mode = #tpu.pipeline_mode<synchronous>, transform_indices = @transform_3, window_bounds = array<i64: 1024, 512>}, {pipeline_mode = #tpu.pipeline_mode<synchronous>, transform_indices = @transform_4, window_bounds = array<i64: 1, 512>}, {pipeline_mode = #tpu.pipeline_mode<synchronous>, transform_indices = @transform_5, window_bounds = array<i64: 512, 256>}, {pipeline_mode = #tpu.pipeline_mode<synchronous>, transform_indices = @transform_6, window_bounds = array<i64: 1, 256>}, {pipeline_mode = #tpu.pipeline_mode<synchronous>, transform_indices = @transform_7, window_bounds = array<i64: 256, 128>}, {pipeline_mode = #tpu.pipeline_mode<synchronous>, transform_indices = @transform_8, window_bounds = array<i64: 1, 128>}, {transform_indices = @transform_9, window_bounds = array<i64: 16, 128>}]} {
    %c0 = arith.constant 0 : index
    %0 = memref.load %arg1[%c0] : memref<1xi32, #tpu.memory_space<smem>>
    %c16_i32 = arith.constant 16 : i32
    %1 = arith.muli %arg0, %c16_i32 : i32
    %c0_0 = arith.constant 0 : index
    %c0_1 = arith.constant 0 : index
    %2 = vector.load %arg2[%c0_0, %c0_1] : memref<16x128xbf16, #tpu.memory_space<vmem>>, vector<16x128xbf16>
    %c0_2 = arith.constant 0 : index
    %c0_3 = arith.constant 0 : index
    %3 = vector.load %arg3[%c0_2, %c0_3] : memref<128x1024xbf16, #tpu.memory_space<vmem>>, vector<128x1024xbf16>
    %cst = arith.constant dense<0.000000e+00> : vector<16x1024xf32>
    %4 = tpu.matmul %2, %3, %cst {dimension_numbers = #tpu.dot_dimension_numbers<[1], [0], [0], [1], [0, 0, 1, 1], [], []>} : vector<16x128xbf16>, vector<128x1024xbf16>, vector<16x1024xf32> -> vector<16x1024xf32>
    %c0_4 = arith.constant 0 : index
    %c0_5 = arith.constant 0 : index
    %5 = vector.load %arg4[%c0_4, %c0_5] : memref<1x1024xf32, #tpu.memory_space<vmem>>, vector<1x1024xf32>
    %6 = vector.broadcast %5 : vector<1x1024xf32> to vector<16x1024xf32>
    %7 = arith.addf %4, %6 : vector<16x1024xf32>
    %cst_6 = arith.constant 0.000000e+00 : f32
    %8 = vector.broadcast %cst_6 : f32 to vector<16x1024xf32>
    %9 = arith.cmpf ogt, %7, %8 : vector<16x1024xf32>
    %cst_7 = arith.constant 2.000000e-01 : f32
    %10 = vector.broadcast %cst_7 : f32 to vector<16x1024xf32>
    %11 = arith.mulf %10, %7 : vector<16x1024xf32>
    %12 = arith.select %9, %7, %11 : vector<16x1024xi1>, vector<16x1024xf32>
    %13 = tpu.iota {dimensions = array<i32: 0>} : vector<16x1024xi32>
    %14 = vector.broadcast %1 : i32 to vector<16x1024xi32>
    %15 = arith.addi %13, %14 : vector<16x1024xi32>
    %16 = tpu.iota {dimensions = array<i32: 1>} : vector<16x1024xi32>
    %c-1640531535_i32 = arith.constant -1640531535 : i32
    %17 = arith.muli %0, %c-1640531535_i32 : i32
    %c-2048144777_i32 = arith.constant -2048144777 : i32
    %18 = vector.broadcast %c-2048144777_i32 : i32 to vector<16x1024xi32>
    %19 = arith.muli %15, %18 : vector<16x1024xi32>
    %20 = vector.broadcast %17 : i32 to vector<16x1024xi32>
    %21 = arith.xori %20, %19 : vector<16x1024xi32>
    %c-1028477379_i32 = arith.constant -1028477379 : i32
    %22 = vector.broadcast %c-1028477379_i32 : i32 to vector<16x1024xi32>
    %23 = arith.muli %16, %22 : vector<16x1024xi32>
    %24 = arith.xori %21, %23 : vector<16x1024xi32>
    %c668265263_i32 = arith.constant 668265263 : i32
    %25 = vector.broadcast %c668265263_i32 : i32 to vector<16x1024xi32>
    %26 = arith.xori %24, %25 : vector<16x1024xi32>
    %c16_i32_8 = arith.constant 16 : i32
    %27 = vector.broadcast %c16_i32_8 : i32 to vector<16x1024xi32>
    %28 = arith.shrui %26, %27 : vector<16x1024xi32>
    %29 = arith.xori %26, %28 : vector<16x1024xi32>
    %c-2048144789_i32 = arith.constant -2048144789 : i32
    %30 = vector.broadcast %c-2048144789_i32 : i32 to vector<16x1024xi32>
    %31 = arith.muli %29, %30 : vector<16x1024xi32>
    %c13_i32 = arith.constant 13 : i32
    %32 = vector.broadcast %c13_i32 : i32 to vector<16x1024xi32>
    %33 = arith.shrui %31, %32 : vector<16x1024xi32>
    %34 = arith.xori %31, %33 : vector<16x1024xi32>
    %c-1028477387_i32 = arith.constant -1028477387 : i32
    %35 = vector.broadcast %c-1028477387_i32 : i32 to vector<16x1024xi32>
    %36 = arith.muli %34, %35 : vector<16x1024xi32>
    %c16_i32_9 = arith.constant 16 : i32
    %37 = vector.broadcast %c16_i32_9 : i32 to vector<16x1024xi32>
    %38 = arith.shrui %36, %37 : vector<16x1024xi32>
    %39 = arith.xori %36, %38 : vector<16x1024xi32>
    %c8_i32 = arith.constant 8 : i32
    %40 = vector.broadcast %c8_i32 : i32 to vector<16x1024xi32>
    %41 = arith.shrui %39, %40 : vector<16x1024xi32>
    %c5033165_i32 = arith.constant 5033165 : i32
    %42 = vector.broadcast %c5033165_i32 : i32 to vector<16x1024xi32>
    %43 = arith.cmpi sge, %41, %42 : vector<16x1024xi32>
    %cst_10 = arith.constant 1.42857146 : f32
    %44 = vector.broadcast %cst_10 : f32 to vector<16x1024xf32>
    %45 = arith.mulf %12, %44 : vector<16x1024xf32>
    %cst_11 = arith.constant 0.000000e+00 : f32
    %46 = vector.broadcast %cst_11 : f32 to vector<16x1024xf32>
    %47 = arith.select %43, %45, %46 : vector<16x1024xi1>, vector<16x1024xf32>
    %48 = arith.truncf %47 : vector<16x1024xf32> to vector<16x1024xbf16>
    %c0_12 = arith.constant 0 : index
    %c0_13 = arith.constant 0 : index
    %49 = vector.load %arg5[%c0_12, %c0_13] : memref<1024x512xbf16, #tpu.memory_space<vmem>>, vector<1024x512xbf16>
    %cst_14 = arith.constant dense<0.000000e+00> : vector<16x512xf32>
    %50 = tpu.matmul %48, %49, %cst_14 {dimension_numbers = #tpu.dot_dimension_numbers<[1], [0], [0], [1], [0, 0, 1, 1], [], []>} : vector<16x1024xbf16>, vector<1024x512xbf16>, vector<16x512xf32> -> vector<16x512xf32>
    %c0_15 = arith.constant 0 : index
    %c0_16 = arith.constant 0 : index
    %51 = vector.load %arg6[%c0_15, %c0_16] : memref<1x512xf32, #tpu.memory_space<vmem>>, vector<1x512xf32>
    %52 = vector.broadcast %51 : vector<1x512xf32> to vector<16x512xf32>
    %53 = arith.addf %50, %52 : vector<16x512xf32>
    %cst_17 = arith.constant 0.000000e+00 : f32
    %54 = vector.broadcast %cst_17 : f32 to vector<16x512xf32>
    %55 = arith.cmpf ogt, %53, %54 : vector<16x512xf32>
    %cst_18 = arith.constant 2.000000e-01 : f32
    %56 = vector.broadcast %cst_18 : f32 to vector<16x512xf32>
    %57 = arith.mulf %56, %53 : vector<16x512xf32>
    %58 = arith.select %55, %53, %57 : vector<16x512xi1>, vector<16x512xf32>
    %59 = tpu.iota {dimensions = array<i32: 0>} : vector<16x512xi32>
    %60 = vector.broadcast %1 : i32 to vector<16x512xi32>
    %61 = arith.addi %59, %60 : vector<16x512xi32>
    %62 = tpu.iota {dimensions = array<i32: 1>} : vector<16x512xi32>
    %c-1640531535_i32_19 = arith.constant -1640531535 : i32
    %63 = arith.muli %0, %c-1640531535_i32_19 : i32
    %c-2048144777_i32_20 = arith.constant -2048144777 : i32
    %64 = vector.broadcast %c-2048144777_i32_20 : i32 to vector<16x512xi32>
    %65 = arith.muli %61, %64 : vector<16x512xi32>
    %66 = vector.broadcast %63 : i32 to vector<16x512xi32>
    %67 = arith.xori %66, %65 : vector<16x512xi32>
    %c-1028477379_i32_21 = arith.constant -1028477379 : i32
    %68 = vector.broadcast %c-1028477379_i32_21 : i32 to vector<16x512xi32>
    %69 = arith.muli %62, %68 : vector<16x512xi32>
    %70 = arith.xori %67, %69 : vector<16x512xi32>
    %c1336530526_i32 = arith.constant 1336530526 : i32
    %71 = vector.broadcast %c1336530526_i32 : i32 to vector<16x512xi32>
    %72 = arith.xori %70, %71 : vector<16x512xi32>
    %c16_i32_22 = arith.constant 16 : i32
    %73 = vector.broadcast %c16_i32_22 : i32 to vector<16x512xi32>
    %74 = arith.shrui %72, %73 : vector<16x512xi32>
    %75 = arith.xori %72, %74 : vector<16x512xi32>
    %c-2048144789_i32_23 = arith.constant -2048144789 : i32
    %76 = vector.broadcast %c-2048144789_i32_23 : i32 to vector<16x512xi32>
    %77 = arith.muli %75, %76 : vector<16x512xi32>
    %c13_i32_24 = arith.constant 13 : i32
    %78 = vector.broadcast %c13_i32_24 : i32 to vector<16x512xi32>
    %79 = arith.shrui %77, %78 : vector<16x512xi32>
    %80 = arith.xori %77, %79 : vector<16x512xi32>
    %c-1028477387_i32_25 = arith.constant -1028477387 : i32
    %81 = vector.broadcast %c-1028477387_i32_25 : i32 to vector<16x512xi32>
    %82 = arith.muli %80, %81 : vector<16x512xi32>
    %c16_i32_26 = arith.constant 16 : i32
    %83 = vector.broadcast %c16_i32_26 : i32 to vector<16x512xi32>
    %84 = arith.shrui %82, %83 : vector<16x512xi32>
    %85 = arith.xori %82, %84 : vector<16x512xi32>
    %c8_i32_27 = arith.constant 8 : i32
    %86 = vector.broadcast %c8_i32_27 : i32 to vector<16x512xi32>
    %87 = arith.shrui %85, %86 : vector<16x512xi32>
    %c5033165_i32_28 = arith.constant 5033165 : i32
    %88 = vector.broadcast %c5033165_i32_28 : i32 to vector<16x512xi32>
    %89 = arith.cmpi sge, %87, %88 : vector<16x512xi32>
    %cst_29 = arith.constant 1.42857146 : f32
    %90 = vector.broadcast %cst_29 : f32 to vector<16x512xf32>
    %91 = arith.mulf %58, %90 : vector<16x512xf32>
    %cst_30 = arith.constant 0.000000e+00 : f32
    %92 = vector.broadcast %cst_30 : f32 to vector<16x512xf32>
    %93 = arith.select %89, %91, %92 : vector<16x512xi1>, vector<16x512xf32>
    %94 = arith.truncf %93 : vector<16x512xf32> to vector<16x512xbf16>
    %c0_31 = arith.constant 0 : index
    %c0_32 = arith.constant 0 : index
    %95 = vector.load %arg7[%c0_31, %c0_32] : memref<512x256xbf16, #tpu.memory_space<vmem>>, vector<512x256xbf16>
    %cst_33 = arith.constant dense<0.000000e+00> : vector<16x256xf32>
    %96 = tpu.matmul %94, %95, %cst_33 {dimension_numbers = #tpu.dot_dimension_numbers<[1], [0], [0], [1], [0, 0, 1, 1], [], []>} : vector<16x512xbf16>, vector<512x256xbf16>, vector<16x256xf32> -> vector<16x256xf32>
    %c0_34 = arith.constant 0 : index
    %c0_35 = arith.constant 0 : index
    %97 = vector.load %arg8[%c0_34, %c0_35] : memref<1x256xf32, #tpu.memory_space<vmem>>, vector<1x256xf32>
    %98 = vector.broadcast %97 : vector<1x256xf32> to vector<16x256xf32>
    %99 = arith.addf %96, %98 : vector<16x256xf32>
    %cst_36 = arith.constant 0.000000e+00 : f32
    %100 = vector.broadcast %cst_36 : f32 to vector<16x256xf32>
    %101 = arith.cmpf ogt, %99, %100 : vector<16x256xf32>
    %cst_37 = arith.constant 2.000000e-01 : f32
    %102 = vector.broadcast %cst_37 : f32 to vector<16x256xf32>
    %103 = arith.mulf %102, %99 : vector<16x256xf32>
    %104 = arith.select %101, %99, %103 : vector<16x256xi1>, vector<16x256xf32>
    %105 = tpu.iota {dimensions = array<i32: 0>} : vector<16x256xi32>
    %106 = vector.broadcast %1 : i32 to vector<16x256xi32>
    %107 = arith.addi %105, %106 : vector<16x256xi32>
    %108 = tpu.iota {dimensions = array<i32: 1>} : vector<16x256xi32>
    %c-1640531535_i32_38 = arith.constant -1640531535 : i32
    %109 = arith.muli %0, %c-1640531535_i32_38 : i32
    %c-2048144777_i32_39 = arith.constant -2048144777 : i32
    %110 = vector.broadcast %c-2048144777_i32_39 : i32 to vector<16x256xi32>
    %111 = arith.muli %107, %110 : vector<16x256xi32>
    %112 = vector.broadcast %109 : i32 to vector<16x256xi32>
    %113 = arith.xori %112, %111 : vector<16x256xi32>
    %c-1028477379_i32_40 = arith.constant -1028477379 : i32
    %114 = vector.broadcast %c-1028477379_i32_40 : i32 to vector<16x256xi32>
    %115 = arith.muli %108, %114 : vector<16x256xi32>
    %116 = arith.xori %113, %115 : vector<16x256xi32>
    %c2004795789_i32 = arith.constant 2004795789 : i32
    %117 = vector.broadcast %c2004795789_i32 : i32 to vector<16x256xi32>
    %118 = arith.xori %116, %117 : vector<16x256xi32>
    %c16_i32_41 = arith.constant 16 : i32
    %119 = vector.broadcast %c16_i32_41 : i32 to vector<16x256xi32>
    %120 = arith.shrui %118, %119 : vector<16x256xi32>
    %121 = arith.xori %118, %120 : vector<16x256xi32>
    %c-2048144789_i32_42 = arith.constant -2048144789 : i32
    %122 = vector.broadcast %c-2048144789_i32_42 : i32 to vector<16x256xi32>
    %123 = arith.muli %121, %122 : vector<16x256xi32>
    %c13_i32_43 = arith.constant 13 : i32
    %124 = vector.broadcast %c13_i32_43 : i32 to vector<16x256xi32>
    %125 = arith.shrui %123, %124 : vector<16x256xi32>
    %126 = arith.xori %123, %125 : vector<16x256xi32>
    %c-1028477387_i32_44 = arith.constant -1028477387 : i32
    %127 = vector.broadcast %c-1028477387_i32_44 : i32 to vector<16x256xi32>
    %128 = arith.muli %126, %127 : vector<16x256xi32>
    %c16_i32_45 = arith.constant 16 : i32
    %129 = vector.broadcast %c16_i32_45 : i32 to vector<16x256xi32>
    %130 = arith.shrui %128, %129 : vector<16x256xi32>
    %131 = arith.xori %128, %130 : vector<16x256xi32>
    %c8_i32_46 = arith.constant 8 : i32
    %132 = vector.broadcast %c8_i32_46 : i32 to vector<16x256xi32>
    %133 = arith.shrui %131, %132 : vector<16x256xi32>
    %c5033165_i32_47 = arith.constant 5033165 : i32
    %134 = vector.broadcast %c5033165_i32_47 : i32 to vector<16x256xi32>
    %135 = arith.cmpi sge, %133, %134 : vector<16x256xi32>
    %cst_48 = arith.constant 1.42857146 : f32
    %136 = vector.broadcast %cst_48 : f32 to vector<16x256xf32>
    %137 = arith.mulf %104, %136 : vector<16x256xf32>
    %cst_49 = arith.constant 0.000000e+00 : f32
    %138 = vector.broadcast %cst_49 : f32 to vector<16x256xf32>
    %139 = arith.select %135, %137, %138 : vector<16x256xi1>, vector<16x256xf32>
    %140 = arith.truncf %139 : vector<16x256xf32> to vector<16x256xbf16>
    %c0_50 = arith.constant 0 : index
    %c0_51 = arith.constant 0 : index
    %141 = vector.load %arg9[%c0_50, %c0_51] : memref<256x128xbf16, #tpu.memory_space<vmem>>, vector<256x128xbf16>
    %cst_52 = arith.constant dense<0.000000e+00> : vector<16x128xf32>
    %142 = tpu.matmul %140, %141, %cst_52 {dimension_numbers = #tpu.dot_dimension_numbers<[1], [0], [0], [1], [0, 0, 1, 1], [], []>} : vector<16x256xbf16>, vector<256x128xbf16>, vector<16x128xf32> -> vector<16x128xf32>
    %c0_53 = arith.constant 0 : index
    %c0_54 = arith.constant 0 : index
    %143 = vector.load %arg10[%c0_53, %c0_54] : memref<1x128xf32, #tpu.memory_space<vmem>>, vector<1x128xf32>
    %144 = vector.broadcast %143 : vector<1x128xf32> to vector<16x128xf32>
    %145 = arith.addf %142, %144 : vector<16x128xf32>
    %cst_55 = arith.constant 0.000000e+00 : f32
    %146 = vector.broadcast %cst_55 : f32 to vector<16x128xf32>
    %147 = arith.subf %146, %145 : vector<16x128xf32>
    %148 = math.exp %147 : vector<16x128xf32>
    %cst_56 = arith.constant 1.000000e+00 : f32
    %149 = vector.broadcast %cst_56 : f32 to vector<16x128xf32>
    %150 = arith.addf %149, %148 : vector<16x128xf32>
    %cst_57 = arith.constant 1.000000e+00 : f32
    %151 = vector.broadcast %cst_57 : f32 to vector<16x128xf32>
    %152 = arith.divf %151, %150 : vector<16x128xf32>
    %c0_58 = arith.constant 0 : index
    %c0_59 = arith.constant 0 : index
    %153 = vector.load %arg11[%c0_58, %c0_59] : memref<16x128xf32, #tpu.memory_space<vmem>>, vector<16x128xf32>
    tpu.vector_store %arg11[%c0_58, %c0_59], %152 {strides = array<i32>} : memref<16x128xf32, #tpu.memory_space<vmem>>, vector<16x128xf32>,
    return
  }
  func.func @transform_0(%arg0: i32, %arg1: memref<1xi32, #tpu.memory_space<smem>>) -> (i32, i32) {
    %c0_i32 = arith.constant 0 : i32
    %c0_i32_0 = arith.constant 0 : i32
    return %arg0, %c0_i32 : i32, i32
  }
  func.func @transform_1(%arg0: i32, %arg1: memref<1xi32, #tpu.memory_space<smem>>) -> (i32, i32) {
    %c0_i32 = arith.constant 0 : i32
    %c0_i32_0 = arith.constant 0 : i32
    %c0_i32_1 = arith.constant 0 : i32
    return %c0_i32, %c0_i32_0 : i32, i32
  }
  func.func @transform_2(%arg0: i32, %arg1: memref<1xi32, #tpu.memory_space<smem>>) -> (i32, i32) {
    %c0_i32 = arith.constant 0 : i32
    %c0_i32_0 = arith.constant 0 : i32
    %c0_i32_1 = arith.constant 0 : i32
    return %c0_i32, %c0_i32_0 : i32, i32
  }
  func.func @transform_3(%arg0: i32, %arg1: memref<1xi32, #tpu.memory_space<smem>>) -> (i32, i32) {
    %c0_i32 = arith.constant 0 : i32
    %c0_i32_0 = arith.constant 0 : i32
    %c0_i32_1 = arith.constant 0 : i32
    return %c0_i32, %c0_i32_0 : i32, i32
  }
  func.func @transform_4(%arg0: i32, %arg1: memref<1xi32, #tpu.memory_space<smem>>) -> (i32, i32) {
    %c0_i32 = arith.constant 0 : i32
    %c0_i32_0 = arith.constant 0 : i32
    %c0_i32_1 = arith.constant 0 : i32
    return %c0_i32, %c0_i32_0 : i32, i32
  }
  func.func @transform_5(%arg0: i32, %arg1: memref<1xi32, #tpu.memory_space<smem>>) -> (i32, i32) {
    %c0_i32 = arith.constant 0 : i32
    %c0_i32_0 = arith.constant 0 : i32
    %c0_i32_1 = arith.constant 0 : i32
    return %c0_i32, %c0_i32_0 : i32, i32
  }
  func.func @transform_6(%arg0: i32, %arg1: memref<1xi32, #tpu.memory_space<smem>>) -> (i32, i32) {
    %c0_i32 = arith.constant 0 : i32
    %c0_i32_0 = arith.constant 0 : i32
    %c0_i32_1 = arith.constant 0 : i32
    return %c0_i32, %c0_i32_0 : i32, i32
  }
  func.func @transform_7(%arg0: i32, %arg1: memref<1xi32, #tpu.memory_space<smem>>) -> (i32, i32) {
    %c0_i32 = arith.constant 0 : i32
    %c0_i32_0 = arith.constant 0 : i32
    %c0_i32_1 = arith.constant 0 : i32
    return %c0_i32, %c0_i32_0 : i32, i32
  }
  func.func @transform_8(%arg0: i32, %arg1: memref<1xi32, #tpu.memory_space<smem>>) -> (i32, i32) {
    %c0_i32 = arith.constant 0 : i32
    %c0_i32_0 = arith.constant 0 : i32
    %c0_i32_1 = arith.constant 0 : i32
    return %c0_i32, %c0_i32_0 : i32, i32
  }
  func.func @transform_9(%arg0: i32, %arg1: memref<1xi32, #tpu.memory_space<smem>>) -> (i32, i32) {
    %c0_i32 = arith.constant 0 : i32
    %c0_i32_0 = arith.constant 0 : i32
    return %arg0, %c0_i32 : i32, i32
  }
}

</mosaic_0001>

<bundles_post_ra>
// kernel: tpu_custom_call.1
= control target key start
LH: loop header
LB: loop body
LE: loop exit
PB: predicated region body
PF: predicated region fallthrough
CT: control target
= control target key end

     0   :  { %s6247_s0 = inlined_call_operand.<no memory space> [shape: s32[1], index: 0, kind: input, shape index: {}]   ;;  %s6248_s1 = inlined_call_operand.hbm [shape: bf16[32,128], index: 1, kind: input, shape index: {}]   ;;  %s6249_s2 = inlined_call_operand.hbm [shape: bf16[128,1024], index: 2, kind: input, shape index: {}]   ;;  %s6250_s3 = inlined_call_operand.vmem [shape: f32[1,1024], index: 3, kind: input, shape index: {}]   ;;  %s6251_s4 = inlined_call_operand.hbm [shape: bf16[1024,512], index: 4, kind: input, shape index: {}]   ;;  %s6252_s5 = inlined_call_operand.vmem [shape: f32[1,512], index: 5, kind: input, shape index: {}]   ;;  %s6253_s6 = inlined_call_operand.hbm [shape: bf16[512,256], index: 6, kind: input, shape index: {}]   ;;  %s6254_s7 = inlined_call_operand.vmem [shape: f32[1,256], index: 7, kind: input, shape index: {}]   ;;  %s6255_s8 = inlined_call_operand.hbm [shape: bf16[256,128], index: 8, kind: input, shape index: {}]   ;;  %s6256_s9 = inlined_call_operand.vmem [shape: f32[1,128], index: 9, kind: input, shape index: {}]   ;;  %s6257_s10 = inlined_call_operand.hbm [shape: f32[32,128], index: 10, kind: output, shape index: {}]  }
   0x1   :  { %6263 = sst [smem:[#allocation20_spill]] %s6249_s2 }
   0x2   :  { %15 = sst [smem:[#allocation3]] %s6247_s0 }
   0x3   :  { %16 = vsyncpa [#allocation5], 0 }
   0x4   :  { %18 = vsyncpa [#allocation5 + $0x1], 0 }
   0x5   :  { %19 = vsyncpa [#allocation8], 0 }
   0x6   :  { %20 = vsyncpa [#allocation11], 0 }
   0x7   :  { %21 = vsyncpa [#allocation6], 0 }
   0x8   :  { %23 = vsyncpa [#allocation6 + $0x1], 0  ;;  %s5679_s15 = smov 0   ;;  %s5681_s16 = smov 0  }
   0x9   :  { %s5683_s17 = smov 0   ;;  %s5685_s18 = smov 0  }
   0xa LB: > { %6264 = sst [smem:[#allocation18_spill]] %s5590_s15  ;;  %s5700_s0 = sadd.s32 4294967295, %s5602_s18   ;;  %s5602_s18 = sphi %s5685_s18, %s6326_s18   ;;  %s5598_s17 = sphi %s5683_s17, %s6325_s17   ;;  %s5594_s16 = sphi %s5681_s16, %s6324_s16   ;;  %s5590_s15 = sphi %s5679_s15, %s6323_s15  }
   0xb   : > { %s4228_s19 = sadd.s32 4294967294, %s5602_s18   ;;  %p49_p0 = scmp.ne.s32.totalorder %s5594_s16, %s5590_s15 }
   0xc   : > { %p6258_p1 = scmp.eq.s32.totalorder %s5700_s0, 0  ;;  %p247_p3 = scmp.eq.s32.totalorder %s4228_s19, 1 }
   0xd   : > { %p4229_p5 = scmp.ge.s32.totalorder %s5602_s18, 1  ;;  %p254_p7 = scmp.lt.s32.totalorder %s5602_s18, 3 }
   0xe   : > { %p5709_p4 = por %p6258_p1, %p49_p0  ;;  %p5714_p6 = por %p247_p3, %p49_p0 }
   0xf   : > { %p5719_p8 = pnand %p4229_p5, %p254_p7  ;;  %s5604_s23 = smov [#allocation7]  }
  0x10   : > { %s6265_s20 = scalar_select %p5709_p4, 1, 0 }
  0x11   : > { %s6266_s21 = scalar_select %p5714_p6, 1, 0 }
  0x12   : > { %s6268_s22 = scalar_select %p5719_p8, 1, 0 }
  0x13   : > { %6267 = sst [smem:[#allocation19_spill]] %s6266_s21  ;;  %s266_s24 = sshll.u32 %s5604_s23, 4  ;;  %s5723_s24 = int_to_ptr.vmem [resolvable:$true] %s266_s24 }
  0x14   : > { %p4803_p9 = pneg %p5719_p8  ;;  %s5605_s26 = smov [#allocation10]  }
  0x15   : > { %s298_s27 = sshll.u32 %s5605_s26, 4  ;;  %s6270_s2 = sld [smem:[#allocation20_spill]]  ;;  %s5734_s27 = int_to_ptr.vmem [resolvable:$true] %s298_s27 }
  0x16   : > { %p5730_p11 = pnand %p4803_p9, %p6258_p1 }
  0x18   : > { %p5744_p13 = pneg %p5730_p11 }
  0x1b   : > { %s5386_s30 = scalar_lea.hbm %s6270_s2, 8192 }
  0x1c   : > { %p5387_p12 = scmp.ne.s32.totalorder %s6270_s2, %s5386_s30  ;;  %p5393_p5 = scmp.lt.u32.totalorder %s5386_s30, %s6270_s2 }
  0x1e   : > { %p5389_p0 = pnand %p5744_p13, %p5387_p12 }
  0x20   : > { %p5390_p3 = pneg %p5389_p0 }
  0x22   : > { %p5395_p7 = pnand %p5393_p5, %p5390_p3 }
  0x24   : > { %5398 = shalt.err (!%p5395_p7)
}
  0x25   : > { %s5399_s23 = scalar_lea.vmem %s5723_s24, 8192  ;;  %p5407_p2 = scmp.lt.s32.totalorder %s5723_s24, %s5723_s24 }
  0x26   : > { %p5400_p9 = scmp.ne.s32.totalorder %s5723_s24, %s5399_s23  ;;  %p5408_p6 = scmp.lt.s32.totalorder %s5399_s23, %s5399_s23 }
  0x28   : > { %p5402_p10 = pnand %p5400_p9, %p5744_p13  ;;  %p5409_p12 = por %p5408_p6, %p5407_p2 }
  0x2a   : > { %p5403_p1 = pneg %p5402_p10 }
  0x2c   : > { %p5410_p0 = pnand %p5409_p12, %p5403_p1 }
  0x2e   : > { %5413 = shalt.err (!%p5410_p0)
}
  0x2f   : > { %s5606_s26 = smov 512   ;;  %s5607_s28 = smov 32  }
  0x30   : > { %4806 = dma.hbm_to_vmem [thread:$0]  (!%p5730_p11), %s6270_s2, 8192, %s5723_s24, [#allocation8], %s5606_s26, %s5606_s26, %s5607_s28  }
  0x31   : > { %s5414_s14 = scalar_lea.hbm %s6253_s6, 8192 }
  0x32   : > { %p5415_p2 = scmp.ne.s32.totalorder %s6253_s6, %s5414_s14  ;;  %p5421_p10 = scmp.lt.u32.totalorder %s5414_s14, %s6253_s6 }
  0x34   : > { %p5417_p1 = pnand %p5415_p2, %p5744_p13 }
  0x36   : > { %p5418_p6 = pneg %p5417_p1 }
  0x38   : > { %p5423_p3 = pnand %p5421_p10, %p5418_p6 }
  0x3a   : > { %5426 = shalt.err (!%p5423_p3)
}
  0x3b   : > { %s5427_s24 = scalar_lea.vmem %s5734_s27, 8192  ;;  %p5435_p12 = scmp.lt.s32.totalorder %s5734_s27, %s5734_s27 }
  0x3c   : > { %p5428_p5 = scmp.ne.s32.totalorder %s5734_s27, %s5427_s24  ;;  %p5436_p0 = scmp.lt.s32.totalorder %s5427_s24, %s5427_s24 }
  0x3e   : > { %p5430_p7 = pnand %p5428_p5, %p5744_p13  ;;  %p5437_p2 = por %p5436_p0, %p5435_p12 }
  0x40   : > { %p5431_p9 = pneg %p5430_p7 }
  0x42   : > { %p5438_p1 = pnand %p5437_p2, %p5431_p9 }
  0x44   : > { %5441 = shalt.err (!%p5438_p1)
}
  0x45   : > { %s5608_s21 = smov 128   ;;  %s5609_s15 = smov 8  }
  0x46   : > { %4812 = dma.hbm_to_vmem [thread:$0]  (!%p5730_p11), %s6253_s6, 8192, %s5734_s27, [#allocation11], %s5608_s21, %s5608_s21, %s5609_s15  }
  0x47   : > { %s5610_s29 = smov [#allocation9]   ;;  %s5442_s14 = scalar_lea.hbm %s6251_s4, 32768 }
  0x48   : > { %s282_s30 = sshll.u32 %s5610_s29, 4  ;;  %p5443_p6 = scmp.ne.s32.totalorder %s6251_s4, %s5442_s14  ;;  %s283_s30 = int_to_ptr.vmem [resolvable:$true] %s282_s30 }
  0x49   : > { %p5449_p5 = scmp.lt.u32.totalorder %s5442_s14, %s6251_s4 }
  0x4a   : > { %p5445_p10 = pnand %p5443_p6, %p5744_p13 }
  0x4c   : > { %p5446_p3 = pneg %p5445_p10 }
  0x4e   : > { %p5451_p7 = pnand %p5449_p5, %p5446_p3 }
  0x50   : > { %5454 = shalt.err (!%p5451_p7)
}
  0x51   : > { %s5455_s27 = scalar_lea.vmem %s283_s30, 32768  ;;  %p5463_p2 = scmp.lt.s32.totalorder %s283_s30, %s283_s30 }
  0x52   : > { %p5456_p9 = scmp.ne.s32.totalorder %s283_s30, %s5455_s27  ;;  %p5464_p1 = scmp.lt.s32.totalorder %s5455_s27, %s5455_s27 }
  0x54   : > { %p5458_p12 = pnand %p5456_p9, %p5744_p13  ;;  %p5465_p4 = por %p5464_p1, %p5463_p2 }
  0x56   : > { %p5459_p0 = pneg %p5458_p12 }
  0x58   : > { %p5466_p8 = pnand %p5465_p4, %p5459_p0 }
  0x5a   : > { %5469 = shalt.err (!%p5466_p8)
}
  0x5b   : > { %s5611_s21 = smov 256   ;;  %s5612_s15 = smov 16  }
  0x5c   : > { %4809 = dma.hbm_to_vmem [thread:$0]  (!%p5730_p11), %s6251_s4, 32768, %s283_s30, [#allocation8], %s5611_s21, %s5611_s21, %s5612_s15  }
  0x5d   : > { %s5613_s28 = smov [#allocation12]   ;;  %s5470_s14 = scalar_lea.hbm %s6255_s8, 2048 }
  0x5e   : > { %s314_s29 = sshll.u32 %s5613_s28, 4  ;;  %p5471_p4 = scmp.ne.s32.totalorder %s6255_s8, %s5470_s14  ;;  %s315_s29 = int_to_ptr.vmem [resolvable:$true] %s314_s29 }
  0x5f   : > { %p5477_p10 = scmp.lt.u32.totalorder %s5470_s14, %s6255_s8 }
  0x60   : > { %p5473_p8 = pnand %p5471_p4, %p5744_p13 }
  0x62   : > { %p5474_p6 = pneg %p5473_p8 }
  0x64   : > { %p5479_p3 = pnand %p5477_p10, %p5474_p6 }
  0x66   : > { %5482 = shalt.err (!%p5479_p3)
}
  0x67   : > { %s5483_s30 = scalar_lea.vmem %s315_s29, 2048  ;;  %p5491_p12 = scmp.lt.s32.totalorder %s315_s29, %s315_s29 }
  0x68   : > { %p5484_p5 = scmp.ne.s32.totalorder %s315_s29, %s5483_s30  ;;  %p5492_p0 = scmp.lt.s32.totalorder %s5483_s30, %s5483_s30 }
  0x6a   : > { %p5486_p7 = pnand %p5484_p5, %p5744_p13  ;;  %p5493_p2 = por %p5492_p0, %p5491_p12 }
  0x6c   : > { %p5487_p9 = pneg %p5486_p7 }
  0x6e   : > { %p5494_p1 = pnand %p5493_p2, %p5487_p9 }
  0x70   : > { %5497 = shalt.err (!%p5494_p1)
}
  0x71   : > { %s5614_s21 = smov 64   ;;  %s5615_s13 = smov 4  }
  0x72   : > { %4815 = dma.hbm_to_vmem [thread:$0]  (!%p5730_p11), %s6255_s8, 2048, %s315_s29, [#allocation11], %s5614_s21, %s5614_s21, %s5615_s13  }
  0x73   : > { %s5828_s26 = sadd.s32 1, %s5602_s18   ;;  %s36_s11 = sadd.s32 1, %s5598_s17 }
  0x74   : > { %s33_s28 = ssub.s32 %s5602_s18, %s5828_s26  ;;  %p43_p4 = scmp.ne.s32.totalorder %s5598_s17, %s5594_s16 }
  0x75   : > { %p34_p13 = scmp.eq.s32.totalorder %s33_s28, 0  ;;  %p44_p8 = scmp.eq.s32.totalorder %s5602_s18, 0 }
  0x76   : > { %p6272_p10 = scmp.eq.s32.totalorder %s5700_s0, 1  ;;  %p4828_p5 = scmp.lt.s32.totalorder %s5602_s18, 2 }
  0x77   : > { %s5837_s12 = scalar_select %p34_p13, %s5598_s17, %s36_s11  }
  0x78   : > { %p45_p6 = por %p44_p8, %p43_p4  ;;  %p5841_p3 = por %p6272_p10, %p43_p4 }
  0x79   : > { %s331_s14 = sand.u32 1, %s5598_s17   ;;  %s4719_s29 = sshll.u32 %s5602_s18, 7 }
  0x7a   : > { %s4235_s19 = sshll.u32 %s331_s14, 3  ;;  %s5851_s27 = scalar_lea.hbm %s6248_s1, %s4719_s29 }
  0x7b   : > { %s335_s30 = scalar_lea.vmem [#allocation4], %s4235_s19  ;;  %p5855_p11 = pnand %p4828_p5, %p45_p6 }
  0x7c   : > { %s342_s15 = sshll.u32 %s335_s30, 4  ;;  %s5859_s28 = scalar_lea.sflag [#allocation5], %s331_s14  ;;  %s5853_s15 = int_to_ptr.vmem [resolvable:$true] %s342_s15 }
  0x7d   : > { %s5498_s11 = scalar_lea.hbm %s5851_s27, 128  ;;  %p5500_p9 = pneg %p5855_p11 }
  0x7e   : > { %p5499_p7 = scmp.ne.s32.totalorder %s5851_s27, %s5498_s11  ;;  %s5503_s23 = scalar_lea.hbm %s6248_s1, 256 }
  0x7f   : > { %p5504_p2 = scmp.lt.u32.totalorder %s5851_s27, %s6248_s1  ;;  %p5505_p1 = scmp.lt.u32.totalorder %s5503_s23, %s5498_s11 }
  0x80   : > { %p5501_p12 = pnand %p5500_p9, %p5499_p7  ;;  %p5507_p4 = scmp.lt.u32.totalorder %s5498_s11, %s5851_s27 }
  0x81   : > { %p5506_p13 = por %p5505_p1, %p5504_p2 }
  0x82   : > { %p5502_p0 = pneg %p5501_p12 }
  0x83   : > { %p5508_p8 = por %p5507_p4, %p5506_p13 }
  0x85   : > { %p5509_p6 = pnand %p5508_p8, %p5502_p0 }
  0x87   : > { %5512 = shalt.err (!%p5509_p6)
}
  0x88   : > { %s5513_s14 = scalar_lea.vmem %s5853_s15, 128  ;;  %s5616_s19 = smov [#allocation4]  }
  0x89   : > { %p5514_p10 = scmp.ne.s32.totalorder %s5853_s15, %s5513_s14  ;;  %s5518_s29 = sshll.u32 %s5616_s19, 4  ;;  %s5519_s29 = int_to_ptr.vmem [resolvable:$false] %s5518_s29 }
  0x8a   : > { %s5520_s24 = scalar_lea.vmem %s5519_s29, 256  ;;  %p5521_p12 = scmp.lt.s32.totalorder %s5853_s15, %s5519_s29 }
  0x8b   : > { %p5516_p5 = pnand %p5514_p10, %p5500_p9  ;;  %p5522_p2 = scmp.lt.s32.totalorder %s5520_s24, %s5513_s14 }
  0x8d   : > { %p5517_p7 = pneg %p5516_p5  ;;  %p5523_p1 = por %p5522_p2, %p5521_p12 }
  0x8f   : > { %p5524_p13 = pnand %p5523_p1, %p5517_p7 }
  0x91   : > { %5527 = shalt.err (!%p5524_p13)
}
  0x92   : > { %4819 = dma.hbm_to_vmem [thread:$0]  (!%p5855_p11), %s5851_s27, 128, %s5853_s15, %s5859_s28, %s5614_s21, %s5614_s21, %s5615_s13  }
  0x93   : > { %p6275_p9 = scmp.ne.s32.totalorder %s6268_s22, 0 }
  0x94   : > { %s5893_s11 = sand.u32 (!%p6275_p9), 1, %s5594_s16   ;;  %p6276_p0 = scmp.ne.s32.totalorder (!%p6275_p9), %s6265_s20, 0 }
  0x95   : > { %354 = sbr.rel (%p6275_p9) target bundleno = 1396 (0x574), region = 56  ;;  %s4239_s23 = sshll.u32 (!%p6275_p9), %s5893_s11, 3 }
  0x96   : > { %s357_s30 = scalar_lea.sflag (!%p6275_p9), [#allocation5], %s5893_s11  ;;  %s5897_s14 = scalar_lea.vmem (!%p6275_p9), [#allocation4], %s4239_s23 }
  0x9c   : > { %5573 = dma.done.wait (%p6276_p0), %s357_s30, 128  }
  0x9d   : > { %5575 = vsyncadd (%p6276_p0), %s357_s30, 4294967168  ;;  %p6277_p11 = scmp.eq.s32.totalorder %s5700_s0, 0 }
  0x9f   : > { %5577 = dma.done.wait (%p6277_p11), [#allocation8], 40960   ;;  %p6278_p4 = pmov %p6277_p11 }
  0xa1   : > { %5579 = vsyncadd (%p6278_p4), [#allocation8], 4294926336  ;;  %p6279_p8 = pmov %p6278_p4 }
  0xa2   : > { %p6280_p6 = pmov %p6278_p4 }
  0xa3   : > { %5581 = dma.done.wait (%p6279_p8), [#allocation11], 10240  }
  0xa4   : > { %5583 = vsyncadd (%p6280_p6), [#allocation11], 4294957056  ;;  %v5617_v0 = vmov 0   ;;  %v418_v1 = vld [vmem:[#allocation7] sm:$0xff]  ;;  %v420_v18 = vld [vmem:[#allocation7 + $0x10] sm:$0xff]  ;;  %s414_s20 = sld [smem:[#allocation3]] }
  0xa5   : > { %882 = vmatprep.mubr.bf16.mxu1 %v5617_v0  ;;  %968 = vmatprep.mubr.bf16.mxu0 %v5617_v0  ;;  %v422_v2 = vld [vmem:[#allocation7 + $0x20] sm:$0xff]  ;;  %v424_v20 = vld [vmem:[#allocation7 + $0x30] sm:$0xff]  ;;  %v419_v48 = vld [vmem:[#allocation7 + $0x8] sm:$0xff]  ;;  %s4245_s22 = sshll.u32 %s5700_s0, 4  ;;  %s4244_s23 = sshll.u32 %s5893_s11, 4 }
  0xa6   : > { %v426_v3 = vld [vmem:[#allocation7 + $0x40] sm:$0xff]  ;;  %v4248_v4 = vcombine.high %v418_v1, %v422_v2  ;;  %v4247_v5 = vcombine.low %v418_v1, %v422_v2  ;;  %v428_v21 = vld [vmem:[#allocation7 + $0x50] sm:$0xff]  ;;  %v4252_v25 = vcombine.high %v420_v18, %v424_v20  ;;  %v4251_v26 = vcombine.low %v420_v18, %v424_v20  ;;  %v423_v49 = vld [vmem:[#allocation7 + $0x28] sm:$0xff]  ;;  %s4720_s30 = sshll.u32 %s5700_s0, 8  ;;  %s4104_s27 = scalar_lea.sflag [#allocation6], %s5893_s11 }
  0xa7   : > { %v430_v6 = vld [vmem:[#allocation7 + $0x60] sm:$0xff]  ;;  %v432_v22 = vld [vmem:[#allocation7 + $0x70] sm:$0xff]  ;;  %v4250_v58 = vcombine.high %v419_v48, %v423_v49  ;;  %v427_v59 = vld [vmem:[#allocation7 + $0x48] sm:$0xff]  ;;  %v4249_v1 = vcombine.low %v419_v48, %v423_v49  ;;  %s6201_s13 = scalar_lea.hbm %s6257_s10, %s4720_s30  ;;  %s5618_s0 = smov [#allocation13]  }
  0xa8   : > { %v4256_v7 = vcombine.high %v426_v3, %v430_v6  ;;  %v434_v8 = vld [vmem:[#allocation7 + $0x80] sm:$0xff]  ;;  %850 = vmatprep.subr.bf16.mxu1 %v4248_v4  ;;  %v4255_v10 = vcombine.low %v426_v3, %v430_v6  ;;  %v4260_v27 = vcombine.high %v428_v21, %v432_v22  ;;  %v436_v29 = vld [vmem:[#allocation7 + $0x90] sm:$0xff]  ;;  %936 = vmatprep.subr.bf16.mxu0 %v4252_v25  ;;  %v431_v61 = vld [vmem:[#allocation7 + $0x68] sm:$0xff]  ;;  %s5532_s2 = sshll.u32 %s5618_s0, 4  ;;  %s5533_s2 = int_to_ptr.vmem [resolvable:$false] %s5532_s2 }
  0xa9   : > { %v438_v9 = vld [vmem:[#allocation7 + $0xa0] sm:$0xff]  ;;  %851 = vmatpush1.bf16.msra.mxu1 %v4247_v5  ;;  %v440_v30 = vld [vmem:[#allocation7 + $0xb0] sm:$0xff]  ;;  %937 = vmatpush1.bf16.msra.mxu0 %v4251_v26  ;;  %v4259_v32 = vcombine.low %v428_v21, %v432_v22  ;;  %v4258_v2 = vcombine.high %v427_v59, %v431_v61  ;;  %v435_v3 = vld [vmem:[#allocation7 + $0x88] sm:$0xff]  ;;  %s5534_s28 = scalar_lea.vmem %s5533_s2, 512 }
  0xaa   : > { %852 = vmatprep.subr.bf16.mxu1 %v4256_v7  ;;  %v4264_v11 = vcombine.high %v434_v8, %v438_v9  ;;  %v442_v12 = vld [vmem:[#allocation7 + $0xc0] sm:$0xff]  ;;  %v4263_v14 = vcombine.low %v434_v8, %v438_v9  ;;  %938 = vmatprep.subr.bf16.mxu0 %v4260_v27  ;;  %v4268_v35 = vcombine.high %v436_v29, %v440_v30  ;;  %v444_v37 = vld [vmem:[#allocation7 + $0xd0] sm:$0xff]  ;;  %v439_v5 = vld [vmem:[#allocation7 + $0xa8] sm:$0xff]  ;;  %s1085_s21 = smul.u32 2654435761, %s414_s20 }
  0xab   : > { %v446_v13 = vld [vmem:[#allocation7 + $0xe0] sm:$0xff]  ;;  %v448_v38 = vld [vmem:[#allocation7 + $0xf0] sm:$0xff]  ;;  %v4267_v40 = vcombine.low %v436_v29, %v440_v30  ;;  %v4257_v9 = vcombine.low %v427_v59, %v431_v61  ;;  %v455_v18 = vld [vmem:[#allocation7 + $0x128] sm:$0xff] }
  0xac   : > { %v4272_v15 = vcombine.high %v442_v12, %v446_v13  ;;  %v450_v16 = vld [vmem:[#allocation7 + $0x100] sm:$0xff]  ;;  %v4271_v19 = vcombine.low %v442_v12, %v446_v13  ;;  %v4276_v44 = vcombine.high %v444_v37, %v448_v38  ;;  %v452_v45 = vld [vmem:[#allocation7 + $0x110] sm:$0xff]  ;;  %v4275_v50 = vcombine.low %v444_v37, %v448_v38  ;;  %v447_v13 = vld [vmem:[#allocation7 + $0xe8] sm:$0xff] }
  0xad   : > { %853 = vmatpush1.bf16.msra.mxu1 %v4255_v10  ;;  %v454_v17 = vld [vmem:[#allocation7 + $0x120] sm:$0xff]  ;;  %939 = vmatpush1.bf16.msra.mxu0 %v4259_v32  ;;  %v456_v46 = vld [vmem:[#allocation7 + $0x130] sm:$0xff]  ;;  %v4266_v10 = vcombine.high %v435_v3, %v439_v5  ;;  %v459_v22 = vld [vmem:[#allocation7 + $0x148] sm:$0xff] }
  0xae   : > { %854 = vmatprep.subr.bf16.mxu1 %v4264_v11  ;;  %v4280_v23 = vcombine.high %v450_v16, %v454_v17  ;;  %v458_v24 = vld [vmem:[#allocation7 + $0x140] sm:$0xff]  ;;  %v4279_v31 = vcombine.low %v450_v16, %v454_v17  ;;  %940 = vmatprep.subr.bf16.mxu0 %v4268_v35  ;;  %v4284_v52 = vcombine.high %v452_v45, %v456_v46  ;;  %v460_v53 = vld [vmem:[#allocation7 + $0x150] sm:$0xff]  ;;  %v443_v11 = vld [vmem:[#allocation7 + $0xc8] sm:$0xff] }
  0xaf   : > { %v462_v28 = vld [vmem:[#allocation7 + $0x160] sm:$0xff]  ;;  %v464_v54 = vld [vmem:[#allocation7 + $0x170] sm:$0xff]  ;;  %v4283_v56 = vcombine.low %v452_v45, %v456_v46  ;;  %v451_v16 = vld [vmem:[#allocation7 + $0x108] sm:$0xff]  ;;  %v4274_v17 = vcombine.high %v443_v11, %v447_v13  ;;  %v4273_v21 = vcombine.low %v443_v11, %v447_v13 }
  0xb0   : > { %v4288_v33 = vcombine.high %v458_v24, %v462_v28  ;;  %v466_v34 = vld [vmem:[#allocation7 + $0x180] sm:$0xff]  ;;  %v4287_v39 = vcombine.low %v458_v24, %v462_v28  ;;  %v5914_v57 = vld [vmem:[%s5897_s14] sm:$0xff]   ;;  %v4292_v60 = vcombine.high %v460_v53, %v464_v54  ;;  %v4291_v4 = vcombine.low %v460_v53, %v464_v54  ;;  %v467_v28 = vld [vmem:[#allocation7 + $0x188] sm:$0xff]  ;;  %s410_s14 = scalar_lea.vmem [#allocation13], %s4244_s23 }
  0xb1   : > { %855 = vmatpush1.bf16.msra.mxu1 %v4263_v14  ;;  %v470_v36 = vld [vmem:[#allocation7 + $0x1a0] sm:$0xff]  ;;  %941 = vmatpush1.bf16.msra.mxu0 %v4267_v40  ;;  %v468_v62 = vld [vmem:[#allocation7 + $0x190] sm:$0xff]  ;;  %v4282_v24 = vcombine.high %v451_v16, %v455_v18  ;;  %v4281_v27 = vcombine.low %v451_v16, %v455_v18  ;;  %v471_v29 = vld [vmem:[#allocation7 + $0x1a8] sm:$0xff]  ;;  %s4117_s20 = sshll.u32 %s410_s14, 4  ;;  %s6203_s20 = int_to_ptr.vmem [resolvable:$true] %s4117_s20 }
  0xb2   : > { %856 = vmatprep.subr.bf16.mxu1 %v4272_v15  ;;  %v4296_v41 = vcombine.high %v466_v34, %v470_v36  ;;  %v474_v42 = vld [vmem:[#allocation7 + $0x1c0] sm:$0xff]  ;;  %v4295_v47 = vcombine.low %v466_v34, %v470_v36  ;;  %942 = vmatprep.subr.bf16.mxu0 %v4276_v44  ;;  %v472_v63 = vld [vmem:[#allocation7 + $0x1b0] sm:$0xff]  ;;  %v4265_v15 = vcombine.low %v435_v3, %v439_v5  ;;  %v475_v34 = vld [vmem:[#allocation7 + $0x1c8] sm:$0xff]  ;;  %s5528_s15 = scalar_lea.vmem %s6203_s20, 256  ;;  %p5535_p12 = scmp.lt.s32.totalorder %s6203_s20, %s5533_s2 }
  0xb3   : > { %v478_v43 = vld [vmem:[#allocation7 + $0x1e0] sm:$0xff]  ;;  %v4300_v6 = vcombine.high %v468_v62, %v472_v63  ;;  %v476_v7 = vld [vmem:[#allocation7 + $0x1d0] sm:$0xff]  ;;  %v4299_v12 = vcombine.low %v468_v62, %v472_v63  ;;  %v479_v35 = vld [vmem:[#allocation7 + $0x1e8] sm:$0xff]  ;;  %v4298_v36 = vcombine.high %v467_v28, %v471_v29  ;;  %p5529_p10 = scmp.ne.s32.totalorder %s6203_s20, %s5528_s15  ;;  %p5536_p2 = scmp.lt.s32.totalorder %s5534_s28, %s5528_s15 }
  0xb4   : > { %v4304_v51 = vcombine.high %v474_v42, %v478_v43  ;;  %v4303_v55 = vcombine.low %v474_v42, %v478_v43  ;;  %v480_v8 = vld [vmem:[#allocation7 + $0x1f0] sm:$0xff]  ;;  %v421_v40 = vld [vmem:[#allocation7 + $0x18] sm:$0xff]  ;;  %v4306_v43 = vcombine.high %v475_v34, %v479_v35  ;;  %v4305_v46 = vcombine.low %v475_v34, %v479_v35 }
  0xb5   : > { %857 = vmatpush1.bf16.msra.mxu1 %v4271_v19  ;;  %943 = vmatpush1.bf16.msra.mxu0 %v4275_v50  ;;  %v4308_v14 = vcombine.high %v476_v7, %v480_v8  ;;  %v4307_v19 = vcombine.low %v476_v7, %v480_v8  ;;  %v4884_v20 = vld [vmem:[#allocation9 + $0x4] ss:$16 sps:$4 sm:$0xff]   ;;  %v4882_v25 = vld [vmem:[#allocation9] ss:$16 sps:$4 sm:$0xff]   ;;  %v433_v48 = vld [vmem:[#allocation7 + $0x78] sm:$0xff]  ;;  %p5530_p5 = pnand %p5529_p10, %p5841_p3  ;;  %p5537_p1 = por %p5536_p2, %p5535_p12 }
  0xb6   : > { %858 = vmatprep.subr.bf16.mxu1 %v4280_v23  ;;  %944 = vmatprep.subr.bf16.mxu0 %v4284_v52  ;;  %v463_v23 = vld [vmem:[#allocation7 + $0x168] sm:$0xff]  ;;  %v4890_v26 = vld [vmem:[#allocation9 + $0x24] ss:$16 sps:$4 sm:$0xff]   ;;  %v4894_v37 = vld [vmem:[#allocation9 + $0x40] ss:$16 sps:$4 sm:$0xff]  }
  0xb7   : > { %v4290_v30 = vcombine.high %v459_v22, %v463_v23  ;;  %v4896_v32 = vld [vmem:[#allocation9 + $0x44] ss:$16 sps:$4 sm:$0xff]   ;;  %v4900_v42 = vld [vmem:[#allocation9 + $0x60] ss:$16 sps:$4 sm:$0xff]   ;;  %v437_v53 = vld [vmem:[#allocation7 + $0x98] sm:$0xff]  ;;  %p5531_p7 = pneg %p5530_p5 }
  0xb8   : > { %v4902_v38 = vld [vmem:[#allocation9 + $0x64] ss:$16 sps:$4 sm:$0xff]   ;;  %v4906_v45 = vld [vmem:[#allocation9 + $0x80] ss:$16 sps:$4 sm:$0xff]   ;;  %v441_v54 = vld [vmem:[#allocation7 + $0xb8] sm:$0xff] }
  0xb9   : > { %859 = vmatpush1.bf16.msra.mxu1 %v4279_v31  ;;  %945 = vmatpush1.bf16.msra.mxu0 %v4283_v56  ;;  %v4888_v31 = vld [vmem:[#allocation9 + $0x20] ss:$16 sps:$4 sm:$0xff]   ;;  %v4908_v44 = vld [vmem:[#allocation9 + $0x84] ss:$16 sps:$4 sm:$0xff]   ;;  %v449_v61 = vld [vmem:[#allocation7 + $0xf8] sm:$0xff]  ;;  %v4270_v63 = vcombine.high %v437_v53, %v441_v54  ;;  %p5538_p13 = pnand %p5537_p1, %p5531_p7 }
  0xba   : > { %860 = vmatprep.subr.bf16.mxu1 %v4288_v33  ;;  %946 = vmatprep.subr.bf16.mxu0 %v4292_v60  ;;  %v4289_v33 = vcombine.low %v459_v22, %v463_v23  ;;  %v4914_v49 = vld [vmem:[#allocation9 + $0xa4] ss:$16 sps:$4 sm:$0xff]   ;;  %v445_v60 = vld [vmem:[#allocation7 + $0xd8] sm:$0xff]  ;;  %v4930_v7 = vld [vmem:[#allocation9 + $0x100] ss:$16 sps:$4 sm:$0xff]  }
  0xbb   : > { %v4926_v62 = vld [vmem:[#allocation9 + $0xe4] ss:$16 sps:$4 sm:$0xff]   ;;  %v453_v3 = vld [vmem:[#allocation7 + $0x118] sm:$0xff]  ;;  %v4277_v8 = vcombine.low %v445_v60, %v449_v61  ;;  %v4942_v18 = vld [vmem:[#allocation9 + $0x140] ss:$16 sps:$4 sm:$0xff]  }
  0xbc   : > { %v4932_v5 = vld [vmem:[#allocation9 + $0x104] ss:$16 sps:$4 sm:$0xff]   ;;  %v4899_v34 = vld [vmem:[#allocation9 + $0x4c] ss:$16 sps:$4 sm:$0xff]   ;;  %v4897_v35 = vld [vmem:[#allocation9 + $0x48] ss:$16 sps:$4 sm:$0xff]  }
  0xbd   : > { %861 = vmatpush1.bf16.msra.mxu1 %v4287_v39  ;;  %947 = vmatpush1.bf16.msra.mxu0 %v4291_v4  ;;  %v4297_v39 = vcombine.low %v467_v28, %v471_v29  ;;  %v457_v4 = vld [vmem:[#allocation7 + $0x138] sm:$0xff]  ;;  %v4944_v16 = vld [vmem:[#allocation9 + $0x144] ss:$16 sps:$4 sm:$0xff]   ;;  %v4954_v29 = vld [vmem:[#allocation9 + $0x180] ss:$16 sps:$4 sm:$0xff]  }
  0xbe   : > { %862 = vmatprep.subr.bf16.mxu1 %v4296_v41  ;;  %948 = vmatprep.subr.bf16.mxu0 %v4300_v6  ;;  %v425_v41 = vld [vmem:[#allocation7 + $0x38] sm:$0xff]  ;;  %v4278_v6 = vcombine.high %v445_v60, %v449_v61  ;;  %v4286_v11 = vcombine.high %v453_v3, %v457_v4  ;;  %v4285_v13 = vcombine.low %v453_v3, %v457_v4  ;;  %v4950_v22 = vld [vmem:[#allocation9 + $0x164] ss:$16 sps:$4 sm:$0xff]  }
  0xbf   : > { %v4254_v50 = vcombine.high %v421_v40, %v425_v41  ;;  %v4253_v52 = vcombine.low %v421_v40, %v425_v41  ;;  %v4887_v28 = vld [vmem:[#allocation9 + $0xc] ss:$16 sps:$4 sm:$0xff]   ;;  %v4915_v41 = vld [vmem:[#allocation9 + $0xa8] ss:$16 sps:$4 sm:$0xff]  }
  0xc0   : > { %v4917_v40 = vld [vmem:[#allocation9 + $0xac] ss:$16 sps:$4 sm:$0xff]   ;;  %v4951_v60 = vld [vmem:[#allocation9 + $0x168] ss:$16 sps:$4 sm:$0xff]  }
  0xc1   : > { %863 = vmatpush1.bf16.msra.mxu1 %v4295_v47  ;;  %949 = vmatpush1.bf16.msra.mxu0 %v4299_v12  ;;  %v429_v47 = vld [vmem:[#allocation7 + $0x58] sm:$0xff]  ;;  %v4936_v12 = vld [vmem:[#allocation9 + $0x120] ss:$16 sps:$4 sm:$0xff]  }
  0xc2   : > { %864 = vmatprep.subr.bf16.mxu1 %v4304_v51  ;;  %950 = vmatprep.subr.bf16.mxu0 %v4308_v14  ;;  %v4912_v51 = vld [vmem:[#allocation9 + $0xa0] ss:$16 sps:$4 sm:$0xff]   ;;  %v4262_v56 = vcombine.high %v429_v47, %v433_v48  ;;  %v4261_v59 = vcombine.low %v429_v47, %v433_v48  ;;  %v469_v14 = vld [vmem:[#allocation7 + $0x198] sm:$0xff] }
  0xc3   : > { %v4966_v47 = vld [vmem:[#allocation9 + $0x1c0] ss:$16 sps:$4 sm:$0xff]   ;;  %v4927_v48 = vld [vmem:[#allocation9 + $0xe8] ss:$16 sps:$4 sm:$0xff]   ;;  %v4959_v61 = vld [vmem:[#allocation9 + $0x18c] ss:$16 sps:$4 sm:$0xff]  }
  0xc4   : > { %v4969_v3 = vld [vmem:[#allocation9 + $0x1c8] ss:$16 sps:$4 sm:$0xff]   ;;  %v4977_v4 = vld [vmem:[#allocation9 + $0x1ec] ss:$16 sps:$4 sm:$0xff]  }
  0xc5   : > { %865 = vmatpush1.bf16.msra.mxu1 %v4303_v55  ;;  %951 = vmatpush1.bf16.msra.mxu0 %v4307_v19  ;;  %v4920_v55 = vld [vmem:[#allocation9 + $0xc4] ss:$16 sps:$4 sm:$0xff]  }
  0xc6   : > { %893 = vmatprep.subr.bf16.mxu1 %v4250_v58  ;;  %2889 = vmatprep.subr.bf16.mxu0 %v4884_v20  ;;  %v4918_v58 = vld [vmem:[#allocation9 + $0xc0] ss:$16 sps:$4 sm:$0xff]   ;;  %v477_v20 = vld [vmem:[#allocation7 + $0x1d8] sm:$0xff] }
  0xc8   : > { %883 = vmatmul.mubr.bf16.vlgmr.msra.gmra.mrb[0].mxu1 %v5914_v57  ;;  %969 = vmatmul.mubr.bf16.vlgmr.msra.gmra.mrb[0].mxu0 %v5914_v57 }
  0xc9   : > { %894 = vmatpush1.bf16.msra.mxu1 %v4249_v1  ;;  %925 = vmatprep.mubr.bf16.mxu1 %v5617_v0  ;;  %v4924_v1 = vld [vmem:[#allocation9 + $0xe0] ss:$16 sps:$4 sm:$0xff]  }
  0xca   : > { %895 = vmatprep.subr.bf16.mxu1 %v4258_v2  ;;  %2890 = vmatpush1.bf16.msra.mxu0 %v4882_v25  ;;  %v4269_v2 = vcombine.low %v437_v53, %v441_v54  ;;  %v4941_v53 = vld [vmem:[#allocation9 + $0x12c] ss:$16 sps:$4 sm:$0xff]   ;;  %v4980_v54 = vld [vmem:[#allocation9 + $0x204] ss:$16 sps:$4 sm:$0xff]  }
  0xcb   : > { %2891 = vmatprep.subr.bf16.mxu0 %v4890_v26  ;;  %v4956_v26 = vld [vmem:[#allocation9 + $0x184] ss:$16 sps:$4 sm:$0xff]  }
  0xcd   : > { %896 = vmatpush1.bf16.msra.mxu1 %v4257_v9  ;;  %v461_v9 = vld [vmem:[#allocation7 + $0x158] sm:$0xff] }
  0xce   : > { %897 = vmatprep.subr.bf16.mxu1 %v4266_v10  ;;  %2892 = vmatpush1.bf16.msra.mxu0 %v4888_v31  ;;  %v4938_v10 = vld [vmem:[#allocation9 + $0x124] ss:$16 sps:$4 sm:$0xff]   ;;  %v4885_v31 = vld [vmem:[#allocation9 + $0x8] ss:$16 sps:$4 sm:$0xff]  }
  0xcf   : > { %2893 = vmatprep.subr.bf16.mxu0 %v4896_v32  ;;  %v4893_v32 = vld [vmem:[#allocation9 + $0x2c] ss:$16 sps:$4 sm:$0xff]  }
  0xd1   : > { %898 = vmatpush1.bf16.msra.mxu1 %v4265_v15  ;;  %v473_v15 = vld [vmem:[#allocation7 + $0x1b8] sm:$0xff] }
  0xd2   : > { %899 = vmatprep.subr.bf16.mxu1 %v4274_v17  ;;  %2894 = vmatpush1.bf16.msra.mxu0 %v4894_v37  ;;  %v4302_v23 = vcombine.high %v469_v14, %v473_v15  ;;  %v4301_v25 = vcombine.low %v469_v14, %v473_v15  ;;  %v4903_v37 = vld [vmem:[#allocation9 + $0x68] ss:$16 sps:$4 sm:$0xff]  }
  0xd3   : > { %2895 = vmatprep.subr.bf16.mxu0 %v4902_v38  ;;  %v4911_v38 = vld [vmem:[#allocation9 + $0x8c] ss:$16 sps:$4 sm:$0xff]  }
  0xd5   : > { %900 = vmatpush1.bf16.msra.mxu1 %v4273_v21  ;;  %v481_v21 = vld [vmem:[#allocation7 + $0x1f8] sm:$0xff] }
  0xd6   : > { %901 = vmatprep.subr.bf16.mxu1 %v4282_v24  ;;  %2896 = vmatpush1.bf16.msra.mxu0 %v4900_v42  ;;  %v4948_v24 = vld [vmem:[#allocation9 + $0x160] ss:$16 sps:$4 sm:$0xff]   ;;  %v4923_v42 = vld [vmem:[#allocation9 + $0xcc] ss:$16 sps:$4 sm:$0xff]  }
  0xd7   : > { %2897 = vmatprep.subr.bf16.mxu0 %v4908_v44  ;;  %v4960_v44 = vld [vmem:[#allocation9 + $0x1a0] ss:$16 sps:$4 sm:$0xff]  }
  0xd9   : > { %902 = vmatpush1.bf16.msra.mxu1 %v4281_v27  ;;  %v4310_v27 = vcombine.high %v477_v20, %v481_v21 }
  0xda   : > { %903 = vmatprep.subr.bf16.mxu1 %v4290_v30  ;;  %2898 = vmatpush1.bf16.msra.mxu0 %v4906_v45  ;;  %v4309_v30 = vcombine.low %v477_v20, %v481_v21  ;;  %v4929_v45 = vld [vmem:[#allocation9 + $0xec] ss:$16 sps:$4 sm:$0xff]  }
  0xdb   : > { %2899 = vmatprep.subr.bf16.mxu0 %v4914_v49  ;;  %v4935_v49 = vld [vmem:[#allocation9 + $0x10c] ss:$16 sps:$4 sm:$0xff]  }
  0xdd   : > { %904 = vmatpush1.bf16.msra.mxu1 %v4289_v33  ;;  %v4891_v33 = vld [vmem:[#allocation9 + $0x28] ss:$16 sps:$4 sm:$0xff]  }
  0xde   : > { %905 = vmatprep.subr.bf16.mxu1 %v4298_v36  ;;  %2900 = vmatpush1.bf16.msra.mxu0 %v4912_v51  ;;  %v4905_v36 = vld [vmem:[#allocation9 + $0x6c] ss:$16 sps:$4 sm:$0xff]   ;;  %v4933_v51 = vld [vmem:[#allocation9 + $0x108] ss:$16 sps:$4 sm:$0xff]  }
  0xdf   : > { %2901 = vmatprep.subr.bf16.mxu0 %v4920_v55  ;;  %v4939_v55 = vld [vmem:[#allocation9 + $0x128] ss:$16 sps:$4 sm:$0xff]  }
  0xe1   : > { %906 = vmatpush1.bf16.msra.mxu1 %v4297_v39  ;;  %v4909_v39 = vld [vmem:[#allocation9 + $0x88] ss:$16 sps:$4 sm:$0xff]  }
  0xe2   : > { %907 = vmatprep.subr.bf16.mxu1 %v4306_v43  ;;  %2902 = vmatpush1.bf16.msra.mxu0 %v4918_v58  ;;  %v4921_v43 = vld [vmem:[#allocation9 + $0xc8] ss:$16 sps:$4 sm:$0xff]  }
  0xe3   : > { %2903 = vmatprep.subr.bf16.mxu0 %v4926_v62  ;;  %v4945_v58 = vld [vmem:[#allocation9 + $0x148] ss:$16 sps:$4 sm:$0xff]  }
  0xe4   : > { %v4957_v62 = vld [vmem:[#allocation9 + $0x188] ss:$16 sps:$4 sm:$0xff]  }
  0xe5   : > { %908 = vmatpush1.bf16.msra.mxu1 %v4305_v46  ;;  %v4968_v46 = vld [vmem:[#allocation9 + $0x1c4] ss:$16 sps:$4 sm:$0xff]  }
  0xe6   : > { %979 = vmatprep.subr.bf16.mxu1 %v4254_v50  ;;  %2904 = vmatpush1.bf16.msra.mxu0 %v4924_v1  ;;  %v4974_v50 = vld [vmem:[#allocation9 + $0x1e4] ss:$16 sps:$4 sm:$0xff]   ;;  %v4963_v1 = vld [vmem:[#allocation9 + $0x1a8] ss:$16 sps:$4 sm:$0xff]  }
  0xe7   : > { %2905 = vmatprep.subr.bf16.mxu0 %v4932_v5  ;;  %v4975_v5 = vld [vmem:[#allocation9 + $0x1e8] ss:$16 sps:$4 sm:$0xff]  }
  0xe8   : > { %926 = vmatmul.mubr.bf16.vlgmr.msra.gmra.mrb[4].mxu1 %v5914_v57 }
  0xe9   : > { %980 = vmatpush1.bf16.msra.mxu1 %v4253_v52  ;;  %1011 = vmatprep.mubr.bf16.mxu1 %v5617_v0  ;;  %v465_v0 = vld [vmem:[#allocation7 + $0x178] sm:$0xff]  ;;  %v4972_v52 = vld [vmem:[#allocation9 + $0x1e0] ss:$16 sps:$4 sm:$0xff]  }
  0xea   : > { %981 = vmatprep.subr.bf16.mxu1 %v4262_v56  ;;  %v4294_v17 = vcombine.high %v461_v9, %v465_v0  ;;  %2906 = vmatpush1.bf16.msra.mxu0 %v4930_v7  ;;  %v4293_v19 = vcombine.low %v461_v9, %v465_v0  ;;  %v4947_v56 = vld [vmem:[#allocation9 + $0x14c] ss:$16 sps:$4 sm:$0xff]   ;;  %v484_v7 = vlaneseq  ;;  %v1073_v0 = vstv %s4245_s22 }
  0xeb   : > { %2907 = vmatprep.subr.bf16.mxu0 %v4938_v10 }
  0xec   : > { %v5926_v10 = vand.u32 127, %v484_v7 }
  0xed   : > { %982 = vmatpush1.bf16.msra.mxu1 %v4261_v59  ;;  %v4953_v59 = vld [vmem:[#allocation9 + $0x16c] ss:$16 sps:$4 sm:$0xff]  }
  0xee   : > { %983 = vmatprep.subr.bf16.mxu1 %v4270_v63  ;;  %2908 = vmatpush1.bf16.msra.mxu0 %v4936_v12  ;;  %v4965_v63 = vld [vmem:[#allocation9 + $0x1ac] ss:$16 sps:$4 sm:$0xff]  }
  0xef   : > { %2909 = vmatprep.subr.bf16.mxu0 %v4944_v16  ;;  %v1088_v16 = vstv %s1085_s21 }
  0xf1   : > { %984 = vmatpush1.bf16.msra.mxu1 %v4269_v2  ;;  %v4971_v2 = vld [vmem:[#allocation9 + $0x1cc] ss:$16 sps:$4 sm:$0xff]  }
  0xf2   : > { %985 = vmatprep.subr.bf16.mxu1 %v4278_v6  ;;  %2910 = vmatpush1.bf16.msra.mxu0 %v4942_v18  ;;  %v4983_v6 = vld [vmem:[#allocation9 + $0x20c] ss:$16 sps:$4 sm:$0xff]  }
  0xf3   : > { %2911 = vmatprep.subr.bf16.mxu0 %v4950_v22  ;;  %v1091_v22 = vmul.u32 3266489917, %v5926_v10 }
  0xf5   : > { %986 = vmatpush1.bf16.msra.mxu1 %v4277_v8  ;;  %v5922_v8 = vshrl.u32 %v484_v7, 7 }
  0xf6   : > { %987 = vmatprep.subr.bf16.mxu1 %v4286_v11  ;;  %2912 = vmatpush1.bf16.msra.mxu0 %v4948_v24 }
  0xf7   : > { %2913 = vmatprep.subr.bf16.mxu0 %v4956_v26  ;;  %v1072_v9 = vadd.s32 8, %v5922_v8  ;;  %v1074_v11 = vadd.s32 %v1073_v0, %v5922_v8 }
  0xf9   : > { %988 = vmatpush1.bf16.msra.mxu1 %v4285_v13  ;;  %v1075_v12 = vadd.s32 %v1073_v0, %v1072_v9  ;;  %v1078_v13 = vadd.s32 128, %v5926_v10  ;;  %v1086_v14 = vmul.u32 2246822519, %v1074_v11 }
  0xfa   : > { %989 = vmatprep.subr.bf16.mxu1 %v4294_v17  ;;  %2914 = vmatpush1.bf16.msra.mxu0 %v4954_v29 }
  0xfb   : > { %v1087_v15 = vmul.u32 2246822519, %v1075_v12  ;;  %v5930_v17 = vxor.u32 %v1088_v16, %v1086_v14 }
  0xfd   : > { %990 = vmatpush1.bf16.msra.mxu1 %v4293_v19  ;;  %v5932_v18 = vxor.u32 %v1088_v16, %v1087_v15  ;;  %v1092_v19 = vmul.u32 3266489917, %v1078_v13 }
  0xfe   : > { %991 = vmatprep.subr.bf16.mxu1 %v4302_v23 }
  0xff   : > { %v5935_v20 = vxor.u32 %v1092_v19, %v5930_v17  ;;  %v5938_v21 = vxor.u32 %v1092_v19, %v5932_v18  ;;  %v5947_v26 = vxor.u32 %v1091_v22, %v5932_v18 }
 0x101   : > { %992 = vmatpush1.bf16.msra.mxu1 %v4301_v25  ;;  %v1116_v23 = vxor.u32 668265263, %v5935_v20  ;;  %v1124_v24 = vxor.u32 668265263, %v5938_v21  ;;  %v5944_v25 = vxor.u32 %v1091_v22, %v5930_v17 }
 0x102   : > { %993 = vmatprep.subr.bf16.mxu1 %v4310_v27 }
 0x103   : > { %v1132_v27 = vshrl.u32 %v1116_v23, 16  ;;  %v1115_v29 = vxor.u32 668265263, %v5944_v25 }
 0x105   : > { %994 = vmatpush1.bf16.msra.mxu1 %v4309_v30  ;;  %v1123_v30 = vxor.u32 668265263, %v5947_v26 }
 0x106   : > { %3061 = vmatprep.subr.bf16.mxu1 %v4887_v28  ;;  %v1140_v28 = vshrl.u32 %v1124_v24, 16 }
 0x108   : > { %1012 = vmatmul.mubr.bf16.vlgmr.msra.gmra.mrb[8].mxu1 %v5914_v57  ;;  %v4962_v57 = vld [vmem:[#allocation9 + $0x1a4] ss:$16 sps:$4 sm:$0xff]  }
 0x109   : > { %3062 = vmatpush1.bf16.msra.mxu1 %v4885_v31  ;;  %2915 = vmatprep.subr.bf16.mxu0 %v4962_v57  ;;  %v1148_v31 = vxor.u32 %v1132_v27, %v1116_v23  ;;  %v4990_v23 = vld [vmem:[#allocation9 + $0x240] ss:$16 sps:$4 sm:$0xff]  }
 0x10a   : > { %3063 = vmatprep.subr.bf16.mxu1 %v4893_v32  ;;  %2916 = vmatpush1.bf16.msra.mxu0 %v4960_v44  ;;  %v1156_v32 = vxor.u32 %v1140_v28, %v1124_v24  ;;  %v4993_v24 = vld [vmem:[#allocation9 + $0x248] ss:$16 sps:$4 sm:$0xff]  }
 0x10b   : > { %2917 = vmatprep.subr.bf16.mxu0 %v4968_v46  ;;  %v1080_v46 = vadd.s32 384, %v5926_v10 }
 0x10d   : > { %3064 = vmatpush1.bf16.msra.mxu1 %v4891_v33  ;;  %v1131_v33 = vshrl.u32 %v1115_v29, 16 }
 0x10e   : > { %3065 = vmatprep.subr.bf16.mxu1 %v4899_v34  ;;  %2918 = vmatpush1.bf16.msra.mxu0 %v4966_v47  ;;  %v1139_v34 = vshrl.u32 %v1123_v30, 16 }
 0x10f   : > { %2919 = vmatprep.subr.bf16.mxu0 %v4974_v50 }
 0x111   : > { %3066 = vmatpush1.bf16.msra.mxu1 %v4897_v35  ;;  %v1164_v35 = vmul.u32 2246822507, %v1148_v31 }
 0x112   : > { %3067 = vmatprep.subr.bf16.mxu1 %v4905_v36  ;;  %2920 = vmatpush1.bf16.msra.mxu0 %v4972_v52  ;;  %v1172_v36 = vmul.u32 2246822507, %v1156_v32 }
 0x113   : > { %2932 = vmatprep.subr.bf16.mxu0 %v4980_v54 }
 0x115   : > { %3068 = vmatpush1.bf16.msra.mxu1 %v4903_v37  ;;  %v1147_v37 = vxor.u32 %v1131_v33, %v1115_v29 }
 0x116   : > { %3069 = vmatprep.subr.bf16.mxu1 %v4911_v38  ;;  %v1155_v38 = vxor.u32 %v1139_v34, %v1123_v30 }
 0x119   : > { %3070 = vmatpush1.bf16.msra.mxu1 %v4909_v39  ;;  %v1180_v39 = vshrl.u32 %v1164_v35, 13 }
 0x11a   : > { %3071 = vmatprep.subr.bf16.mxu1 %v4917_v40  ;;  %v1188_v40 = vshrl.u32 %v1172_v36, 13 }
 0x11b   : > { %v1196_v57 = vxor.u32 %v1180_v39, %v1164_v35 }
 0x11d   : > { %3072 = vmatpush1.bf16.msra.mxu1 %v4915_v41  ;;  %v1163_v41 = vmul.u32 2246822507, %v1147_v37  ;;  %v1212_v47 = vmul.u32 3266489909, %v1196_v57  ;;  %v1082_v57 = vadd.s32 640, %v5926_v10 }
 0x11e   : > { %3073 = vmatprep.subr.bf16.mxu1 %v4923_v42  ;;  %v1171_v42 = vmul.u32 2246822507, %v1155_v38 }
 0x11f   : > { %v1179_v44 = vshrl.u32 %v1163_v41, 13  ;;  %v1228_v52 = vshrl.u32 %v1212_v47, 16 }
 0x121   : > { %3074 = vmatpush1.bf16.msra.mxu1 %v4921_v43  ;;  %v1204_v43 = vxor.u32 %v1188_v40, %v1172_v36  ;;  %v502_v40 = vsub.s32 4, %v5922_v8 }
 0x122   : > { %3075 = vmatprep.subr.bf16.mxu1 %v4929_v45  ;;  %v1187_v45 = vshrl.u32 %v1171_v42, 13 }
 0x124   : > { %v1203_v50 = vxor.u32 %v1187_v45, %v1171_v42 }
 0x125   : > { %3076 = vmatpush1.bf16.msra.mxu1 %v4927_v48  ;;  %v1220_v48 = vmul.u32 3266489909, %v1204_v43  ;;  %v506_v43 = vsub.s32 5, %v5922_v8 }
 0x126   : > { %3077 = vmatprep.subr.bf16.mxu1 %v4935_v49  ;;  %v1195_v49 = vxor.u32 %v1179_v44, %v1163_v41 }
 0x128   : > { %v1211_v54 = vmul.u32 3266489909, %v1195_v49 }
 0x129   : > { %3078 = vmatpush1.bf16.msra.mxu1 %v4933_v51  ;;  %v1094_v51 = vmul.u32 3266489917, %v1080_v46 }
 0x12a   : > { %3079 = vmatprep.subr.bf16.mxu1 %v4941_v53  ;;  %v1236_v53 = vshrl.u32 %v1220_v48, 16 }
 0x12d   : > { %3080 = vmatpush1.bf16.msra.mxu1 %v4939_v55  ;;  %v1219_v55 = vmul.u32 3266489909, %v1203_v50 }
 0x12e   : > { %3081 = vmatprep.subr.bf16.mxu1 %v4947_v56  ;;  %v5953_v56 = vxor.u32 %v1094_v51, %v5930_v17 }
 0x131   : > { %3082 = vmatpush1.bf16.msra.mxu1 %v4945_v58  ;;  %v5956_v58 = vsub.s32 0, %v5922_v8 }
 0x132   : > { %3083 = vmatprep.subr.bf16.mxu1 %v4953_v59  ;;  %v5959_v59 = vxor.u32 %v1094_v51, %v5932_v18 }
 0x135   : > { %3084 = vmatpush1.bf16.msra.mxu1 %v4951_v60  ;;  %v5964_v60 = vld [vmem:[%s6250_s3] sm:$0xff] }
 0x136   : > { %3085 = vmatprep.subr.bf16.mxu1 %v4959_v61  ;;  %v5967_v61 = vsub.s32 1, %v5922_v8 }
 0x139   : > { %3086 = vmatpush1.bf16.msra.mxu1 %v4957_v62  ;;  %v1244_v62 = vxor.u32 %v1228_v52, %v1212_v47  ;;  %v503_v52 = vrot.slane %v5964_v60, %v502_v40 }
 0x13a   : > { %3087 = vmatprep.subr.bf16.mxu1 %v4965_v63  ;;  %v1252_v63 = vxor.u32 %v1236_v53, %v1220_v48 }
 0x13b   : > { %v1260_v7 = vshrl.u32 %v1244_v62, 8  ;;  %v507_v62 = vrot.slane %v5964_v60, %v506_v43 }
 0x13c   : > { %v1268_v9 = vshrl.u32 %v1252_v63, 8  ;;  %v4986_v63 = vld [vmem:[#allocation9 + $0x224] ss:$16 sps:$4 sm:$0xff]  }
 0x13d   : > { %3088 = vmatpush1.bf16.msra.mxu1 %v4963_v1  ;;  %v1227_v1 = vshrl.u32 %v1211_v54, 16  ;;  %vm5975_vm0 = vcmp.ge.s32.totalorder %v1260_v7, 5033165 }
 0x13e   : > { %3089 = vmatprep.subr.bf16.mxu1 %v4971_v2  ;;  %v1235_v2 = vshrl.u32 %v1219_v55, 16  ;;  %vm5979_vm1 = vcmp.ge.s32.totalorder %v1268_v9, 5033165 }
 0x13f   : > { %v1243_v0 = vxor.u32 %v1227_v1, %v1211_v54  ;;  %vm4567_vm8 = vmpackc.low %vm5979_vm1, %vm5975_vm0  ;;  %v4978_v54 = vld [vmem:[#allocation9 + $0x200] ss:$16 sps:$4 sm:$0xff]   ;;  %v4989_v1 = vld [vmem:[#allocation9 + $0x22c] ss:$16 sps:$4 sm:$0xff]  }
 0x140   : > { %v1251_v11 = vxor.u32 %v1235_v2, %v1219_v55  ;;  %v4981_v55 = vld [vmem:[#allocation9 + $0x208] ss:$16 sps:$4 sm:$0xff]  }
 0x141   : > { %3090 = vmatpush1.bf16.msra.mxu1 %v4969_v3  ;;  %v1118_v3 = vxor.u32 668265263, %v5953_v56  ;;  %v1259_v27 = vshrl.u32 %v1243_v0, 8  ;;  %v4987_v0 = vld [vmem:[#allocation9 + $0x228] ss:$16 sps:$4 sm:$0xff]  }
 0x142   : > { %3091 = vmatprep.subr.bf16.mxu1 %v4977_v4  ;;  %v487_v4 = vrot.slane %v5964_v60, %v5956_v58  ;;  %v1267_v31 = vshrl.u32 %v1251_v11, 8  ;;  %v4992_v11 = vld [vmem:[#allocation9 + $0x244] ss:$16 sps:$4 sm:$0xff]  }
 0x143   : > { %v1134_v13 = vshrl.u32 %v1118_v3, 16  ;;  %vm5984_vm6 = vcmp.ge.s32.totalorder %v1259_v27, 5033165 }
 0x144   : > { %vm5988_vm7 = vcmp.ge.s32.totalorder %v1267_v31, 5033165 }
 0x145   : > { %3092 = vmatpush1.bf16.msra.mxu1 %v4975_v5  ;;  %v1126_v5 = vxor.u32 668265263, %v5959_v59  ;;  %v1150_v34 = vxor.u32 %v1134_v13, %v1118_v3  ;;  %vm4570_vm9 = vmpackc.low %vm5988_vm7, %vm5984_vm6  ;;  %v6004_v3 = vadd.s32 256, %v5926_v10 }
 0x146   : > { %3104 = vmatprep.subr.bf16.mxu1 %v4983_v6  ;;  %v491_v6 = vrot.slane %v5964_v60, %v5967_v61 }
 0x147   : > { %v1142_v16 = vshrl.u32 %v1126_v5, 16  ;;  %v1166_v47 = vmul.u32 2246822507, %v1150_v34  ;;  %v1093_v27 = vmul.u32 3266489917, %v6004_v3 }
 0x148   : > { %v5005_v3 = vld [vmem:[#allocation9 + $0x288] ss:$16 sps:$4 sm:$0xff]  }
 0x149   : > { %v1158_v37 = vxor.u32 %v1142_v16, %v1126_v5  ;;  %v1182_v2 = vshrl.u32 %v1166_v47, 13  ;;  %v4984_v5 = vld [vmem:[#allocation9 + $0x220] ss:$16 sps:$4 sm:$0xff]  }
 0x14b   : > { %v1174_v51 = vmul.u32 2246822507, %v1158_v37  ;;  %v5001_v37 = vld [vmem:[#allocation9 + $0x26c] ss:$16 sps:$4 sm:$0xff]  }
 0x19b   : > { %v884_v12 = vpop.f32.mrb[0].mxu1 }
 0x19c   : > { %v885_v14 = vadd.f32 %v884_v12, %v487_v4  ;;  %v886_v15 = vpop.f32.mrb[1].mxu1 }
 0x19d   : > { %v887_v19 = vadd.f32 %v886_v15, %v491_v6  ;;  %v888_v22 = vpop.f32.mrb[2].mxu1  ;;  %v1198_v15 = vxor.u32 %v1182_v2, %v1166_v47  ;;  %v4999_v47 = vld [vmem:[#allocation9 + $0x268] ss:$16 sps:$4 sm:$0xff]   ;;  %v5002_v2 = vld [vmem:[#allocation9 + $0x280] ss:$16 sps:$4 sm:$0xff]  }
 0x19e   : > { %vm1022_vm2 = vcmp.gt.f32.partialorder %v885_v14, 0.0  ;;  %v1038_v28 = vmul.f32 0.2, %v885_v14  ;;  %v889_v29 = vadd.f32 %v888_v22, %v487_v4  ;;  %v890_v30 = vpop.f32.mrb[3].mxu1  ;;  %v970_v4 = vpop.f32.mrb[0].mxu0 }
 0x19f   : > { %vm1023_vm3 = vcmp.gt.f32.partialorder %v887_v19, 0.0  ;;  %v1039_v32 = vmul.f32 0.2, %v887_v19  ;;  %v891_v33 = vadd.f32 %v890_v30, %v491_v6  ;;  %v1190_v6 = vshrl.u32 %v1174_v51, 13  ;;  %v972_v9 = vpop.f32.mrb[1].mxu0 }
 0x1a0   : > { %v1054_v35 = vsel %vm1022_vm2, %v885_v14, %v1038_v28  ;;  %vm1030_vm4 = vcmp.gt.f32.partialorder %v889_v29, 0.0  ;;  %v1046_v36 = vmul.f32 0.2, %v889_v29  ;;  %v971_v7 = vadd.f32 %v970_v4, %v503_v52  ;;  %v974_v13 = vpop.f32.mrb[2].mxu0  ;;  %v4995_v14 = vld [vmem:[#allocation9 + $0x24c] ss:$16 sps:$4 sm:$0xff]  }
 0x1a1   : > { %v1055_v38 = vsel %vm1023_vm3, %v887_v19, %v1039_v32  ;;  %vm1031_vm5 = vcmp.gt.f32.partialorder %v891_v33, 0.0  ;;  %v1047_v39 = vmul.f32 0.2, %v891_v33  ;;  %v1291_v44 = vmul.f32 1.4285715, %v1054_v35  ;;  %v976_v22 = vpop.f32.mrb[3].mxu0 }
 0x1a2   : > { %v1062_v41 = vsel %vm1030_vm4, %v889_v29, %v1046_v36  ;;  %v1292_v48 = vmul.f32 1.4285715, %v1055_v38  ;;  %v973_v12 = vadd.f32 %v972_v9, %v507_v62  ;;  %vm1026_vm10 = vcmp.gt.f32.partialorder %v971_v7, 0.0  ;;  %v4998_v30 = vld [vmem:[#allocation9 + $0x264] ss:$16 sps:$4 sm:$0xff]  }
 0x1a3   : > { %v1299_v45 = vmul.f32 1.4285715, %v1062_v41  ;;  %v1063_v46 = vsel %vm1031_vm5, %v891_v33, %v1047_v39  ;;  %v1042_v16 = vmul.f32 0.2, %v971_v7  ;;  %v975_v19 = vadd.f32 %v974_v13, %v503_v52  ;;  %v5010_v4 = vld [vmem:[#allocation9 + $0x2a4] ss:$16 sps:$4 sm:$0xff]  }
 0x1a4   : > { %v1300_v49 = vmul.f32 1.4285715, %v1063_v46  ;;  %vm1027_vm11 = vcmp.gt.f32.partialorder %v973_v12, 0.0  ;;  %v1043_v28 = vmul.f32 0.2, %v973_v12  ;;  %v977_v29 = vadd.f32 %v976_v22, %v507_v62 }
 0x1a5   : > { %v4571_v50 = vpack.c.bf16 %v1299_v45, %v1291_v44  ;;  %v1206_v31 = vxor.u32 %v1190_v6, %v1174_v51  ;;  %v1058_v32 = vsel %vm1026_vm10, %v971_v7, %v1042_v16  ;;  %vm1034_vm12 = vcmp.gt.f32.partialorder %v975_v19, 0.0  ;;  %v4996_v46 = vld [vmem:[#allocation9 + $0x260] ss:$16 sps:$4 sm:$0xff]   ;;  %v5019_v22 = vld [vmem:[#allocation9 + $0x2cc] ss:$16 sps:$4 sm:$0xff]  }
 0x1a6   : > { %v4568_v53 = vpack.c.bf16 %v1300_v49, %v1292_v48  ;;  %v1050_v33 = vmul.f32 0.2, %v975_v19  ;;  %v1295_v34 = vmul.f32 1.4285715, %v1058_v32  ;;  %v1059_v35 = vsel %vm1027_vm11, %v973_v12, %v1043_v28  ;;  %v5004_v49 = vld [vmem:[#allocation9 + $0x284] ss:$16 sps:$4 sm:$0xff]  }
 0x1a7   : > { %vm1035_vm13 = vcmp.gt.f32.partialorder %v977_v29, 0.0  ;;  %v1051_v36 = vmul.f32 0.2, %v977_v29  ;;  %v1214_v38 = vmul.u32 3266489909, %v1198_v15  ;;  %v6009_v44 = vxor.u32 %v1093_v27, %v5930_v17 }
 0x1a8   : > { %4569 = vmatprep.mubr.msk.bf16.mxu0 %vm4567_vm8, %v4568_v53  ;;  %4593 = vmatprep.mubr.msk.bf16.mxu1 %vm4567_vm8, %v4568_v53  ;;  %v1296_v39 = vmul.f32 1.4285715, %v1059_v35  ;;  %v1066_v40 = vsel %vm1034_vm12, %v975_v19, %v1050_v33  ;;  %v1222_v43 = vmul.u32 3266489909, %v1206_v31  ;;  %v494_v53 = vsub.s32 2, %v5922_v8 }
 0x1a9   : > { %4572 = vmatmul.mubr.msk.bf16.vlgmr.msra.gmra.mrb[4].mxu0 %vm4570_vm9, %v4571_v50  ;;  %4596 = vmatmul.mubr.msk.bf16.vlgmr.msra.gmra.mrb[12].mxu1 %vm4570_vm9, %v4571_v50  ;;  %v1303_v41 = vmul.f32 1.4285715, %v1066_v40  ;;  %v1067_v42 = vsel %vm1035_vm13, %v977_v29, %v1051_v36  ;;  %v5007_v50 = vld [vmem:[#allocation9 + $0x28c] ss:$16 sps:$4 sm:$0xff]   ;;  %v1230_v51 = vshrl.u32 %v1214_v38, 16 }
 0x1aa   : > { %2933 = vmatpush1.bf16.msra.mxu0 %v4978_v54  ;;  %3105 = vmatpush1.bf16.msra.mxu1 %v4981_v55  ;;  %v1304_v45 = vmul.f32 1.4285715, %v1067_v42  ;;  %v1096_v54 = vmul.u32 3266489917, %v1082_v57  ;;  %v498_v55 = vsub.s32 3, %v5922_v8  ;;  %v1238_v62 = vshrl.u32 %v1222_v43, 16 }
 0x1ab   : > { %2934 = vmatprep.subr.bf16.mxu0 %v4986_v63  ;;  %3106 = vmatprep.subr.bf16.mxu1 %v4989_v1  ;;  %v6011_v48 = vpack.c.bf16 %v1303_v41, %v1295_v34  ;;  %v6018_v63 = vxor.u32 %v1093_v27, %v5932_v18  ;;  %v1117_v1 = vxor.u32 668265263, %v6009_v44  ;;  %v1246_v6 = vxor.u32 %v1230_v51, %v1214_v38  ;;  %v5011_v15 = vld [vmem:[#allocation9 + $0x2a8] ss:$16 sps:$4 sm:$0xff]   ;;  %v5016_v19 = vld [vmem:[#allocation9 + $0x2c4] ss:$16 sps:$4 sm:$0xff]  }
 0x1ac   : > { %v6013_v52 = vpack.c.bf16 %v1304_v45, %v1296_v39  ;;  %v495_v7 = vrot.slane %v5964_v60, %v494_v53  ;;  %v6025_v9 = vxor.u32 %v1096_v54, %v5930_v17  ;;  %v6032_v16 = vxor.u32 %v1096_v54, %v5932_v18  ;;  %v5014_v27 = vld [vmem:[#allocation9 + $0x2c0] ss:$16 sps:$4 sm:$0xff]   ;;  %v5017_v28 = vld [vmem:[#allocation9 + $0x2c8] ss:$16 sps:$4 sm:$0xff]   ;;  %v5022_v32 = vld [vmem:[#allocation9 + $0x2e4] ss:$16 sps:$4 sm:$0xff]  }
 0x1ad   : > { %v1125_v12 = vxor.u32 668265263, %v6018_v63  ;;  %v1133_v13 = vshrl.u32 %v1117_v1, 16  ;;  %v5025_v33 = vld [vmem:[#allocation9 + $0x2ec] ss:$16 sps:$4 sm:$0xff]  }
 0x1ae   : > { %2935 = vmatpush1.bf16.msra.mxu0 %v4984_v5  ;;  %3107 = vmatpush1.bf16.msra.mxu1 %v4987_v0  ;;  %v5013_v5 = vld [vmem:[#allocation9 + $0x2ac] ss:$16 sps:$4 sm:$0xff]   ;;  %v499_v0 = vrot.slane %v5964_v60, %v498_v55  ;;  %v1120_v31 = vxor.u32 668265263, %v6025_v9  ;;  %v1128_v42 = vxor.u32 668265263, %v6032_v16 }
 0x1af   : > { %2936 = vmatprep.subr.bf16.mxu0 %v4992_v11  ;;  %3108 = vmatprep.subr.bf16.mxu1 %v4995_v14  ;;  %v1254_v11 = vxor.u32 %v1238_v62, %v1222_v43  ;;  %v5008_v14 = vld [vmem:[#allocation9 + $0x2a0] ss:$16 sps:$4 sm:$0xff]   ;;  %v6035_v38 = vxor.u32 %v1133_v13, %v1117_v1 }
 0x1b0   : > { %v1136_v51 = vshrl.u32 %v1120_v31, 16 }
 0x1b1   : > { %v1270_v36 = vshrl.u32 %v1254_v11, 8 }
 0x1b2   : > { %2937 = vmatpush1.bf16.msra.mxu0 %v4990_v23  ;;  %3109 = vmatpush1.bf16.msra.mxu1 %v4993_v24  ;;  %v1262_v24 = vshrl.u32 %v1246_v6, 8  ;;  %v5028_v6 = vld [vmem:[#allocation9 + $0x304] ss:$16 sps:$4 sm:$0xff]   ;;  %v1152_v16 = vxor.u32 %v1136_v51, %v1120_v31 }
 0x1b3   : > { %2938 = vmatprep.subr.bf16.mxu0 %v4998_v30  ;;  %3110 = vmatprep.subr.bf16.mxu1 %v5001_v37  ;;  %v1141_v37 = vshrl.u32 %v1125_v12, 16  ;;  %vm6042_vm3 = vcmp.ge.s32.totalorder %v1270_v36, 5033165  ;;  %v5052_v51 = vld [vmem:[#allocation9 + $0x384] ss:$16 sps:$4 sm:$0xff]  }
 0x1b4   : > { %vm6038_vm0 = vcmp.ge.s32.totalorder %v1262_v24, 5033165 }
 0x1b5   : > { %v1157_v11 = vxor.u32 %v1141_v37, %v1125_v12  ;;  %vm4573_vm4 = vmpackc.low %vm6042_vm3, %vm6038_vm0  ;;  %v5034_v12 = vld [vmem:[#allocation9 + $0x324] ss:$16 sps:$4 sm:$0xff]  }
 0x1b6   : > { %2939 = vmatpush1.bf16.msra.mxu0 %v4996_v46  ;;  %3111 = vmatpush1.bf16.msra.mxu1 %v4999_v47  ;;  %v5020_v46 = vld [vmem:[#allocation9 + $0x2e0] ss:$16 sps:$4 sm:$0xff]   ;;  %v5023_v47 = vld [vmem:[#allocation9 + $0x2e8] ss:$16 sps:$4 sm:$0xff]  }
 0x1b7   : > { %2940 = vmatprep.subr.bf16.mxu0 %v5004_v49  ;;  %3112 = vmatprep.subr.bf16.mxu1 %v5007_v50 }
 0x1ba   : > { %2941 = vmatpush1.bf16.msra.mxu0 %v5002_v2  ;;  %3113 = vmatpush1.bf16.msra.mxu1 %v5005_v3 }
 0x1bb   : > { %2942 = vmatprep.subr.bf16.mxu0 %v5010_v4  ;;  %3114 = vmatprep.subr.bf16.mxu1 %v5013_v5  ;;  %v927_v23 = vpop.f32.mrb[4].mxu1  ;;  %v1144_v5 = vshrl.u32 %v1128_v42, 16 }
 0x1bc   : > { %v928_v29 = vadd.f32 %v927_v23, %v495_v7  ;;  %v929_v30 = vpop.f32.mrb[5].mxu1 }
 0x1bd   : > { %v930_v34 = vadd.f32 %v929_v30, %v499_v0  ;;  %v931_v35 = vpop.f32.mrb[6].mxu1  ;;  %v1160_v24 = vxor.u32 %v1144_v5, %v1128_v42  ;;  %v1168_v30 = vmul.u32 2246822507, %v1152_v16  ;;  %v5046_v42 = vld [vmem:[#allocation9 + $0x364] ss:$16 sps:$4 sm:$0xff]  }
 0x1be   : > { %2943 = vmatpush1.bf16.msra.mxu0 %v5008_v14  ;;  %3115 = vmatpush1.bf16.msra.mxu1 %v5011_v15  ;;  %vm1024_vm14 = vcmp.gt.f32.partialorder %v928_v29, 0.0  ;;  %v1040_v39 = vmul.f32 0.2, %v928_v29  ;;  %v932_v40 = vadd.f32 %v931_v35, %v495_v7  ;;  %v933_v41 = vpop.f32.mrb[7].mxu1  ;;  %v5031_v7 = vld [vmem:[#allocation9 + $0x30c] ss:$16 sps:$4 sm:$0xff]  }
 0x1bf   : > { %2944 = vmatprep.subr.bf16.mxu0 %v5016_v19  ;;  %3116 = vmatprep.subr.bf16.mxu1 %v5019_v22  ;;  %vm1025_vm15 = vcmp.gt.f32.partialorder %v930_v34, 0.0  ;;  %v1041_v57 = vmul.f32 0.2, %v930_v34  ;;  %v934_v43 = vadd.f32 %v933_v41, %v499_v0  ;;  %v1165_v15 = vmul.u32 2246822507, %v6035_v38 }
 0x1c0   : > { %v1056_v49 = vsel %vm1024_vm14, %v928_v29, %v1040_v39  ;;  %vm1032_vm1 = vcmp.gt.f32.partialorder %v932_v40, 0.0  ;;  %v1048_v50 = vmul.f32 0.2, %v932_v40  ;;  %v5026_v19 = vld [vmem:[#allocation9 + $0x300] ss:$16 sps:$4 sm:$0xff]   ;;  %v1184_v38 = vshrl.u32 %v1168_v30, 13 }
 0x1c1   : > { %v1293_v54 = vmul.f32 1.4285715, %v1056_v49  ;;  %v1057_v62 = vsel %vm1025_vm15, %v930_v34, %v1041_v57  ;;  %vm1033_vm2 = vcmp.gt.f32.partialorder %v934_v43, 0.0  ;;  %v1049_v1 = vmul.f32 0.2, %v934_v43 }
 0x1c2   : > { %2945 = vmatpush1.bf16.msra.mxu0 %v5014_v27  ;;  %3117 = vmatpush1.bf16.msra.mxu1 %v5017_v28  ;;  %v1294_v2 = vmul.f32 1.4285715, %v1057_v62  ;;  %v1064_v3 = vsel %vm1032_vm1, %v932_v40, %v1048_v50  ;;  %v5029_v22 = vld [vmem:[#allocation9 + $0x308] ss:$16 sps:$4 sm:$0xff]   ;;  %v5037_v27 = vld [vmem:[#allocation9 + $0x32c] ss:$16 sps:$4 sm:$0xff]  }
 0x1c3   : > { %2946 = vmatprep.subr.bf16.mxu0 %v5022_v32  ;;  %3118 = vmatprep.subr.bf16.mxu1 %v5025_v33  ;;  %v1301_v9 = vmul.f32 1.4285715, %v1064_v3  ;;  %v1065_v0 = vsel %vm1033_vm2, %v934_v43, %v1049_v1  ;;  %v1173_v28 = vmul.u32 2246822507, %v1157_v11  ;;  %v1181_v29 = vshrl.u32 %v1165_v15, 13 }
 0x1c4   : > { %v1302_v13 = vmul.f32 1.4285715, %v1065_v0  ;;  %v5032_v32 = vld [vmem:[#allocation9 + $0x320] ss:$16 sps:$4 sm:$0xff]   ;;  %v5035_v33 = vld [vmem:[#allocation9 + $0x328] ss:$16 sps:$4 sm:$0xff]  }
 0x1c5   : > { %v6046_v14 = vpack.c.bf16 %v1301_v9, %v1293_v54  ;;  %v1176_v31 = vmul.u32 2246822507, %v1160_v24  ;;  %v5040_v34 = vld [vmem:[#allocation9 + $0x344] ss:$16 sps:$4 sm:$0xff]   ;;  %v5043_v35 = vld [vmem:[#allocation9 + $0x34c] ss:$16 sps:$4 sm:$0xff]   ;;  %v1197_v37 = vxor.u32 %v1181_v29, %v1165_v15 }
 0x1c6   : > { %2947 = vmatpush1.bf16.msra.mxu0 %v5020_v46  ;;  %3119 = vmatpush1.bf16.msra.mxu1 %v5023_v47  ;;  %v4574_v23 = vpack.c.bf16 %v1302_v13, %v1294_v2  ;;  %v1189_v36 = vshrl.u32 %v1173_v28, 13  ;;  %v5038_v39 = vld [vmem:[#allocation9 + $0x340] ss:$16 sps:$4 sm:$0xff]   ;;  %v5041_v40 = vld [vmem:[#allocation9 + $0x348] ss:$16 sps:$4 sm:$0xff]   ;;  %v1200_v46 = vxor.u32 %v1184_v38, %v1168_v30  ;;  %v510_v1 = vsub.s32 6, %v5922_v8 }
 0x1c7   : > { %2948 = vmatprep.subr.bf16.mxu0 %v5028_v6  ;;  %3120 = vmatprep.subr.bf16.mxu1 %v5031_v7  ;;  %v1192_v41 = vshrl.u32 %v1176_v31, 13  ;;  %v5049_v57 = vld [vmem:[#allocation9 + $0x36c] ss:$16 sps:$4 sm:$0xff]   ;;  %v1213_v45 = vmul.u32 3266489909, %v1197_v37  ;;  %v514_v7 = vsub.s32 7, %v5922_v8 }
 0x1c8   : > { %4575 = vmatprep.mubr.msk.bf16.mxu0 %vm4573_vm4, %v4574_v23  ;;  %4599 = vmatprep.mubr.msk.bf16.mxu1 %vm4573_vm4, %v4574_v23  ;;  %v1205_v43 = vxor.u32 %v1189_v36, %v1173_v28  ;;  %v5044_v47 = vld [vmem:[#allocation9 + $0x360] ss:$16 sps:$4 sm:$0xff]   ;;  %v5047_v49 = vld [vmem:[#allocation9 + $0x368] ss:$16 sps:$4 sm:$0xff]   ;;  %v5055_v54 = vld [vmem:[#allocation9 + $0x38c] ss:$16 sps:$4 sm:$0xff]   ;;  %v511_v13 = vrot.slane %v5964_v60, %v510_v1 }
 0x1c9   : > { %v1208_v50 = vxor.u32 %v1192_v41, %v1176_v31  ;;  %v5050_v2 = vld [vmem:[#allocation9 + $0x380] ss:$16 sps:$4 sm:$0xff]   ;;  %v1229_v3 = vshrl.u32 %v1213_v45, 16  ;;  %v1216_v4 = vmul.u32 3266489909, %v1200_v46 }
 0x1ca   : > { %2949 = vmatpush1.bf16.msra.mxu0 %v5026_v19  ;;  %3121 = vmatpush1.bf16.msra.mxu1 %v5029_v22  ;;  %v1221_v62 = vmul.u32 3266489909, %v1205_v43  ;;  %v5053_v5 = vld [vmem:[#allocation9 + $0x388] ss:$16 sps:$4 sm:$0xff]   ;;  %v5058_v9 = vld [vmem:[#allocation9 + $0x3a4] ss:$16 sps:$4 sm:$0xff]   ;;  %v515_v19 = vrot.slane %v5964_v60, %v514_v7 }
 0x1cb   : > { %2950 = vmatprep.subr.bf16.mxu0 %v5034_v12  ;;  %3122 = vmatprep.subr.bf16.mxu1 %v5037_v27  ;;  %v1224_v6 = vmul.u32 3266489909, %v1208_v50  ;;  %v5061_v0 = vld [vmem:[#allocation9 + $0x3ac] ss:$16 sps:$4 sm:$0xff]   ;;  %v1245_v15 = vxor.u32 %v1229_v3, %v1213_v45  ;;  %v1232_v16 = vshrl.u32 %v1216_v4, 16 }
 0x1cc   : > { %v1237_v11 = vshrl.u32 %v1221_v62, 16  ;;  %v5056_v22 = vld [vmem:[#allocation9 + $0x3a0] ss:$16 sps:$4 sm:$0xff]   ;;  %v5059_v23 = vld [vmem:[#allocation9 + $0x3a8] ss:$16 sps:$4 sm:$0xff]  }
 0x1cd   : > { %v1240_v24 = vshrl.u32 %v1224_v6, 16  ;;  %v5064_v12 = vld [vmem:[#allocation9 + $0x3c4] ss:$16 sps:$4 sm:$0xff]   ;;  %v5067_v27 = vld [vmem:[#allocation9 + $0x3cc] ss:$16 sps:$4 sm:$0xff]  }
 0x1ce   : > { %2951 = vmatpush1.bf16.msra.mxu0 %v5032_v32  ;;  %3123 = vmatpush1.bf16.msra.mxu1 %v5035_v33  ;;  %v1253_v28 = vxor.u32 %v1237_v11, %v1221_v62  ;;  %v5062_v33 = vld [vmem:[#allocation9 + $0x3c0] ss:$16 sps:$4 sm:$0xff]   ;;  %v5065_v31 = vld [vmem:[#allocation9 + $0x3c8] ss:$16 sps:$4 sm:$0xff]   ;;  %v5070_v60 = vld [vmem:[#allocation9 + $0x3e4] ss:$16 sps:$4 sm:$0xff]  }
 0x1cf   : > { %2952 = vmatprep.subr.bf16.mxu0 %v5040_v34  ;;  %3124 = vmatprep.subr.bf16.mxu1 %v5043_v35  ;;  %v1261_v34 = vshrl.u32 %v1245_v15, 8  ;;  %v1248_v35 = vxor.u32 %v1232_v16, %v1216_v4  ;;  %v1256_v38 = vxor.u32 %v1240_v24, %v1224_v6  ;;  %v5068_v46 = vld [vmem:[#allocation9 + $0x3e0] ss:$16 sps:$4 sm:$0xff]   ;;  %v5118_v7 = vld [vmem:[#allocation9 + $0x4e4] ss:$16 sps:$4 sm:$0xff]  }
 0x1d0   : > { %v5074_v15 = vld [vmem:[#allocation9 + $0x400] ss:$16 sps:$4 sm:$0xff]  }
 0x1d1   : > { %v1264_v3 = vshrl.u32 %v1248_v35, 8  ;;  %v1272_v4 = vshrl.u32 %v1256_v38, 8  ;;  %vm6057_vm9 = vcmp.ge.s32.totalorder %v1261_v34, 5033165  ;;  %v5097_v34 = vld [vmem:[#allocation9 + $0x46c] ss:$16 sps:$4 sm:$0xff]  }
 0x1d2   : > { %2953 = vmatpush1.bf16.msra.mxu0 %v5038_v39  ;;  %3125 = vmatpush1.bf16.msra.mxu1 %v5041_v40  ;;  %v1081_v35 = vadd.s32 512, %v5926_v10  ;;  %v5100_v38 = vld [vmem:[#allocation9 + $0x484] ss:$16 sps:$4 sm:$0xff]  }
 0x1d3   : > { %2954 = vmatprep.subr.bf16.mxu0 %v5046_v42  ;;  %3126 = vmatprep.subr.bf16.mxu1 %v5049_v57  ;;  %v5073_v42 = vld [vmem:[#allocation9 + $0x3ec] ss:$16 sps:$4 sm:$0xff]   ;;  %v1269_v57 = vshrl.u32 %v1253_v28, 8  ;;  %vm6071_vm12 = vcmp.ge.s32.totalorder %v1264_v3, 5033165 }
 0x1d4   : > { %vm6075_vm13 = vcmp.ge.s32.totalorder %v1272_v4, 5033165  ;;  %v5080_v28 = vld [vmem:[#allocation9 + $0x420] ss:$16 sps:$4 sm:$0xff]   ;;  %v5113_v4 = vld [vmem:[#allocation9 + $0x4c8] ss:$16 sps:$4 sm:$0xff]  }
 0x1d5   : > { %vm6061_vm10 = vcmp.ge.s32.totalorder %v1269_v57, 5033165  ;;  %vm4579_vm14 = vmpackc.low %vm6075_vm13, %vm6071_vm12  ;;  %v5106_v57 = vld [vmem:[#allocation9 + $0x4a4] ss:$16 sps:$4 sm:$0xff]   ;;  %v5110_v3 = vld [vmem:[#allocation9 + $0x4c0] ss:$16 sps:$4 sm:$0xff]  }
 0x1d6   : > { %2955 = vmatpush1.bf16.msra.mxu0 %v5044_v47  ;;  %3127 = vmatpush1.bf16.msra.mxu1 %v5047_v49  ;;  %v5071_v47 = vld [vmem:[#allocation9 + $0x3e8] ss:$16 sps:$4 sm:$0xff]   ;;  %vm4576_vm11 = vmpackc.low %vm6061_vm10, %vm6057_vm9 }
 0x1d7   : > { %2956 = vmatprep.subr.bf16.mxu0 %v5052_v51  ;;  %3128 = vmatprep.subr.bf16.mxu1 %v5055_v54  ;;  %v5076_v51 = vld [vmem:[#allocation9 + $0x404] ss:$16 sps:$4 sm:$0xff]  }
 0x1da   : > { %2957 = vmatpush1.bf16.msra.mxu0 %v5050_v2  ;;  %3129 = vmatpush1.bf16.msra.mxu1 %v5053_v5  ;;  %v5079_v2 = vld [vmem:[#allocation9 + $0x40c] ss:$16 sps:$4 sm:$0xff]  }
 0x1db   : > { %2958 = vmatprep.subr.bf16.mxu0 %v5058_v9  ;;  %3130 = vmatprep.subr.bf16.mxu1 %v5061_v0  ;;  %v1013_v29 = vpop.f32.mrb[8].mxu1  ;;  %v5121_v9 = vld [vmem:[#allocation9 + $0x4ec] ss:$16 sps:$4 sm:$0xff]  }
 0x1dc   : > { %v1014_v30 = vadd.f32 %v1013_v29, %v511_v13  ;;  %v1015_v32 = vpop.f32.mrb[9].mxu1  ;;  %v5083_v29 = vld [vmem:[#allocation9 + $0x428] ss:$16 sps:$4 sm:$0xff]  }
 0x1dd   : > { %v1016_v36 = vadd.f32 %v1015_v32, %v515_v19  ;;  %v1017_v37 = vpop.f32.mrb[10].mxu1  ;;  %v5091_v32 = vld [vmem:[#allocation9 + $0x44c] ss:$16 sps:$4 sm:$0xff]  }
 0x1de   : > { %2959 = vmatpush1.bf16.msra.mxu0 %v5056_v22  ;;  %3131 = vmatpush1.bf16.msra.mxu1 %v5059_v23  ;;  %vm1028_vm5 = vcmp.gt.f32.partialorder %v1014_v30, 0.0  ;;  %v1044_v39 = vmul.f32 0.2, %v1014_v30  ;;  %v1018_v40 = vadd.f32 %v1017_v37, %v511_v13  ;;  %v1019_v41 = vpop.f32.mrb[11].mxu1  ;;  %v5095_v37 = vld [vmem:[#allocation9 + $0x468] ss:$16 sps:$4 sm:$0xff]  }
 0x1df   : > { %2960 = vmatprep.subr.bf16.mxu0 %v5064_v12  ;;  %3132 = vmatprep.subr.bf16.mxu1 %v5067_v27  ;;  %vm1029_vm6 = vcmp.gt.f32.partialorder %v1016_v36, 0.0  ;;  %v1045_v43 = vmul.f32 0.2, %v1016_v36  ;;  %v1020_v45 = vadd.f32 %v1019_v41, %v515_v19  ;;  %v5077_v19 = vld [vmem:[#allocation9 + $0x408] ss:$16 sps:$4 sm:$0xff]  }
 0x1e0   : > { %v1060_v49 = vsel %vm1028_vm5, %v1014_v30, %v1044_v39  ;;  %vm1036_vm7 = vcmp.gt.f32.partialorder %v1018_v40, 0.0  ;;  %v1052_v50 = vmul.f32 0.2, %v1018_v40  ;;  %v5082_v12 = vld [vmem:[#allocation9 + $0x424] ss:$16 sps:$4 sm:$0xff]  }
 0x1e1   : > { %v1297_v54 = vmul.f32 1.4285715, %v1060_v49  ;;  %v1061_v62 = vsel %vm1029_vm6, %v1016_v36, %v1045_v43  ;;  %vm1037_vm8 = vcmp.gt.f32.partialorder %v1020_v45, 0.0  ;;  %v1053_v1 = vmul.f32 0.2, %v1020_v45 }
 0x1e2   : > { %2961 = vmatpush1.bf16.msra.mxu0 %v5062_v33  ;;  %3133 = vmatpush1.bf16.msra.mxu1 %v5065_v31  ;;  %v1298_v5 = vmul.f32 1.4285715, %v1061_v62  ;;  %v1068_v6 = vsel %vm1036_vm7, %v1018_v40, %v1052_v50  ;;  %v5085_v27 = vld [vmem:[#allocation9 + $0x42c] ss:$16 sps:$4 sm:$0xff]   ;;  %v5088_v30 = vld [vmem:[#allocation9 + $0x444] ss:$16 sps:$4 sm:$0xff]  }
 0x1e3   : > { %2962 = vmatprep.subr.bf16.mxu0 %v5070_v60  ;;  %3134 = vmatprep.subr.bf16.mxu1 %v5073_v42  ;;  %v1305_v0 = vmul.f32 1.4285715, %v1068_v6  ;;  %v1069_v11 = vsel %vm1037_vm8, %v1020_v45, %v1053_v1  ;;  %v5089_v33 = vld [vmem:[#allocation9 + $0x448] ss:$16 sps:$4 sm:$0xff]   ;;  %v5094_v31 = vld [vmem:[#allocation9 + $0x464] ss:$16 sps:$4 sm:$0xff]  }
 0x1e4   : > { %v1306_v13 = vmul.f32 1.4285715, %v1069_v11  ;;  %v5092_v36 = vld [vmem:[#allocation9 + $0x460] ss:$16 sps:$4 sm:$0xff]   ;;  %v1084_v60 = vadd.s32 896, %v5926_v10 }
 0x1e5   : > { %v6065_v16 = vpack.c.bf16 %v1305_v0, %v1297_v54  ;;  %v1095_v39 = vmul.u32 3266489917, %v1081_v35  ;;  %v5098_v40 = vld [vmem:[#allocation9 + $0x480] ss:$16 sps:$4 sm:$0xff]   ;;  %v5101_v41 = vld [vmem:[#allocation9 + $0x488] ss:$16 sps:$4 sm:$0xff]  }
 0x1e6   : > { %2963 = vmatpush1.bf16.msra.mxu0 %v5068_v46  ;;  %3135 = vmatpush1.bf16.msra.mxu1 %v5071_v47  ;;  %v6079_v24 = vpack.c.bf16 %v1306_v13, %v1298_v5  ;;  %v1098_v42 = vmul.u32 3266489917, %v1084_v60  ;;  %v5109_v43 = vld [vmem:[#allocation9 + $0x4ac] ss:$16 sps:$4 sm:$0xff]   ;;  %v5104_v47 = vld [vmem:[#allocation9 + $0x4a0] ss:$16 sps:$4 sm:$0xff]  }
 0x1e7   : > { %2975 = vmatprep.subr.bf16.mxu0 %v5076_v51  ;;  %3147 = vmatprep.subr.bf16.mxu1 %v5079_v2  ;;  %v1103_v45 = vxor.u32 %v1095_v39, %v5930_v17  ;;  %v1111_v46 = vxor.u32 %v1095_v39, %v5932_v18  ;;  %v5107_v49 = vld [vmem:[#allocation9 + $0x4a8] ss:$16 sps:$4 sm:$0xff]   ;;  %v5112_v50 = vld [vmem:[#allocation9 + $0x4c4] ss:$16 sps:$4 sm:$0xff]   ;;  %v5115_v62 = vld [vmem:[#allocation9 + $0x4cc] ss:$16 sps:$4 sm:$0xff]  }
 0x1e8   : > { %v1106_v51 = vxor.u32 %v1098_v42, %v5930_v17  ;;  %v1114_v54 = vxor.u32 %v1098_v42, %v5932_v18  ;;  %v5116_v13 = vld [vmem:[#allocation9 + $0x4e0] ss:$16 sps:$4 sm:$0xff]   ;;  %v5124_v23 = vld [vmem:[#allocation9 + $0x504] ss:$16 sps:$4 sm:$0xff]   ;;  %v5139_v39 = vld [vmem:[#allocation9 + $0x54c] ss:$16 sps:$4 sm:$0xff]  }
 0x1e9   : > { %4578 = vmatmul.mubr.msk.bf16.vlgmr.msra.gmra.mrb[4].mxu0 %vm4576_vm11, %v6046_v14  ;;  %4602 = vmatmul.mubr.msk.bf16.vlgmr.msra.gmra.mrb[12].mxu1 %vm4576_vm11, %v6046_v14  ;;  %v5086_v14 = vld [vmem:[#allocation9 + $0x440] ss:$16 sps:$4 sm:$0xff]   ;;  %v1119_v1 = vxor.u32 668265263, %v1103_v45  ;;  %v1127_v2 = vxor.u32 668265263, %v1111_v46 }
 0x1ea   : > { %2976 = vmatpush1.bf16.msra.mxu0 %v5074_v15  ;;  %3148 = vmatpush1.bf16.msra.mxu1 %v5077_v19  ;;  %v1122_v5 = vxor.u32 668265263, %v1106_v51  ;;  %v1130_v6 = vxor.u32 668265263, %v1114_v54  ;;  %v5119_v15 = vld [vmem:[#allocation9 + $0x4e8] ss:$16 sps:$4 sm:$0xff]  }
 0x1eb   : > { %2977 = vmatprep.subr.bf16.mxu0 %v5082_v12  ;;  %3149 = vmatprep.subr.bf16.mxu1 %v5085_v27  ;;  %v1135_v0 = vshrl.u32 %v1119_v1, 16  ;;  %v1143_v11 = vshrl.u32 %v1127_v2, 16  ;;  %v5127_v12 = vld [vmem:[#allocation9 + $0x50c] ss:$16 sps:$4 sm:$0xff]   ;;  %v5134_v42 = vld [vmem:[#allocation9 + $0x540] ss:$16 sps:$4 sm:$0xff]  }
 0x1ec   : > { %4581 = vmatprep.mubr.msk.bf16.mxu0 %vm4579_vm14, %v6013_v52  ;;  %4605 = vmatprep.mubr.msk.bf16.mxu1 %vm4579_vm14, %v6013_v52  ;;  %v5103_v52 = vld [vmem:[#allocation9 + $0x48c] ss:$16 sps:$4 sm:$0xff]   ;;  %v1138_v19 = vshrl.u32 %v1122_v5, 16  ;;  %v1146_v22 = vshrl.u32 %v1130_v6, 16  ;;  %v5142_v46 = vld [vmem:[#allocation9 + $0x564] ss:$16 sps:$4 sm:$0xff]  }
 0x1ed   : > { %v1151_v27 = vxor.u32 %v1135_v0, %v1119_v1  ;;  %v5140_v51 = vld [vmem:[#allocation9 + $0x560] ss:$16 sps:$4 sm:$0xff]   ;;  %v5143_v54 = vld [vmem:[#allocation9 + $0x568] ss:$16 sps:$4 sm:$0xff]  }
 0x1ee   : > { %2978 = vmatpush1.bf16.msra.mxu0 %v5080_v28  ;;  %3150 = vmatpush1.bf16.msra.mxu1 %v5083_v29  ;;  %v1159_v28 = vxor.u32 %v1143_v11, %v1127_v2  ;;  %v5122_v29 = vld [vmem:[#allocation9 + $0x500] ss:$16 sps:$4 sm:$0xff]   ;;  %v5154_v11 = vld [vmem:[#allocation9 + $0x5a4] ss:$16 sps:$4 sm:$0xff]  }
 0x1ef   : > { %2979 = vmatprep.subr.bf16.mxu0 %v5088_v30  ;;  %3151 = vmatprep.subr.bf16.mxu1 %v5091_v32  ;;  %v5125_v30 = vld [vmem:[#allocation9 + $0x508] ss:$16 sps:$4 sm:$0xff]   ;;  %v5130_v32 = vld [vmem:[#allocation9 + $0x524] ss:$16 sps:$4 sm:$0xff]  }
 0x1f0   : > { %v1175_v35 = vmul.u32 2246822507, %v1159_v28  ;;  %v5160_v28 = vld [vmem:[#allocation9 + $0x5c4] ss:$16 sps:$4 sm:$0xff]  }
 0x1f2   : > { %2980 = vmatpush1.bf16.msra.mxu0 %v5086_v14  ;;  %3152 = vmatpush1.bf16.msra.mxu1 %v5089_v33  ;;  %v1154_v14 = vxor.u32 %v1138_v19, %v1122_v5  ;;  %v1162_v33 = vxor.u32 %v1146_v22, %v1130_v6  ;;  %v5146_v6 = vld [vmem:[#allocation9 + $0x580] ss:$16 sps:$4 sm:$0xff]  }
 0x1f3   : > { %2981 = vmatprep.subr.bf16.mxu0 %v5094_v31  ;;  %3153 = vmatprep.subr.bf16.mxu1 %v5097_v34  ;;  %v5133_v31 = vld [vmem:[#allocation9 + $0x52c] ss:$16 sps:$4 sm:$0xff]   ;;  %v1167_v34 = vmul.u32 2246822507, %v1151_v27  ;;  %v5152_v22 = vld [vmem:[#allocation9 + $0x5a0] ss:$16 sps:$4 sm:$0xff]  }
 0x1f4   : > { %v1170_v60 = vmul.u32 2246822507, %v1154_v14  ;;  %v5158_v14 = vld [vmem:[#allocation9 + $0x5c0] ss:$16 sps:$4 sm:$0xff]  }
 0x1f6   : > { %2982 = vmatpush1.bf16.msra.mxu0 %v5092_v36  ;;  %3154 = vmatpush1.bf16.msra.mxu1 %v5095_v37  ;;  %v5128_v36 = vld [vmem:[#allocation9 + $0x520] ss:$16 sps:$4 sm:$0xff]   ;;  %v5131_v37 = vld [vmem:[#allocation9 + $0x528] ss:$16 sps:$4 sm:$0xff]  }
 0x1f7   : > { %2983 = vmatprep.subr.bf16.mxu0 %v5100_v38  ;;  %3155 = vmatprep.subr.bf16.mxu1 %v5103_v52  ;;  %v1178_v38 = vmul.u32 2246822507, %v1162_v33  ;;  %v5136_v52 = vld [vmem:[#allocation9 + $0x544] ss:$16 sps:$4 sm:$0xff]   ;;  %v5161_v33 = vld [vmem:[#allocation9 + $0x5c8] ss:$16 sps:$4 sm:$0xff]  }
 0x1f9   : > { %v1194_v45 = vshrl.u32 %v1178_v38, 13 }
 0x1fa   : > { %2984 = vmatpush1.bf16.msra.mxu0 %v5098_v40  ;;  %3156 = vmatpush1.bf16.msra.mxu1 %v5101_v41  ;;  %v1183_v40 = vshrl.u32 %v1167_v34, 13  ;;  %v1191_v41 = vshrl.u32 %v1175_v35, 13 }
 0x1fb   : > { %2985 = vmatprep.subr.bf16.mxu0 %v5106_v57  ;;  %3157 = vmatprep.subr.bf16.mxu1 %v5109_v43  ;;  %v5137_v57 = vld [vmem:[#allocation9 + $0x548] ss:$16 sps:$4 sm:$0xff]   ;;  %v1186_v43 = vshrl.u32 %v1170_v60, 13  ;;  %v1210_v2 = vxor.u32 %v1194_v45, %v1178_v38  ;;  %v5164_v38 = vld [vmem:[#allocation9 + $0x5e0] ss:$16 sps:$4 sm:$0xff]  }
 0x1fc   : > { %v5173_v45 = vld [vmem:[#allocation9 + $0x608] ss:$16 sps:$4 sm:$0xff]  }
 0x1fd   : > { %v1202_v1 = vxor.u32 %v1186_v43, %v1170_v60  ;;  %v1226_v0 = vmul.u32 3266489909, %v1210_v2  ;;  %v5170_v43 = vld [vmem:[#allocation9 + $0x600] ss:$16 sps:$4 sm:$0xff]   ;;  %v5185_v2 = vld [vmem:[#allocation9 + $0x648] ss:$16 sps:$4 sm:$0xff]  }
 0x1fe   : > { %2986 = vmatpush1.bf16.msra.mxu0 %v5104_v47  ;;  %3158 = vmatpush1.bf16.msra.mxu1 %v5107_v49  ;;  %v5145_v47 = vld [vmem:[#allocation9 + $0x56c] ss:$16 sps:$4 sm:$0xff]   ;;  %v1199_v49 = vxor.u32 %v1183_v40, %v1167_v34 }
 0x1ff   : > { %2987 = vmatprep.subr.bf16.mxu0 %v5112_v50  ;;  %3159 = vmatprep.subr.bf16.mxu1 %v5115_v62  ;;  %v1207_v50 = vxor.u32 %v1191_v41, %v1175_v35  ;;  %v5148_v62 = vld [vmem:[#allocation9 + $0x584] ss:$16 sps:$4 sm:$0xff]   ;;  %v1242_v27 = vshrl.u32 %v1226_v0, 16 }
 0x200   : > { %v5166_v35 = vld [vmem:[#allocation9 + $0x5e4] ss:$16 sps:$4 sm:$0xff]  }
 0x201   : > { %v1223_v5 = vmul.u32 3266489909, %v1207_v50  ;;  %v1258_v34 = vxor.u32 %v1242_v27, %v1226_v0  ;;  %v5181_v50 = vld [vmem:[#allocation9 + $0x62c] ss:$16 sps:$4 sm:$0xff]   ;;  %v5208_v27 = vld [vmem:[#allocation9 + $0x6c4] ss:$16 sps:$4 sm:$0xff]  }
 0x202   : > { %2988 = vmatpush1.bf16.msra.mxu0 %v5110_v3  ;;  %3160 = vmatpush1.bf16.msra.mxu1 %v5113_v4  ;;  %v5151_v3 = vld [vmem:[#allocation9 + $0x58c] ss:$16 sps:$4 sm:$0xff]   ;;  %v1215_v4 = vmul.u32 3266489909, %v1199_v49  ;;  %v5178_v49 = vld [vmem:[#allocation9 + $0x624] ss:$16 sps:$4 sm:$0xff]  }
 0x203   : > { %2989 = vmatprep.subr.bf16.mxu0 %v5118_v7  ;;  %3161 = vmatprep.subr.bf16.mxu1 %v5121_v9  ;;  %v5149_v7 = vld [vmem:[#allocation9 + $0x588] ss:$16 sps:$4 sm:$0xff]   ;;  %v1218_v9 = vmul.u32 3266489909, %v1202_v1  ;;  %v1239_v19 = vshrl.u32 %v1223_v5, 16  ;;  %v1274_v41 = vshrl.u32 %v1258_v34, 8 }
 0x204   : > { %v5187_v1 = vld [vmem:[#allocation9 + $0x64c] ss:$16 sps:$4 sm:$0xff]   ;;  %v5212_v34 = vld [vmem:[#allocation9 + $0x6e0] ss:$16 sps:$4 sm:$0xff]  }
 0x205   : > { %vm6105_vm3 = vcmp.ge.s32.totalorder %v1274_v41, 5033165  ;;  %v5199_v0 = vld [vmem:[#allocation9 + $0x68c] ss:$16 sps:$4 sm:$0xff]  }
 0x206   : > { %2990 = vmatpush1.bf16.msra.mxu0 %v5116_v13  ;;  %3162 = vmatpush1.bf16.msra.mxu1 %v5119_v15  ;;  %v5157_v13 = vld [vmem:[#allocation9 + $0x5ac] ss:$16 sps:$4 sm:$0xff]   ;;  %v1231_v15 = vshrl.u32 %v1215_v4, 16 }
 0x207   : > { %2991 = vmatprep.subr.bf16.mxu0 %v5124_v23  ;;  %3163 = vmatprep.subr.bf16.mxu1 %v5127_v12  ;;  %v5155_v23 = vld [vmem:[#allocation9 + $0x5a8] ss:$16 sps:$4 sm:$0xff]   ;;  %v1234_v12 = vshrl.u32 %v1218_v9, 16  ;;  %v5229_v41 = vld [vmem:[#allocation9 + $0x72c] ss:$16 sps:$4 sm:$0xff]  }
 0x20a   : > { %2992 = vmatpush1.bf16.msra.mxu0 %v5122_v29  ;;  %3164 = vmatpush1.bf16.msra.mxu1 %v5125_v30  ;;  %v5163_v29 = vld [vmem:[#allocation9 + $0x5cc] ss:$16 sps:$4 sm:$0xff]   ;;  %v1247_v30 = vxor.u32 %v1231_v15, %v1215_v4  ;;  %v5202_v15 = vld [vmem:[#allocation9 + $0x6a4] ss:$16 sps:$4 sm:$0xff]  }
 0x20b   : > { %2993 = vmatprep.subr.bf16.mxu0 %v5130_v32  ;;  %3165 = vmatprep.subr.bf16.mxu1 %v5133_v31  ;;  %v1255_v32 = vxor.u32 %v1239_v19, %v1223_v5  ;;  %v1250_v31 = vxor.u32 %v1234_v12, %v1218_v9  ;;  %v5193_v4 = vld [vmem:[#allocation9 + $0x66c] ss:$16 sps:$4 sm:$0xff]   ;;  %v1083_v5 = vadd.s32 768, %v5926_v10  ;;  %v5196_v9 = vld [vmem:[#allocation9 + $0x684] ss:$16 sps:$4 sm:$0xff]  }
 0x20c   : > { %v5205_v19 = vld [vmem:[#allocation9 + $0x6ac] ss:$16 sps:$4 sm:$0xff]   ;;  %v5203_v12 = vld [vmem:[#allocation9 + $0x6a8] ss:$16 sps:$4 sm:$0xff]  }
 0x20d   : > { %v1271_v60 = vshrl.u32 %v1255_v32, 8  ;;  %v1266_v40 = vshrl.u32 %v1250_v31, 8  ;;  %v5206_v32 = vld [vmem:[#allocation9 + $0x6c0] ss:$16 sps:$4 sm:$0xff]  }
 0x20e   : > { %2994 = vmatpush1.bf16.msra.mxu0 %v5128_v36  ;;  %3166 = vmatpush1.bf16.msra.mxu1 %v5131_v37  ;;  %v5169_v36 = vld [vmem:[#allocation9 + $0x5ec] ss:$16 sps:$4 sm:$0xff]   ;;  %v1263_v37 = vshrl.u32 %v1247_v30, 8 }
 0x20f   : > { %2995 = vmatprep.subr.bf16.mxu0 %v5136_v52  ;;  %3167 = vmatprep.subr.bf16.mxu1 %v5139_v39  ;;  %v5167_v52 = vld [vmem:[#allocation9 + $0x5e8] ss:$16 sps:$4 sm:$0xff]   ;;  %v5172_v39 = vld [vmem:[#allocation9 + $0x604] ss:$16 sps:$4 sm:$0xff]   ;;  %vm1287_vm0 = vcmp.ge.s32.totalorder %v1271_v60, 5033165 }
 0x210   : > { %vm6095_vm15 = vcmp.ge.s32.totalorder %v1263_v37, 5033165  ;;  %vm6101_vm2 = vcmp.ge.s32.totalorder %v1266_v40, 5033165  ;;  %v5223_v37 = vld [vmem:[#allocation9 + $0x70c] ss:$16 sps:$4 sm:$0xff]  }
 0x211   : > { %vm4582_vm1 = vmpackc.low %vm1287_vm0, %vm6095_vm15  ;;  %v5226_v40 = vld [vmem:[#allocation9 + $0x724] ss:$16 sps:$4 sm:$0xff]  }
 0x212   : > { %2996 = vmatpush1.bf16.msra.mxu0 %v5134_v42  ;;  %3168 = vmatpush1.bf16.msra.mxu1 %v5137_v57  ;;  %v5175_v57 = vld [vmem:[#allocation9 + $0x60c] ss:$16 sps:$4 sm:$0xff]   ;;  %vm4585_vm4 = vmpackc.low %vm6105_vm3, %vm6101_vm2 }
 0x213   : > { %2997 = vmatprep.subr.bf16.mxu0 %v5142_v46  ;;  %3169 = vmatprep.subr.bf16.mxu1 %v5145_v47  ;;  %v5232_v46 = vld [vmem:[#allocation9 + $0x744] ss:$16 sps:$4 sm:$0xff]   ;;  %v5235_v47 = vld [vmem:[#allocation9 + $0x74c] ss:$16 sps:$4 sm:$0xff]  }
 0x216   : > { %2998 = vmatpush1.bf16.msra.mxu0 %v5140_v51  ;;  %3170 = vmatpush1.bf16.msra.mxu1 %v5143_v54  ;;  %v5176_v51 = vld [vmem:[#allocation9 + $0x620] ss:$16 sps:$4 sm:$0xff]   ;;  %v5179_v54 = vld [vmem:[#allocation9 + $0x628] ss:$16 sps:$4 sm:$0xff]  }
 0x217   : > { %2999 = vmatprep.subr.bf16.mxu0 %v5148_v62  ;;  %3171 = vmatprep.subr.bf16.mxu1 %v5151_v3  ;;  %v5184_v62 = vld [vmem:[#allocation9 + $0x644] ss:$16 sps:$4 sm:$0xff]  }
 0x218   : > { %v5190_v3 = vld [vmem:[#allocation9 + $0x664] ss:$16 sps:$4 sm:$0xff]  }
 0x21a   : > { %3000 = vmatpush1.bf16.msra.mxu0 %v5146_v6  ;;  %3172 = vmatpush1.bf16.msra.mxu1 %v5149_v7  ;;  %v5188_v6 = vld [vmem:[#allocation9 + $0x660] ss:$16 sps:$4 sm:$0xff]   ;;  %v5191_v7 = vld [vmem:[#allocation9 + $0x668] ss:$16 sps:$4 sm:$0xff]  }
 0x21b   : > { %3001 = vmatprep.subr.bf16.mxu0 %v5154_v11  ;;  %3173 = vmatprep.subr.bf16.mxu1 %v5157_v13  ;;  %v1097_v11 = vmul.u32 3266489917, %v1083_v5  ;;  %v5197_v13 = vld [vmem:[#allocation9 + $0x688] ss:$16 sps:$4 sm:$0xff]   ;;  %v5244_v5 = vld [vmem:[#allocation9 + $0x784] ss:$16 sps:$4 sm:$0xff]  }
 0x21d   : > { %v1113_v10 = vxor.u32 %v1097_v11, %v5932_v18 }
 0x21e   : > { %3002 = vmatpush1.bf16.msra.mxu0 %v5152_v22  ;;  %3174 = vmatpush1.bf16.msra.mxu1 %v5155_v23  ;;  %v1105_v22 = vxor.u32 %v1097_v11, %v5930_v17  ;;  %v5200_v23 = vld [vmem:[#allocation9 + $0x6a0] ss:$16 sps:$4 sm:$0xff]   ;;  %v5217_v17 = vld [vmem:[#allocation9 + $0x6ec] ss:$16 sps:$4 sm:$0xff]   ;;  %v5245_v11 = vld [vmem:[#allocation9 + $0x788] ss:$16 sps:$4 sm:$0xff]  }
 0x21f   : > { %3003 = vmatprep.subr.bf16.mxu0 %v5160_v28  ;;  %3175 = vmatprep.subr.bf16.mxu1 %v5163_v29  ;;  %v5211_v28 = vld [vmem:[#allocation9 + $0x6cc] ss:$16 sps:$4 sm:$0xff]   ;;  %v1129_v30 = vxor.u32 668265263, %v1113_v10  ;;  %v5251_v10 = vld [vmem:[#allocation9 + $0x7a8] ss:$16 sps:$4 sm:$0xff]  }
 0x220   : > { %v1121_v29 = vxor.u32 668265263, %v1105_v22  ;;  %v5248_v22 = vld [vmem:[#allocation9 + $0x7a0] ss:$16 sps:$4 sm:$0xff]  }
 0x221   : > { %v1145_v18 = vshrl.u32 %v1129_v30, 16 }
 0x222   : > { %3004 = vmatpush1.bf16.msra.mxu0 %v5158_v14  ;;  %3176 = vmatpush1.bf16.msra.mxu1 %v5161_v33  ;;  %v5209_v14 = vld [vmem:[#allocation9 + $0x6c8] ss:$16 sps:$4 sm:$0xff]   ;;  %v5214_v33 = vld [vmem:[#allocation9 + $0x6e4] ss:$16 sps:$4 sm:$0xff]   ;;  %v1137_v31 = vshrl.u32 %v1121_v29, 16 }
 0x223   : > { %3005 = vmatprep.subr.bf16.mxu0 %v5166_v35  ;;  %3177 = vmatprep.subr.bf16.mxu1 %v5169_v36  ;;  %v5215_v35 = vld [vmem:[#allocation9 + $0x6e8] ss:$16 sps:$4 sm:$0xff]   ;;  %v5220_v36 = vld [vmem:[#allocation9 + $0x704] ss:$16 sps:$4 sm:$0xff]  }
 0x224   : > { %v1153_v60 = vxor.u32 %v1137_v31, %v1121_v29  ;;  %v5254_v29 = vld [vmem:[#allocation9 + $0x7c0] ss:$16 sps:$4 sm:$0xff]  }
 0x225   : > { %v5260_v31 = vld [vmem:[#allocation9 + $0x7e0] ss:$16 sps:$4 sm:$0xff]  }
 0x226   : > { %3006 = vmatpush1.bf16.msra.mxu0 %v5164_v38  ;;  %3178 = vmatpush1.bf16.msra.mxu1 %v5167_v52  ;;  %v1161_v38 = vxor.u32 %v1145_v18, %v1129_v30  ;;  %v5218_v52 = vld [vmem:[#allocation9 + $0x700] ss:$16 sps:$4 sm:$0xff]   ;;  %v1169_v42 = vmul.u32 2246822507, %v1153_v60  ;;  %v5257_v30 = vld [vmem:[#allocation9 + $0x7c8] ss:$16 sps:$4 sm:$0xff]  }
 0x227   : > { %3018 = vmatprep.subr.bf16.mxu0 %v5172_v39  ;;  %3190 = vmatprep.subr.bf16.mxu1 %v5175_v57  ;;  %v5221_v39 = vld [vmem:[#allocation9 + $0x708] ss:$16 sps:$4 sm:$0xff]   ;;  %v5274_v60 = vld [vmem:[#allocation10 + $0x24] ss:$8 sps:$4 sm:$0xff]  }
 0x228   : > { %v1177_v57 = vmul.u32 2246822507, %v1161_v38  ;;  %v5263_v18 = vld [vmem:[#allocation9 + $0x7e8] ss:$16 sps:$4 sm:$0xff]  }
 0x229   : > { %4584 = vmatmul.mubr.msk.bf16.vlgmr.msra.gmra.mrb[4].mxu0 %vm4582_vm1, %v6011_v48  ;;  %4608 = vmatmul.mubr.msk.bf16.vlgmr.msra.gmra.mrb[12].mxu1 %vm4582_vm1, %v6011_v48  ;;  %v5182_v48 = vld [vmem:[#allocation9 + $0x640] ss:$16 sps:$4 sm:$0xff]  }
 0x22a   : > { %3019 = vmatpush1.bf16.msra.mxu0 %v5170_v43  ;;  %3191 = vmatpush1.bf16.msra.mxu1 %v5173_v45  ;;  %v5224_v43 = vld [vmem:[#allocation9 + $0x720] ss:$16 sps:$4 sm:$0xff]   ;;  %v5227_v45 = vld [vmem:[#allocation9 + $0x728] ss:$16 sps:$4 sm:$0xff]  }
 0x22b   : > { %3020 = vmatprep.subr.bf16.mxu0 %v5178_v49  ;;  %3192 = vmatprep.subr.bf16.mxu1 %v5181_v50  ;;  %v1185_v49 = vshrl.u32 %v1169_v42, 13  ;;  %v1193_v50 = vshrl.u32 %v1177_v57, 13  ;;  %v5272_v38 = vld [vmem:[#allocation10 + $0x20] ss:$8 sps:$4 sm:$0xff]  }
 0x22c   : > { %4587 = vmatprep.mubr.msk.bf16.mxu0 %vm4585_vm4, %v6079_v24  ;;  %4611 = vmatprep.mubr.msk.bf16.mxu1 %vm4585_vm4, %v6079_v24  ;;  %v5194_v24 = vld [vmem:[#allocation9 + $0x680] ss:$16 sps:$4 sm:$0xff]  }
 0x22e   : > { %3021 = vmatpush1.bf16.msra.mxu0 %v5176_v51  ;;  %3193 = vmatpush1.bf16.msra.mxu1 %v5179_v54  ;;  %v5230_v51 = vld [vmem:[#allocation9 + $0x740] ss:$16 sps:$4 sm:$0xff]   ;;  %v5233_v54 = vld [vmem:[#allocation9 + $0x748] ss:$16 sps:$4 sm:$0xff]  }
 0x22f   : > { %3022 = vmatprep.subr.bf16.mxu0 %v5184_v62  ;;  %3194 = vmatprep.subr.bf16.mxu1 %v5187_v1  ;;  %v5238_v62 = vld [vmem:[#allocation9 + $0x764] ss:$16 sps:$4 sm:$0xff]   ;;  %v5241_v1 = vld [vmem:[#allocation9 + $0x76c] ss:$16 sps:$4 sm:$0xff]  }
 0x232   : > { %3023 = vmatpush1.bf16.msra.mxu0 %v5182_v48  ;;  %3195 = vmatpush1.bf16.msra.mxu1 %v5185_v2  ;;  %v1201_v48 = vxor.u32 %v1185_v49, %v1169_v42  ;;  %v1209_v2 = vxor.u32 %v1193_v50, %v1177_v57  ;;  %v5283_v42 = vld [vmem:[#allocation10 + $0x54] ss:$8 sps:$4 sm:$0xff]   ;;  %v5281_v57 = vld [vmem:[#allocation10 + $0x50] ss:$8 sps:$4 sm:$0xff]   ;;  %v5290_v49 = vld [vmem:[#allocation10 + $0x80] ss:$8 sps:$4 sm:$0xff]  }
 0x233   : > { %3024 = vmatprep.subr.bf16.mxu0 %v5190_v3  ;;  %3196 = vmatprep.subr.bf16.mxu1 %v5193_v4  ;;  %v5236_v3 = vld [vmem:[#allocation9 + $0x760] ss:$16 sps:$4 sm:$0xff]   ;;  %v5239_v4 = vld [vmem:[#allocation9 + $0x768] ss:$16 sps:$4 sm:$0xff]   ;;  %v5295_v50 = vld [vmem:[#allocation10 + $0x94] ss:$8 sps:$4 sm:$0xff]  }
 0x236   : > { %3025 = vmatpush1.bf16.msra.mxu0 %v5188_v6  ;;  %3197 = vmatpush1.bf16.msra.mxu1 %v5191_v7  ;;  %v5247_v6 = vld [vmem:[#allocation9 + $0x78c] ss:$16 sps:$4 sm:$0xff]   ;;  %v1217_v7 = vmul.u32 3266489909, %v1201_v48  ;;  %v5299_v48 = vld [vmem:[#allocation10 + $0xb0] ss:$8 sps:$4 sm:$0xff]  }
 0x237   : > { %3026 = vmatprep.subr.bf16.mxu0 %v5196_v9  ;;  %3198 = vmatprep.subr.bf16.mxu1 %v5199_v0  ;;  %v1225_v9 = vmul.u32 3266489909, %v1209_v2  ;;  %v5242_v0 = vld [vmem:[#allocation9 + $0x780] ss:$16 sps:$4 sm:$0xff]   ;;  %v5304_v2 = vld [vmem:[#allocation10 + $0xc4] ss:$8 sps:$4 sm:$0xff]  }
 0x23a   : > { %3027 = vmatpush1.bf16.msra.mxu0 %v5194_v24  ;;  %3199 = vmatpush1.bf16.msra.mxu1 %v5197_v13  ;;  %v5250_v24 = vld [vmem:[#allocation9 + $0x7a4] ss:$16 sps:$4 sm:$0xff]   ;;  %v5253_v13 = vld [vmem:[#allocation9 + $0x7ac] ss:$16 sps:$4 sm:$0xff]  }
 0x23b   : > { %3028 = vmatprep.subr.bf16.mxu0 %v5202_v15  ;;  %3200 = vmatprep.subr.bf16.mxu1 %v5205_v19  ;;  %v1233_v15 = vshrl.u32 %v1217_v7, 16  ;;  %v1241_v19 = vshrl.u32 %v1225_v9, 16 }
 0x23e   : > { %3029 = vmatpush1.bf16.msra.mxu0 %v5200_v23  ;;  %3201 = vmatpush1.bf16.msra.mxu1 %v5203_v12  ;;  %v5256_v23 = vld [vmem:[#allocation9 + $0x7c4] ss:$16 sps:$4 sm:$0xff]   ;;  %v5259_v12 = vld [vmem:[#allocation9 + $0x7cc] ss:$16 sps:$4 sm:$0xff]  }
 0x23f   : > { %3030 = vmatprep.subr.bf16.mxu0 %v5208_v27  ;;  %3202 = vmatprep.subr.bf16.mxu1 %v5211_v28  ;;  %v1249_v27 = vxor.u32 %v1233_v15, %v1217_v7  ;;  %v1257_v28 = vxor.u32 %v1241_v19, %v1225_v9  ;;  %v5308_v7 = vld [vmem:[#allocation10 + $0xe0] ss:$8 sps:$4 sm:$0xff]   ;;  %v5313_v9 = vld [vmem:[#allocation10 + $0xf4] ss:$8 sps:$4 sm:$0xff]  }
 0x240   : > { %v5364_v15 = vld [vmem:[#allocation12 + $0x48] sm:$0xff]  }
 0x241   : > { %v5365_v19 = vld [vmem:[#allocation12 + $0x8] sm:$0xff]  }
 0x242   : > { %3031 = vmatpush1.bf16.msra.mxu0 %v5206_v32  ;;  %3203 = vmatpush1.bf16.msra.mxu1 %v5209_v14  ;;  %v5262_v32 = vld [vmem:[#allocation9 + $0x7e4] ss:$16 sps:$4 sm:$0xff]   ;;  %v5265_v14 = vld [vmem:[#allocation9 + $0x7ec] ss:$16 sps:$4 sm:$0xff]  }
 0x243   : > { %3032 = vmatprep.subr.bf16.mxu0 %v5214_v33  ;;  %3204 = vmatprep.subr.bf16.mxu1 %v5217_v17  ;;  %v1265_v33 = vshrl.u32 %v1249_v27, 8  ;;  %v1273_v17 = vshrl.u32 %v1257_v28, 8  ;;  %v3262_v27 = vxor.u32 1336530526, %v5938_v21  ;;  %v3257_v28 = vxor.u32 1336530526, %v5944_v25 }
 0x245   : > { %vm1281_vm5 = vcmp.ge.s32.totalorder %v1265_v33, 5033165  ;;  %vm1289_vm6 = vcmp.ge.s32.totalorder %v1273_v17, 5033165  ;;  %v3270_v17 = vshrl.u32 %v3262_v27, 16 }
 0x246   : > { %3033 = vmatpush1.bf16.msra.mxu0 %v5212_v34  ;;  %3205 = vmatpush1.bf16.msra.mxu1 %v5215_v35  ;;  %v5268_v34 = vld [vmem:[#allocation10 + $0x4] ss:$8 sps:$4 sm:$0xff]   ;;  %vm4588_vm7 = vmpackc.low %vm1289_vm6, %vm1281_vm5  ;;  %v5266_v35 = vld [vmem:[#allocation10] ss:$8 sps:$4 sm:$0xff]  }
 0x247   : > { %3034 = vmatprep.subr.bf16.mxu0 %v5220_v36  ;;  %3206 = vmatprep.subr.bf16.mxu1 %v5223_v37  ;;  %v5271_v36 = vld [vmem:[#allocation10 + $0x14] ss:$8 sps:$4 sm:$0xff]   ;;  %v5269_v37 = vld [vmem:[#allocation10 + $0x10] ss:$8 sps:$4 sm:$0xff]  }
 0x24a   : > { %3035 = vmatpush1.bf16.msra.mxu0 %v5218_v52  ;;  %3207 = vmatpush1.bf16.msra.mxu1 %v5221_v39  ;;  %v5277_v52 = vld [vmem:[#allocation10 + $0x34] ss:$8 sps:$4 sm:$0xff]   ;;  %v5275_v39 = vld [vmem:[#allocation10 + $0x30] ss:$8 sps:$4 sm:$0xff]  }
 0x24b   : > { %3036 = vmatprep.subr.bf16.mxu0 %v5226_v40  ;;  %3208 = vmatprep.subr.bf16.mxu1 %v5229_v41  ;;  %v5280_v40 = vld [vmem:[#allocation10 + $0x44] ss:$8 sps:$4 sm:$0xff]   ;;  %v5278_v41 = vld [vmem:[#allocation10 + $0x40] ss:$8 sps:$4 sm:$0xff]  }
 0x24e   : > { %3037 = vmatpush1.bf16.msra.mxu0 %v5224_v43  ;;  %3209 = vmatpush1.bf16.msra.mxu1 %v5227_v45  ;;  %v5284_v43 = vld [vmem:[#allocation10 + $0x60] ss:$8 sps:$4 sm:$0xff]   ;;  %v5289_v45 = vld [vmem:[#allocation10 + $0x74] ss:$8 sps:$4 sm:$0xff]  }
 0x24f   : > { %3038 = vmatprep.subr.bf16.mxu0 %v5232_v46  ;;  %3210 = vmatprep.subr.bf16.mxu1 %v5235_v47  ;;  %v5287_v46 = vld [vmem:[#allocation10 + $0x70] ss:$8 sps:$4 sm:$0xff]   ;;  %v5292_v47 = vld [vmem:[#allocation10 + $0x84] ss:$8 sps:$4 sm:$0xff]  }
 0x252   : > { %3039 = vmatpush1.bf16.msra.mxu0 %v5230_v51  ;;  %3211 = vmatpush1.bf16.msra.mxu1 %v5233_v54  ;;  %v5293_v51 = vld [vmem:[#allocation10 + $0x90] ss:$8 sps:$4 sm:$0xff]   ;;  %v5298_v54 = vld [vmem:[#allocation10 + $0xa4] ss:$8 sps:$4 sm:$0xff]  }
 0x253   : > { %3040 = vmatprep.subr.bf16.mxu0 %v5238_v62  ;;  %3212 = vmatprep.subr.bf16.mxu1 %v5241_v1  ;;  %v5296_v62 = vld [vmem:[#allocation10 + $0xa0] ss:$8 sps:$4 sm:$0xff]   ;;  %v5301_v1 = vld [vmem:[#allocation10 + $0xb4] ss:$8 sps:$4 sm:$0xff]  }
 0x256   : > { %3041 = vmatpush1.bf16.msra.mxu0 %v5236_v3  ;;  %3213 = vmatpush1.bf16.msra.mxu1 %v5239_v4  ;;  %v5302_v3 = vld [vmem:[#allocation10 + $0xc0] ss:$8 sps:$4 sm:$0xff]   ;;  %v5307_v4 = vld [vmem:[#allocation10 + $0xd4] ss:$8 sps:$4 sm:$0xff]  }
 0x257   : > { %3042 = vmatprep.subr.bf16.mxu0 %v5244_v5  ;;  %3214 = vmatprep.subr.bf16.mxu1 %v5247_v6  ;;  %v5305_v5 = vld [vmem:[#allocation10 + $0xd0] ss:$8 sps:$4 sm:$0xff]   ;;  %v5310_v6 = vld [vmem:[#allocation10 + $0xe4] ss:$8 sps:$4 sm:$0xff]  }
 0x25a   : > { %3043 = vmatpush1.bf16.msra.mxu0 %v5242_v0  ;;  %3215 = vmatpush1.bf16.msra.mxu1 %v5245_v11  ;;  %v5311_v0 = vld [vmem:[#allocation10 + $0xf0] ss:$8 sps:$4 sm:$0xff]   ;;  %v5316_v11 = vld [vmem:[#allocation10 + $0x104] ss:$8 sps:$4 sm:$0xff]  }
 0x25b   : > { %3044 = vmatprep.subr.bf16.mxu0 %v5250_v24  ;;  %3216 = vmatprep.subr.bf16.mxu1 %v5253_v13  ;;  %v5362_v24 = vld [vmem:[#allocation12 + $0x40] sm:$0xff]  }
 0x25c   : > { %v5363_v13 = vld [vmem:[#allocation12] sm:$0xff]  }
 0x25e   : > { %3045 = vmatpush1.bf16.msra.mxu0 %v5248_v22  ;;  %3217 = vmatpush1.bf16.msra.mxu1 %v5251_v10  ;;  %v5366_v22 = vld [vmem:[#allocation12 + $0x50] sm:$0xff]  }
 0x25f   : > { %3046 = vmatprep.subr.bf16.mxu0 %v5256_v23  ;;  %3218 = vmatprep.subr.bf16.mxu1 %v5259_v12  ;;  %v5367_v10 = vld [vmem:[#allocation12 + $0x10] sm:$0xff]   ;;  %v5368_v23 = vld [vmem:[#allocation12 + $0x58] sm:$0xff]   ;;  %v3258_v12 = vxor.u32 1336530526, %v5935_v20 }
 0x261   : > { %v3266_v33 = vshrl.u32 %v3258_v12, 16 }
 0x262   : > { %3047 = vmatpush1.bf16.msra.mxu0 %v5254_v29  ;;  %3219 = vmatpush1.bf16.msra.mxu1 %v5257_v30  ;;  %v3261_v29 = vxor.u32 1336530526, %v5947_v26  ;;  %v5369_v30 = vld [vmem:[#allocation12 + $0x18] sm:$0xff]  }
 0x263   : > { %3048 = vmatprep.subr.bf16.mxu0 %v5262_v32  ;;  %3220 = vmatprep.subr.bf16.mxu1 %v5265_v14  ;;  %v3260_v32 = vxor.u32 1336530526, %v5953_v56  ;;  %v5370_v14 = vld [vmem:[#allocation12 + $0x60] sm:$0xff]  }
 0x266   : > { %3049 = vmatpush1.bf16.msra.mxu0 %v5260_v31  ;;  %3221 = vmatpush1.bf16.msra.mxu1 %v5263_v18  ;;  %v3265_v31 = vshrl.u32 %v3257_v28, 16  ;;  %v3269_v18 = vshrl.u32 %v3261_v29, 16 }
 0x267   : > { %3761 = vmatprep.subr.bf16.mxu0 %v5268_v34  ;;  %4721 = vmatprep.subr.bf16.mxu1 %v5362_v24  ;;  %v5371_v34 = vld [vmem:[#allocation12 + $0x20] sm:$0xff]  }
 0x269   : > { %4590 = vmatmul.mubr.msk.bf16.vlgmr.msra.gmra.mrb[4].mxu0 %vm4588_vm7, %v6065_v16  ;;  %4614 = vmatmul.mubr.msk.bf16.vlgmr.msra.gmra.mrb[12].mxu1 %vm4588_vm7, %v6065_v16  ;;  %v5286_v16 = vld [vmem:[#allocation10 + $0x64] ss:$8 sps:$4 sm:$0xff]  }
 0x26a   : > { %3762 = vmatpush1.bf16.msra.mxu0 %v5266_v35  ;;  %4722 = vmatpush3.bf16.msra.mxu1 %v5363_v13  ;;  %v3264_v35 = vxor.u32 1336530526, %v5959_v59 }
 0x26b   : > { %3763 = vmatprep.subr.bf16.mxu0 %v5271_v36  ;;  %4723 = vmatprep.subr.bf16.mxu1 %v5364_v15  ;;  %v3268_v36 = vshrl.u32 %v3260_v32, 16  ;;  %v1587_v15 = vld [vmem:[%s6252_s5] sm:$0xf] }
 0x26e   : > { %3764 = vmatpush1.bf16.msra.mxu0 %v5269_v37  ;;  %4724 = vmatpush3.bf16.msra.mxu1 %v5365_v19  ;;  %v3274_v37 = vxor.u32 %v3266_v33, %v3258_v12 }
 0x26f   : > { %3765 = vmatprep.subr.bf16.mxu0 %v5274_v60  ;;  %4725 = vmatprep.subr.bf16.mxu1 %v5366_v22  ;;  %v3278_v60 = vxor.u32 %v3270_v17, %v3262_v27  ;;  %v1592_v27 = vrot.slane %v1587_v15, %v5956_v58 }
 0x270   : > { %v3282_v56 = vmul.u32 2246822507, %v3274_v37 }
 0x272   : > { %3766 = vmatpush1.bf16.msra.mxu0 %v5272_v38  ;;  %4726 = vmatpush3.bf16.msra.mxu1 %v5367_v10  ;;  %v3273_v38 = vxor.u32 %v3265_v31, %v3257_v28  ;;  %v1600_v28 = vrot.slane %v1587_v15, %v494_v53 }
 0x273   : > { %3767 = vmatprep.subr.bf16.mxu0 %v5277_v52  ;;  %4727 = vmatprep.subr.bf16.mxu1 %v5368_v23  ;;  %v3277_v52 = vxor.u32 %v3269_v18, %v3261_v29 }
 0x276   : > { %3768 = vmatpush1.bf16.msra.mxu0 %v5275_v39  ;;  %4728 = vmatpush3.bf16.msra.mxu1 %v5369_v30  ;;  %v3272_v39 = vshrl.u32 %v3264_v35, 16  ;;  %v1596_v30 = vrot.slane %v1587_v15, %v5967_v61 }
 0x277   : > { %3769 = vmatprep.subr.bf16.mxu0 %v5280_v40  ;;  %4729 = vmatprep.subr.bf16.mxu1 %v5370_v14  ;;  %v3276_v40 = vxor.u32 %v3268_v36, %v3260_v32  ;;  %v1604_v32 = vrot.slane %v1587_v15, %v498_v55 }
 0x27a   : > { %3770 = vmatpush1.bf16.msra.mxu0 %v5278_v41  ;;  %4730 = vmatpush3.bf16.msra.mxu1 %v5371_v34  ;;  %v3286_v41 = vmul.u32 2246822507, %v3278_v60 }
 0x27b   : > { %3771 = vmatprep.subr.bf16.mxu0 %v5283_v42  ;;  %v3281_v42 = vmul.u32 2246822507, %v3273_v38 }
 0x27e   : > { %3772 = vmatpush1.bf16.msra.mxu0 %v5281_v57  ;;  %v3285_v57 = vmul.u32 2246822507, %v3277_v52 }
 0x27f   : > { %3773 = vmatprep.subr.bf16.mxu0 %v5286_v16  ;;  %v3280_v16 = vxor.u32 %v3272_v39, %v3264_v35 }
 0x281   : > { %v3288_v59 = vmul.u32 2246822507, %v3280_v16  ;;  %v5335_v16 = vld [vmem:[#allocation10 + $0x170] ss:$8 sps:$4 sm:$0xff]  }
 0x282   : > { %3774 = vmatpush1.bf16.msra.mxu0 %v5284_v43  ;;  %v3284_v43 = vmul.u32 2246822507, %v3276_v40 }
 0x283   : > { %3775 = vmatprep.subr.bf16.mxu0 %v5289_v45  ;;  %v3290_v45 = vshrl.u32 %v3282_v56, 13 }
 0x286   : > { %3776 = vmatpush1.bf16.msra.mxu0 %v5287_v46  ;;  %v3294_v46 = vshrl.u32 %v3286_v41, 13 }
 0x287   : > { %3777 = vmatprep.subr.bf16.mxu0 %v5292_v47  ;;  %v3289_v47 = vshrl.u32 %v3281_v42, 13 }
 0x28a   : > { %3778 = vmatpush1.bf16.msra.mxu0 %v5290_v49  ;;  %v3293_v49 = vshrl.u32 %v3285_v57, 13 }
 0x28b   : > { %3779 = vmatprep.subr.bf16.mxu0 %v5295_v50  ;;  %v3292_v50 = vshrl.u32 %v3284_v43, 13 }
 0x28e   : > { %3780 = vmatpush1.bf16.msra.mxu0 %v5293_v51  ;;  %v3298_v51 = vxor.u32 %v3290_v45, %v3282_v56 }
 0x28f   : > { %3781 = vmatprep.subr.bf16.mxu0 %v5298_v54  ;;  %v3302_v54 = vxor.u32 %v3294_v46, %v3286_v41 }
 0x292   : > { %3782 = vmatpush1.bf16.msra.mxu0 %v5296_v62  ;;  %v3297_v62 = vxor.u32 %v3289_v47, %v3281_v42 }
 0x293   : > { %3783 = vmatprep.subr.bf16.mxu0 %v5301_v1  ;;  %v3301_v1 = vxor.u32 %v3293_v49, %v3285_v57 }
 0x296   : > { %3784 = vmatpush1.bf16.msra.mxu0 %v5299_v48  ;;  %v3296_v48 = vshrl.u32 %v3288_v59, 13 }
 0x297   : > { %3785 = vmatprep.subr.bf16.mxu0 %v5304_v2  ;;  %v3300_v2 = vxor.u32 %v3292_v50, %v3284_v43  ;;  %v5340_v43 = vld [vmem:[#allocation10 + $0x184] ss:$8 sps:$4 sm:$0xff]  }
 0x298   : > { %v5346_v50 = vld [vmem:[#allocation10 + $0x1a4] ss:$8 sps:$4 sm:$0xff]  }
 0x29a   : > { %3786 = vmatpush1.bf16.msra.mxu0 %v5302_v3  ;;  %v3306_v3 = vmul.u32 3266489909, %v3298_v51 }
 0x29b   : > { %3787 = vmatprep.subr.bf16.mxu0 %v5307_v4  ;;  %v3310_v4 = vmul.u32 3266489909, %v3302_v54 }
 0x29e   : > { %3788 = vmatpush1.bf16.msra.mxu0 %v5305_v5  ;;  %v3305_v5 = vmul.u32 3266489909, %v3297_v62  ;;  %v5344_v62 = vld [vmem:[#allocation10 + $0x1a0] ss:$8 sps:$4 sm:$0xff]  }
 0x29f   : > { %3789 = vmatprep.subr.bf16.mxu0 %v5310_v6  ;;  %v3309_v6 = vmul.u32 3266489909, %v3301_v1 }
 0x2a0   : > { %v3313_v24 = vshrl.u32 %v3305_v5, 16 }
 0x2a1   : > { %v3317_v13 = vshrl.u32 %v3309_v6, 16 }
 0x2a2   : > { %3790 = vmatpush1.bf16.msra.mxu0 %v5308_v7  ;;  %v3304_v7 = vxor.u32 %v3296_v48, %v3288_v59  ;;  %v3321_v12 = vxor.u32 %v3313_v24, %v3305_v5 }
 0x2a3   : > { %3791 = vmatprep.subr.bf16.mxu0 %v5313_v9  ;;  %v3308_v9 = vmul.u32 3266489909, %v3300_v2  ;;  %v3325_v29 = vxor.u32 %v3317_v13, %v3309_v6 }
 0x2a4   : > { %v3312_v19 = vmul.u32 3266489909, %v3304_v7  ;;  %v3329_v35 = vshrl.u32 %v3321_v12, 8 }
 0x2a5   : > { %v3316_v22 = vshrl.u32 %v3308_v9, 16  ;;  %v3333_v52 = vshrl.u32 %v3325_v29, 8 }
 0x2a6   : > { %3792 = vmatpush1.bf16.msra.mxu0 %v5311_v0  ;;  %v3314_v0 = vshrl.u32 %v3306_v3, 16  ;;  %v3320_v14 = vshrl.u32 %v3312_v19, 16  ;;  %vm6145_vm12 = vcmp.ge.s32.totalorder %v3329_v35, 5033165  ;;  %v5322_v35 = vld [vmem:[#allocation10 + $0x124] ss:$8 sps:$4 sm:$0xff]  }
 0x2a7   : > { %3804 = vmatprep.subr.bf16.mxu0 %v5316_v11  ;;  %v3318_v11 = vshrl.u32 %v3310_v4, 16  ;;  %v3324_v33 = vxor.u32 %v3316_v22, %v3308_v9  ;;  %vm6149_vm13 = vcmp.ge.s32.totalorder %v3333_v52, 5033165  ;;  %v5326_v52 = vld [vmem:[#allocation10 + $0x140] ss:$8 sps:$4 sm:$0xff]  }
 0x2a8   : > { %v3322_v10 = vxor.u32 %v3314_v0, %v3306_v3  ;;  %v3328_v41 = vxor.u32 %v3320_v14, %v3312_v19  ;;  %vm4682_vm7 = vmpackc.low %vm6149_vm13, %vm6145_vm12 }
 0x2a9   : > { %v3326_v23 = vxor.u32 %v3318_v11, %v3310_v4  ;;  %v3332_v42 = vshrl.u32 %v3324_v33, 8 }
 0x2aa   : > { %v3330_v18 = vshrl.u32 %v3322_v10, 8  ;;  %v3336_v48 = vshrl.u32 %v3328_v41, 8  ;;  %v3263_v41 = vxor.u32 1336530526, %v6018_v63  ;;  %v5341_v63 = vld [vmem:[#allocation10 + $0x190] ss:$8 sps:$4 sm:$0xff]  }
 0x2ab   : > { %v3334_v34 = vshrl.u32 %v3326_v23, 8  ;;  %vm6153_vm15 = vcmp.ge.s32.totalorder %v3332_v42, 5033165  ;;  %v5332_v42 = vld [vmem:[#allocation10 + $0x160] ss:$8 sps:$4 sm:$0xff]  }
 0x2ac   : > { %vm6137_vm10 = vcmp.ge.s32.totalorder %v3330_v18, 5033165  ;;  %vm6161_vm5 = vcmp.ge.s32.totalorder %v3336_v48, 5033165  ;;  %v3271_v57 = vshrl.u32 %v3263_v41, 16 }
 0x2ad   : > { %vm6141_vm11 = vcmp.ge.s32.totalorder %v3334_v34, 5033165  ;;  %v5317_v34 = vld [vmem:[#allocation10 + $0x110] ss:$8 sps:$4 sm:$0xff]   ;;  %v5356_v23 = vld [vmem:[#allocation10 + $0x1e0] ss:$8 sps:$4 sm:$0xff]  }
 0x2ae   : > { %vm4679_vm6 = vmpackc.low %vm6141_vm11, %vm6137_vm10 }
 0x33c   : > { %v3052_v17 = vpop.f32.mrb[4].mxu0  ;;  %v3224_v31 = vpop.f32.mrb[12].mxu1 }
 0x33d   : > { %v4743_v36 = vadd.f32 %v3052_v17, %v1592_v27  ;;  %v4747_v37 = vadd.f32 %v3224_v31, %v1600_v28  ;;  %v3054_v60 = vpop.f32.mrb[5].mxu0  ;;  %v3226_v38 = vpop.f32.mrb[13].mxu1  ;;  %v5314_v17 = vld [vmem:[#allocation10 + $0x100] ss:$8 sps:$4 sm:$0xff]   ;;  %v5319_v31 = vld [vmem:[#allocation10 + $0x114] ss:$8 sps:$4 sm:$0xff]  }
 0x33e   : > { %v4744_v39 = vadd.f32 %v3054_v60, %v1596_v30  ;;  %v4748_v53 = vadd.f32 %v3226_v38, %v1604_v32  ;;  %v3056_v40 = vpop.f32.mrb[6].mxu0  ;;  %v3228_v56 = vpop.f32.mrb[14].mxu1  ;;  %v5323_v60 = vld [vmem:[#allocation10 + $0x130] ss:$8 sps:$4 sm:$0xff]   ;;  %v5328_v38 = vld [vmem:[#allocation10 + $0x144] ss:$8 sps:$4 sm:$0xff]  }
 0x33f   : > { %vm3233_vm8 = vcmp.gt.f32.partialorder %v4743_v36, 0.0  ;;  %v3241_v8 = vmul.f32 0.2, %v4743_v36  ;;  %vm3235_vm9 = vcmp.gt.f32.partialorder %v4747_v37, 0.0  ;;  %v3243_v55 = vmul.f32 0.2, %v4747_v37 }
 0x340   : > { %v3242_v45 = vmul.f32 0.2, %v4744_v39  ;;  %v4745_v46 = vadd.f32 %v3056_v40, %v1592_v27  ;;  %v4749_v47 = vadd.f32 %v3228_v56, %v1600_v28  ;;  %v3058_v49 = vpop.f32.mrb[7].mxu0  ;;  %v3230_v59 = vpop.f32.mrb[15].mxu1  ;;  %vm3234_vm14 = vcmp.gt.f32.partialorder %v4744_v39, 0.0 }
 0x341   : > { %v3249_v51 = vsel %vm3233_vm8, %v4743_v36, %v3241_v8  ;;  %v3251_v54 = vsel %vm3235_vm9, %v4747_v37, %v3243_v55  ;;  %v3244_v1 = vmul.f32 0.2, %v4748_v53  ;;  %v4746_v4 = vadd.f32 %v3058_v49, %v1596_v30  ;;  %vm4685_vm8 = vmpackc.low %vm6161_vm5, %vm6153_vm15  ;;  %v5320_v36 = vld [vmem:[#allocation10 + $0x120] ss:$8 sps:$4 sm:$0xff]   ;;  %v5325_v37 = vld [vmem:[#allocation10 + $0x134] ss:$8 sps:$4 sm:$0xff]  }
 0x342   : > { %vm3237_vm0 = vcmp.gt.f32.partialorder %v4745_v46, 0.0  ;;  %vm3239_vm1 = vcmp.gt.f32.partialorder %v4749_v47, 0.0  ;;  %v3245_v2 = vmul.f32 0.2, %v4745_v46  ;;  %v3247_v3 = vmul.f32 0.2, %v4749_v47 }
 0x343   : > { %v4750_v5 = vadd.f32 %v3230_v59, %v1604_v32  ;;  %v3345_v6 = vmul.f32 1.4285715, %v3249_v51  ;;  %v6157_v7 = vmul.f32 1.4285715, %v3251_v54  ;;  %v3250_v9 = vsel %vm3234_vm14, %v4744_v39, %v3242_v45  ;;  %v5331_v39 = vld [vmem:[#allocation10 + $0x154] ss:$8 sps:$4 sm:$0xff]  }
 0x344   : > { %vm3236_vm2 = vcmp.gt.f32.partialorder %v4748_v53, 0.0  ;;  %v3253_v0 = vsel %vm3237_vm0, %v4745_v46, %v3245_v2  ;;  %v3255_v11 = vsel %vm3239_vm1, %v4749_v47, %v3247_v3  ;;  %vm3238_vm3 = vcmp.gt.f32.partialorder %v4746_v4, 0.0  ;;  %v5334_v40 = vld [vmem:[#allocation10 + $0x164] ss:$8 sps:$4 sm:$0xff]   ;;  %v5337_v8 = vld [vmem:[#allocation10 + $0x174] ss:$8 sps:$4 sm:$0xff]  }
 0x345   : > { %v3246_v24 = vmul.f32 0.2, %v4746_v4  ;;  %v3349_v13 = vmul.f32 1.4285715, %v3253_v0  ;;  %v6159_v15 = vmul.f32 1.4285715, %v3255_v11  ;;  %v3252_v19 = vsel %vm3236_vm2, %v4748_v53, %v3244_v1 }
 0x346   : > { %vm3240_vm4 = vcmp.gt.f32.partialorder %v4750_v5, 0.0  ;;  %v3248_v10 = vmul.f32 0.2, %v4750_v5  ;;  %v3346_v12 = vmul.f32 1.4285715, %v3250_v9  ;;  %v3279_v46 = vxor.u32 %v3271_v57, %v3263_v41 }
 0x347   : > { %v3254_v22 = vsel %vm3238_vm3, %v4746_v4, %v3246_v24  ;;  %v4683_v27 = vpack.c.bf16 %v3349_v13, %v3345_v6  ;;  %v4689_v28 = vpack.c.bf16 %v6159_v15, %v6157_v7  ;;  %v3348_v32 = vmul.f32 1.4285715, %v3252_v19  ;;  %v5329_v53 = vld [vmem:[#allocation10 + $0x150] ss:$8 sps:$4 sm:$0xff]   ;;  %v5338_v47 = vld [vmem:[#allocation10 + $0x180] ss:$8 sps:$4 sm:$0xff]  }
 0x348   : > { %v3350_v29 = vmul.f32 1.4285715, %v3254_v22  ;;  %v3256_v30 = vsel %vm3240_vm4, %v4750_v5, %v3248_v10  ;;  %v3259_v56 = vxor.u32 1336530526, %v6009_v44  ;;  %v5343_v49 = vld [vmem:[#allocation10 + $0x194] ss:$8 sps:$4 sm:$0xff]  }
 0x349   : > { %v3352_v33 = vmul.f32 1.4285715, %v3256_v30  ;;  %v3287_v44 = vmul.u32 2246822507, %v3279_v46  ;;  %v5349_v1 = vld [vmem:[#allocation10 + $0x1b4] ss:$8 sps:$4 sm:$0xff]  }
 0x34a   : > { %v4680_v14 = vpack.c.bf16 %v3350_v29, %v3346_v12  ;;  %v3267_v55 = vshrl.u32 %v3259_v56, 16  ;;  %v5347_v3 = vld [vmem:[#allocation10 + $0x1b0] ss:$8 sps:$4 sm:$0xff]   ;;  %v5352_v4 = vld [vmem:[#allocation10 + $0x1c4] ss:$8 sps:$4 sm:$0xff]  }
 0x34b   : > { %v4686_v18 = vpack.c.bf16 %v3352_v33, %v3348_v32  ;;  %v3295_v54 = vshrl.u32 %v3287_v44, 13  ;;  %v5350_v9 = vld [vmem:[#allocation10 + $0x1c0] ss:$8 sps:$4 sm:$0xff]   ;;  %v5355_v0 = vld [vmem:[#allocation10 + $0x1d4] ss:$8 sps:$4 sm:$0xff]  }
 0x34c   : > { %4681 = vmatprep.mubr.msk.bf16.mxu0 %vm4679_vm6, %v4680_v14  ;;  %v3275_v45 = vxor.u32 %v3267_v55, %v3259_v56  ;;  %v5353_v13 = vld [vmem:[#allocation10 + $0x1d0] ss:$8 sps:$4 sm:$0xff]   ;;  %v5358_v19 = vld [vmem:[#allocation10 + $0x1e4] ss:$8 sps:$4 sm:$0xff]   ;;  %v5361_v12 = vld [vmem:[#allocation10 + $0x1f4] ss:$8 sps:$4 sm:$0xff]  }
 0x34d   : > { %4684 = vmatmul.mubr.msk.bf16.vlgmr.msra.gmra.mrb[8].mxu0 %vm4682_vm7, %v4683_v27  ;;  %v3303_v2 = vxor.u32 %v3295_v54, %v3287_v44  ;;  %v5359_v30 = vld [vmem:[#allocation10 + $0x1f0] ss:$8 sps:$4 sm:$0xff]   ;;  %v5372_v32 = vld [vmem:[#allocation12 + $0x68] sm:$0xff]   ;;  %v3861_v7 = vxor.u32 2004795789, %v5947_v26 }
 0x34e   : > { %3805 = vmatpush1.bf16.msra.mxu0 %v5314_v17  ;;  %4687 = vmatprep.mubr.msk.bf16.mxu0 %vm4685_vm8, %v4686_v18  ;;  %v3283_v59 = vmul.u32 2246822507, %v3275_v45  ;;  %v5373_v14 = vld [vmem:[#allocation12 + $0x28] sm:$0xff]   ;;  %v5374_v33 = vld [vmem:[#allocation12 + $0x70] sm:$0xff]   ;;  %v5377_v18 = vld [vmem:[#allocation12 + $0x38] sm:$0xff]  }
 0x34f   : > { %3806 = vmatprep.subr.bf16.mxu0 %v5319_v31  ;;  %v3311_v6 = vmul.u32 3266489909, %v3303_v2  ;;  %4731 = vmatprep.subr.bf16.mxu1 %v5372_v32  ;;  %v5375_v17 = vld [vmem:[#allocation12 + $0x30] sm:$0xff]   ;;  %v5376_v31 = vld [vmem:[#allocation12 + $0x78] sm:$0xff]  }
 0x350   : > { %v3291_v51 = vshrl.u32 %v3283_v59, 13  ;;  %4732 = vmatpush3.bf16.msra.mxu1 %v5373_v14 }
 0x351   : > { %v3319_v24 = vshrl.u32 %v3311_v6, 16  ;;  %4733 = vmatprep.subr.bf16.mxu1 %v5374_v33 }
 0x352   : > { %3807 = vmatpush1.bf16.msra.mxu0 %v5317_v34  ;;  %v3299_v48 = vxor.u32 %v3291_v51, %v3283_v59  ;;  %v3860_v34 = vxor.u32 2004795789, %v5935_v20 }
 0x353   : > { %3808 = vmatprep.subr.bf16.mxu0 %v5322_v35  ;;  %v3327_v10 = vxor.u32 %v3319_v24, %v3311_v6  ;;  %v3862_v35 = vxor.u32 2004795789, %v5938_v21 }
 0x354   : > { %v3307_v5 = vmul.u32 3266489909, %v3299_v48  ;;  %4734 = vmatpush3.bf16.msra.mxu1 %v5375_v17  ;;  %v3864_v15 = vshrl.u32 %v3860_v34, 16 }
 0x355   : > { %v3335_v29 = vshrl.u32 %v3327_v10, 8  ;;  %4735 = vmatprep.subr.bf16.mxu1 %v5376_v31 }
 0x356   : > { %3809 = vmatpush1.bf16.msra.mxu0 %v5320_v36  ;;  %v3315_v11 = vshrl.u32 %v3307_v5, 16  ;;  %v3859_v36 = vxor.u32 2004795789, %v5944_v25 }
 0x357   : > { %3810 = vmatprep.subr.bf16.mxu0 %v5325_v37  ;;  %vm3343_vm10 = vcmp.ge.s32.totalorder %v3335_v29, 5033165 }
 0x358   : > { %v3323_v22 = vxor.u32 %v3315_v11, %v3307_v5  ;;  %4736 = vmatpush3.bf16.msra.mxu1 %v5377_v18  ;;  %v3863_v37 = vshrl.u32 %v3859_v36, 16 }
 0x35a   : > { %3811 = vmatpush1.bf16.msra.mxu0 %v5323_v60  ;;  %v3331_v27 = vshrl.u32 %v3323_v22, 8  ;;  %v3865_v60 = vshrl.u32 %v3861_v7, 16 }
 0x35b   : > { %3812 = vmatprep.subr.bf16.mxu0 %v5328_v38  ;;  %v3868_v38 = vxor.u32 %v3864_v15, %v3860_v34 }
 0x35c   : > { %vm3339_vm9 = vcmp.ge.s32.totalorder %v3331_v27, 5033165 }
 0x35d   : > { %vm4688_vm11 = vmpackc.low %vm3343_vm10, %vm3339_vm9 }
 0x35e   : > { %3813 = vmatpush1.bf16.msra.mxu0 %v5326_v52 }
 0x35f   : > { %3814 = vmatprep.subr.bf16.mxu0 %v5331_v39  ;;  %v3867_v39 = vxor.u32 %v3863_v37, %v3859_v36  ;;  %v4691_v36 = vld [vmem:[%s6256_s9] ss:$0 sm:$0xff] }
 0x361   : > { %v3871_v41 = vmul.u32 2246822507, %v3867_v39 }
 0x362   : > { %3815 = vmatpush1.bf16.msra.mxu0 %v5329_v53  ;;  %v3869_v53 = vxor.u32 %v3865_v60, %v3861_v7 }
 0x363   : > { %3816 = vmatprep.subr.bf16.mxu0 %v5334_v40  ;;  %v3872_v40 = vmul.u32 2246822507, %v3868_v38  ;;  %v3875_v55 = vshrl.u32 %v3871_v41, 13 }
 0x366   : > { %3817 = vmatpush1.bf16.msra.mxu0 %v5332_v42  ;;  %v3873_v42 = vmul.u32 2246822507, %v3869_v53 }
 0x367   : > { %3818 = vmatprep.subr.bf16.mxu0 %v5337_v8  ;;  %v3876_v8 = vshrl.u32 %v3872_v40, 13 }
 0x368   : > { %v3877_v21 = vshrl.u32 %v3873_v42, 13 }
 0x369   : > { %v3880_v57 = vxor.u32 %v3876_v8, %v3872_v40 }
 0x36a   : > { %3819 = vmatpush1.bf16.msra.mxu0 %v5335_v16  ;;  %v3879_v16 = vxor.u32 %v3875_v55, %v3871_v41  ;;  %v3881_v26 = vxor.u32 %v3877_v21, %v3873_v42 }
 0x36b   : > { %3820 = vmatprep.subr.bf16.mxu0 %v5340_v43  ;;  %v3884_v43 = vmul.u32 3266489909, %v3880_v57 }
 0x36c   : > { %v3883_v46 = vmul.u32 3266489909, %v3879_v16 }
 0x36d   : > { %v3888_v59 = vshrl.u32 %v3884_v43, 16 }
 0x36e   : > { %3821 = vmatpush1.bf16.msra.mxu0 %v5338_v47  ;;  %v3885_v47 = vmul.u32 3266489909, %v3881_v26 }
 0x36f   : > { %3822 = vmatprep.subr.bf16.mxu0 %v5343_v49  ;;  %v3429_v49 = vld [vmem:[%s6254_s7] sm:$0x3] }
 0x370   : > { %v3434_v51 = vrot.slane %v3429_v49, %v5956_v58  ;;  %v3438_v54 = vrot.slane %v3429_v49, %v5967_v61 }
 0x372   : > { %3823 = vmatpush1.bf16.msra.mxu0 %v5341_v63  ;;  %v3887_v63 = vshrl.u32 %v3883_v46, 16 }
 0x373   : > { %3824 = vmatprep.subr.bf16.mxu0 %v5346_v50  ;;  %v3889_v50 = vshrl.u32 %v3885_v47, 16 }
 0x374   : > { %v3891_v48 = vxor.u32 %v3887_v63, %v3883_v46 }
 0x376   : > { %3825 = vmatpush1.bf16.msra.mxu0 %v5344_v62  ;;  %v3892_v62 = vxor.u32 %v3888_v59, %v3884_v43  ;;  %v3895_v22 = vshrl.u32 %v3891_v48, 8 }
 0x377   : > { %3826 = vmatprep.subr.bf16.mxu0 %v5349_v1 }
 0x378   : > { %vm3899_vm2 = vcmp.ge.s32.totalorder %v3895_v22, 5033165 }
 0x37a   : > { %3827 = vmatpush1.bf16.msra.mxu0 %v5347_v3  ;;  %v3893_v3 = vxor.u32 %v3889_v50, %v3885_v47 }
 0x37b   : > { %3828 = vmatprep.subr.bf16.mxu0 %v5352_v4 }
 0x37c   : > { %v3897_v61 = vshrl.u32 %v3893_v3, 8 }
 0x37e   : > { %3829 = vmatpush1.bf16.msra.mxu0 %v5350_v9  ;;  %vm3901_vm3 = vcmp.ge.s32.totalorder %v3897_v61, 5033165 }
 0x37f   : > { %3830 = vmatprep.subr.bf16.mxu0 %v5355_v0  ;;  %v3896_v0 = vshrl.u32 %v3892_v62, 8  ;;  %vm4711_vm5 = vmpackc.low %vm3901_vm3, %vm3899_vm2 }
 0x381   : > { %vm3900_vm0 = vcmp.ge.s32.totalorder %v3896_v0, 5033165 }
 0x382   : > { %3831 = vmatpush1.bf16.msra.mxu0 %v5353_v13 }
 0x383   : > { %3832 = vmatprep.subr.bf16.mxu0 %v5358_v19 }
 0x386   : > { %3833 = vmatpush1.bf16.msra.mxu0 %v5356_v23 }
 0x387   : > { %3834 = vmatprep.subr.bf16.mxu0 %v5361_v12 }
 0x38a   : > { %3835 = vmatpush1.bf16.msra.mxu0 %v5359_v30 }
 0x38d   : > { %4690 = vmatmul.mubr.msk.bf16.vlgmr.msra.gmra.mrb[8].mxu0 %vm4688_vm11, %v4689_v28  ;;  %v3866_v28 = vshrl.u32 %v3862_v35, 16 }
 0x38f   : > { %v3870_v52 = vxor.u32 %v3866_v28, %v3862_v35 }
 0x391   : > { %v3874_v56 = vmul.u32 2246822507, %v3870_v52 }
 0x393   : > { %v3878_v20 = vshrl.u32 %v3874_v56, 13 }
 0x395   : > { %v3882_v25 = vxor.u32 %v3878_v20, %v3874_v56 }
 0x397   : > { %v3886_v45 = vmul.u32 3266489909, %v3882_v25 }
 0x399   : > { %v3890_v44 = vshrl.u32 %v3886_v45, 16 }
 0x39b   : > { %v3894_v1 = vxor.u32 %v3890_v44, %v3886_v45 }
 0x39d   : > { %v3898_v11 = vshrl.u32 %v3894_v1, 8 }
 0x39f   : > { %vm3902_vm1 = vcmp.ge.s32.totalorder %v3898_v11, 5033165 }
 0x3a0   : > { %vm4708_vm4 = vmpackc.low %vm3902_vm1, %vm3900_vm0 }
 0x460   : > { %v3838_v2 = vpop.f32.mrb[8].mxu0 }
 0x461   : > { %v4751_v4 = vadd.f32 %v3838_v2, %v3434_v51  ;;  %v3840_v5 = vpop.f32.mrb[9].mxu0 }
 0x462   : > { %v4752_v6 = vadd.f32 %v3840_v5, %v3438_v54  ;;  %v3842_v9 = vpop.f32.mrb[10].mxu0 }
 0x463   : > { %vm3847_vm12 = vcmp.gt.f32.partialorder %v4751_v4, 0.0  ;;  %v3851_v24 = vmul.f32 0.2, %v4751_v4  ;;  %v4753_v13 = vadd.f32 %v3842_v9, %v3434_v51  ;;  %v3844_v19 = vpop.f32.mrb[11].mxu0 }
 0x464   : > { %vm3848_vm13 = vcmp.gt.f32.partialorder %v4752_v6, 0.0  ;;  %v3852_v58 = vmul.f32 0.2, %v4752_v6  ;;  %v4754_v10 = vadd.f32 %v3844_v19, %v3438_v54 }
 0x465   : > { %v3855_v23 = vsel %vm3847_vm12, %v4751_v4, %v3851_v24  ;;  %vm3849_vm14 = vcmp.gt.f32.partialorder %v4753_v13, 0.0  ;;  %v3853_v12 = vmul.f32 0.2, %v4753_v13 }
 0x466   : > { %v3856_v27 = vsel %vm3848_vm13, %v4752_v6, %v3852_v58  ;;  %vm3850_vm15 = vcmp.gt.f32.partialorder %v4754_v10, 0.0  ;;  %v3854_v29 = vmul.f32 0.2, %v4754_v10  ;;  %v3903_v32 = vmul.f32 1.4285715, %v3855_v23 }
 0x467   : > { %v3857_v30 = vsel %vm3849_vm14, %v4753_v13, %v3853_v12  ;;  %v3904_v17 = vmul.f32 1.4285715, %v3856_v27 }
 0x468   : > { %v3905_v14 = vmul.f32 1.4285715, %v3857_v30  ;;  %v3858_v33 = vsel %vm3850_vm15, %v4754_v10, %v3854_v29 }
 0x469   : > { %v3906_v31 = vmul.f32 1.4285715, %v3858_v33 }
 0x46a   : > { %v4712_v18 = vpack.c.bf16 %v3905_v14, %v3903_v32 }
 0x46b   : > { %v4709_v34 = vpack.c.bf16 %v3906_v31, %v3904_v17 }
 0x46d   : > { %4710 = vmatprep.mubr.msk.bf16.mxu1 %vm4708_vm4, %v4709_v34 }
 0x46e   : > { %4713 = vmatmul.mubr.msk.bf16.vlgmr.msra.gmra.mrb[16].mxu1 %vm4711_vm5, %v4712_v18 }
 0x541   : > { %v4737_v35 = vpop.f32.mrb[16].mxu1 }
 0x542   : > { %v4738_v7 = vpop.f32.mrb[17].mxu1 }
 0x543   : > { %v4739_v15 = vadd.f32 %v4738_v7, %v4737_v35  ;;  %v4740_v28 = vpop.f32.mrb[18].mxu1 }
 0x544   : > { %v4741_v37 = vpop.f32.mrb[19].mxu1 }
 0x545   : > { %v4083_v60 = vadd.f32 %v4739_v15, %v4691_v36  ;;  %v4742_v38 = vadd.f32 %v4741_v37, %v4740_v28 }
 0x547   : > { %v4089_v52 = vsub.f32 0.0, %v4083_v60  ;;  %v4086_v39 = vadd.f32 %v4742_v38, %v4691_v36 }
 0x549   : > { %v4091_v53 = vmul.f32 1.442695, %v4089_v52  ;;  %v4090_v40 = vsub.f32 0.0, %v4086_v39 }
 0x54b   : > { %5378 = vpow2.f32 %v4091_v53  ;;  %v4093_v56 = vmul.f32 1.442695, %v4090_v40 }
 0x54d   : > { %5380 = vpow2.f32 %v4093_v56 }
 0x555   : > { %v5379_v41 = vpop.eup %5378 }
 0x556   : > { %v4095_v42 = vadd.f32 1.0, %v5379_v41 }
 0x557   : > { %v5381_v8 = vpop.eup %5380 }
 0x558   : > { %5382 = vrcp.f32 %v4095_v42  ;;  %v4096_v20 = vadd.f32 1.0, %v5381_v8 }
 0x55a   : > { %5384 = vrcp.f32 %v4096_v20 }
 0x562   : > { %v5383_v55 = vpop.eup %5382 }
 0x563   : > { %4101 = vst [vmem:[%s410_s14] sm:$0xff] %v5383_v55 }
 0x564   : > { %v5385_v21 = vpop.eup %5384 }
 0x565   : > { %4102 = vst [vmem:[%s410_s14 + $0x8] sm:$0xff] %v5385_v21 }
 0x566   : > { %5541 = shalt.err (!%p5538_p13)
}
 0x567   : > { %s5542_s19 = scalar_lea.hbm %s6201_s13, 256  ;;  %s5546_s23 = scalar_lea.hbm %s6257_s10, 512 }
 0x568   : > { %p5543_p9 = scmp.ne.s32.totalorder %s6201_s13, %s5542_s19  ;;  %p5547_p4 = scmp.lt.u32.totalorder %s6201_s13, %s6257_s10 }
 0x569   : > { %p5548_p8 = scmp.lt.u32.totalorder %s5546_s23, %s5542_s19  ;;  %p5550_p10 = scmp.lt.u32.totalorder %s5542_s19, %s6201_s13 }
 0x56a   : > { %p5544_p0 = pnand %p5543_p9, %p5841_p3 }
 0x56b   : > { %p5549_p6 = por %p5548_p8, %p5547_p4 }
 0x56c   : > { %p5545_p11 = pneg %p5544_p0 }
 0x56d   : > { %p5551_p5 = por %p5550_p10, %p5549_p6 }
 0x56f   : > { %p5552_p7 = pnand %p5551_p5, %p5545_p11 }
 0x571   : > { %5555 = shalt.err (!%p5552_p7)
}
 0x572   : > { %s5619_s22 = smov 128   ;;  %s5620_s21 = smov 8  }
 0x573   : > { %4801 = dma.vmem_to_hbm [thread:$0]  (%p5841_p3), %s6203_s20, 256, %s6201_s13, %s4104_s27, %s5619_s22, %s5619_s22, %s5620_s21  }
 0x574 PF: > { %s6319_s15 = sld [smem:[#allocation18_spill]]  ;;  %s6320_s0 = sld [smem:[#allocation19_spill]] }
 0x575   : > { %p6322_p2 = scmp.ge.s32.totalorder %s5602_s18, 2 }
 0x57a   : > { %s4132_s2 = sand.u32 1, %s6319_s15   ;;  %p6321_p12 = scmp.ne.s32.totalorder %s6320_s0, 0 }
 0x57b   : > { %s4133_s28 = scalar_lea.sflag [#allocation6], %s4132_s2 }
 0x57c   : > { %p4821_p1 = pnand %p6322_p2, %p6321_p12 }
 0x57e   : > { %5585 = dma.done.wait (!%p4821_p1), %s4133_s28, 256  }
 0x57f   : > { %5587 = vsyncadd (!%p4821_p1), %s4133_s28, 4294967040  ;;  %p26_p13 = scmp.ge.s32.totalorder %s5828_s26, 4   ;;  %s6323_s15 = smov %s5594_s16 }
 0x580   : > { %s6324_s16 = smov %s5598_s17  ;;  %s6325_s17 = smov %s5837_s12 }
 0x581   : > { %s6326_s18 = smov %s5828_s26  ;;  %28 = sbr.rel (!%p26_p13) target bundleno = 10 (0xa), region = 117 }
 0x588   :  { %4138 = vsyncpa [#allocation5], 1 }
 0x589   :  { %4140 = vsyncpa [#allocation5 + $0x1], 1 }
 0x58a   :  { %4141 = vsyncpa [#allocation8], 1 }
 0x58b   :  { %4142 = vsyncpa [#allocation11], 1 }
 0x58c   :  { %4143 = vsyncpa [#allocation6], 1 }
 0x58d   :  { %4145 = vsyncpa [#allocation6 + $0x1], 1 }

</bundles_post_ra>
